<compile_context>
chip_gen: v7x
topology: tpu7x:2x2x1
jax: 0.10.0
libtpu: 0.0.40
codegen_flags: <defaults>
</compile_context>

<pallas_src>
import math

import jax
import jax.numpy as jnp
from jax.experimental import pallas as pl
from jax.experimental.pallas import tpu as pltpu

NUM_HEADS = 2
LN_EPS = 1e-5
NEG_INF = -1e30

# Slab indices inside the packed weight/bias arrays.  Each weight slab is E rows
# of `wmat` (pre-transposed so the kernel computes x @ slab), each bias is one
# row of `bvec`.  Per-head Q/K/V slabs are full-width with the other head's
# columns zeroed, with the attention scale folded into the Q slabs.
SLAB_Q0 = 0            # module 0 (self-attn), head h uses slabs Q0+3h .. Q0+3h+2
SLAB_WO0 = 6
SLAB_WV1 = 7           # module 1 (anomaly->global): only V + out-proj needed
SLAB_WO1 = 8
SLAB_Q2 = 9            # module 2 (global->anomaly), head h uses Q2+3h .. Q2+3h+2
SLAB_WO2 = 15
N_SLABS = 16


# ---------------------------------------------------------------------------
# in-kernel math helpers
# ---------------------------------------------------------------------------
def _layer_norm(x, gamma, beta):
    # x: (rows, E); gamma/beta: (1, E)
    mu = jnp.mean(x, axis=-1, keepdims=True)
    var = jnp.mean((x - mu) ** 2, axis=-1, keepdims=True)
    return (x - mu) * jax.lax.rsqrt(var + LN_EPS) * gamma + beta


def _proj(x, w_ref, b_ref, idx, E):
    """y = x @ wmat[idx] + bvec[idx]; slab loads are vreg-aligned row slices."""
    w = w_ref[idx * E:(idx + 1) * E, :]        # (E, E) static row-slab view
    b = b_ref[idx:idx + 1, :]                  # (1, E)
    return jnp.dot(x, w, preferred_element_type=jnp.float32) + b


def _attend(q_src, kv_src, mask, qkv_base, wo_idx, w_ref, b_ref, E):
    """Block-diagonal multi-head attention on flattened 2D activations.

    Per-head Q/K/V projections come from zero-masked full-width weight slabs,
    so the score / PV matmuls contract the full E width (cross-head terms are
    exact zeros) and no hd-wide lane slices are needed anywhere.
    """
    o_sum = None
    for h in range(NUM_HEADS):
        base = qkv_base + 3 * h
        qh = _proj(q_src, w_ref, b_ref, base + 0, E)   # (Rq, E), scale folded
        kh = _proj(kv_src, w_ref, b_ref, base + 1, E)  # (Rk, E)
        vh = _proj(kv_src, w_ref, b_ref, base + 2, E)  # (Rk, E)
        # scores = qh @ kh^T without materializing a transpose
        s = jax.lax.dot_general(qh, kh, (((1,), (1,)), ((), ())),
                                preferred_element_type=jnp.float32)
        s = s + mask
        s = s - jnp.max(s, axis=-1, keepdims=True)
        p = jnp.exp(s)
        p = p * pl.reciprocal(jnp.sum(p, axis=-1, keepdims=True))
        oh = jnp.dot(p, vh, preferred_element_type=jnp.float32)   # (Rq, E)
        o_sum = oh if o_sum is None else o_sum + oh   # head outputs occupy
        #                                              disjoint (zeroed) columns
    return _proj(o_sum, w_ref, b_ref, wo_idx, E)       # out projection + bias


# ---------------------------------------------------------------------------
# Pallas kernel: TB batch elements per grid step
# ---------------------------------------------------------------------------
def mca_kernel(anom_ref, glob_ref, ln_ref, w_ref, b_ref, cls_w_ref, cls_b_ref,
               o_ref):
    R, E = anom_ref.shape          # R = TB * S anomaly-token rows
    TB = glob_ref.shape[0]
    S = R // TB
    f32 = jnp.float32

    anom = anom_ref[...]           # (R, E)
    glob = glob_ref[...]           # (TB, E)

    ln = ln_ref[...]               # (4, E): [gamma_a, beta_a, gamma_g, beta_g]
    anom_norm = _layer_norm(anom, ln[0:1, :], ln[1:2, :])
    glob_norm = _layer_norm(glob, ln[2:3, :], ln[3:4, :])

    # --- block-diagonal masks / expand / pool built in-kernel (no HBM inputs).
    #     Batch membership of token row r w.r.t. batch b is  b*S <= r < (b+1)*S,
    #     so no integer division is needed.
    r_idx = jax.lax.broadcasted_iota(jnp.int32, (R, TB), 0)
    b_s = jax.lax.broadcasted_iota(jnp.int32, (R, TB), 1) * S
    expand01 = jnp.where((r_idx >= b_s) & (r_idx < b_s + S),
                         1.0, 0.0).astype(f32)                     # (R, TB)
    c_idx = jax.lax.broadcasted_iota(jnp.int32, (TB, R), 1)
    q_s = jax.lax.broadcasted_iota(jnp.int32, (TB, R), 0) * S
    member01 = jnp.where((c_idx >= q_s) & (c_idx < q_s + S),
                         1.0, 0.0).astype(f32)                     # (TB, R)
    mask_cross = jnp.where(member01 > 0.5, 0.0, NEG_INF)           # (TB, R)
    block01 = jnp.dot(expand01, member01, preferred_element_type=f32)  # (R, R)
    mask_self = jnp.where(block01 > 0.5, 0.0, NEG_INF)             # (R, R)
    pool = member01 * (1.0 / S)    # mean-pool weights folded into the matrix

    # --- module 0: self-attention over the 5 anomaly tokens (all TB at once) ---
    sa = _attend(anom_norm, anom_norm, mask_self, SLAB_Q0, SLAB_WO0,
                 w_ref, b_ref, E)                                   # (R, E)
    anom_sa = anom + sa

    # --- module 1: anomaly -> global cross attention.  Key length == 1, so the
    #     softmax is identically 1 and the output is just the projected global
    #     value, broadcast to the 5 queries of each batch element (exact). ---
    v1 = _proj(glob_norm, w_ref, b_ref, SLAB_WV1, E)                # (TB, E)
    a2g = _proj(v1, w_ref, b_ref, SLAB_WO1, E)                      # (TB, E)
    enhanced_anom = anom_sa + jnp.dot(expand01, a2g,
                                      preferred_element_type=f32)   # (R, E)

    # --- module 2: global -> anomaly cross attention (1 query per element) ---
    g2a = _attend(glob_norm, enhanced_anom, mask_cross, SLAB_Q2, SLAB_WO2,
                  w_ref, b_ref, E)                                  # (TB, E)
    enhanced_glob = glob + g2a

    # --- mean pool via 0/(1/S) matmul, split classifier (no concat), sigmoid ---
    pooled = jnp.dot(pool, enhanced_anom, preferred_element_type=f32)  # (TB, E)
    logits = (jnp.dot(pooled, cls_w_ref[0:E, :], preferred_element_type=f32)
              + jnp.dot(enhanced_glob, cls_w_ref[E:2 * E, :],
                        preferred_element_type=f32)
              + cls_b_ref[...])                                     # (TB, LP)
    o_ref[...] = jax.nn.sigmoid(logits)


# ---------------------------------------------------------------------------
# wrapper
# ---------------------------------------------------------------------------
def _pick_tb(Bp):
    """One grid step per TensorCore: grid=1 on single-core chips (v5e/v6e),
    grid=2 balanced across the two TensorCores on v7x."""
    kind = ""
    try:
        kind = jax.devices()[0].device_kind.lower()
    except Exception:
        pass
    if "v7" in kind and Bp % 16 == 0:
        return Bp // 2
    return Bp


def mutual_cross_attention(anomaly_feature, global_image_feature, params, tb=None):
    B, S, E = anomaly_feature.shape
    L = params["num_labels"]
    LP = params["cls_b"].shape[-1]

    # pad batch to a multiple of 8 (sublane granularity of the output block)
    Bp = ((B + 7) // 8) * 8
    if tb is None:
        tb = _pick_tb(Bp)
    assert tb % 8 == 0 and Bp % tb == 0, (tb, Bp)
    if Bp != B:
        pad = Bp - B
        anomaly_feature = jnp.pad(anomaly_feature, ((0, pad), (0, 0), (0, 0)))
        global_image_feature = jnp.pad(global_image_feature, ((0, pad), (0, 0)))

    R = tb * S
    anom_flat = anomaly_feature.reshape(Bp * S, E)
    glob = global_image_feature.reshape(Bp, E)

    n_w = params["wmat"].shape[0]
    n_b = params["bvec"].shape[0]

    # TODO(synk): for production embed_dim, cast weight slabs to bf16 (f32 acc),
    # mark the constant weight specs pipeline_mode=pl.Buffered(1) and set
    # vmem_limit_bytes explicitly for v7x's 64 MiB VMEM.
    in_specs = [
        pl.BlockSpec((R, E), lambda b: (b, 0)),          # anomaly token rows
        pl.BlockSpec((tb, E), lambda b: (b, 0)),         # global token rows
        pl.BlockSpec((4, E), lambda b: (0, 0)),          # LayerNorm gammas/betas
        pl.BlockSpec((n_w, E), lambda b: (0, 0)),        # packed weight slabs
        pl.BlockSpec((n_b, E), lambda b: (0, 0)),        # packed bias rows
        pl.BlockSpec((2 * E, LP), lambda b: (0, 0)),     # classifier W (split)
        pl.BlockSpec((1, LP), lambda b: (0, 0)),         # classifier bias
    ]
    out_specs = pl.BlockSpec((tb, LP), lambda b: (b, 0))

    out = pl.pallas_call(
        mca_kernel,
        grid=(Bp // tb,),
        in_specs=in_specs,
        out_specs=out_specs,
        out_shape=jax.ShapeDtypeStruct((Bp, LP), jnp.float32),
        compiler_params=pltpu.CompilerParams(
            dimension_semantics=("parallel",)),
    )(anom_flat, glob, params["ln"], params["wmat"], params["bvec"],
      params["cls_w"], params["cls_b"])

    return out[:B, :L]


# ---------------------------------------------------------------------------
# parameter construction (PyTorch module shapes) + kernel repacking
# ---------------------------------------------------------------------------
def make_raw_params(key, embed_dim, num_labels):
    E = embed_dim
    ks = jax.random.split(key, 8)
    s = 0.05
    return {
        # LayerNorms: [0] = anomaly_norm, [1] = global_norm
        "ln_w": 1.0 + s * jax.random.normal(ks[0], (2, E), jnp.float32),
        "ln_b": s * jax.random.normal(ks[1], (2, E), jnp.float32),
        # 3 MultiheadAttention modules: [0]=self, [1]=anomaly->global, [2]=global->anomaly
        "in_proj_w": s * jax.random.normal(ks[2], (3, 3 * E, E), jnp.float32),
        "in_proj_b": s * jax.random.normal(ks[3], (3, 3 * E), jnp.float32),
        "out_proj_w": s * jax.random.normal(ks[4], (3, E, E), jnp.float32),
        "out_proj_b": s * jax.random.normal(ks[5], (3, E), jnp.float32),
        # classifier nn.Linear(2E, num_labels)
        "cls_w": s * jax.random.normal(ks[6], (num_labels, 2 * E), jnp.float32),
        "cls_b": s * jax.random.normal(ks[7], (num_labels,), jnp.float32),
    }


def pack_params(raw):
    E = raw["ln_w"].shape[-1]
    hd = E // NUM_HEADS
    scale = 1.0 / math.sqrt(hd)
    L = int(raw["cls_b"].shape[0])
    LP = ((L + 127) // 128) * 128

    def head_col_mask(h):
        return jnp.zeros((E,), jnp.float32).at[h * hd:(h + 1) * hd].set(1.0)

    w_slabs, b_rows = [], []

    def add_headed_module(m):
        Wi, bi = raw["in_proj_w"][m], raw["in_proj_b"][m]
        WqT, WkT, WvT = Wi[:E].T, Wi[E:2 * E].T, Wi[2 * E:].T
        bq, bk, bv = bi[:E], bi[E:2 * E], bi[2 * E:]
        for h in range(NUM_HEADS):
            cm = head_col_mask(h)
            # per-head zero-masked, full-width slabs; attention scale folded into Q
            w_slabs.extend([WqT * (cm * scale)[None, :],
                            WkT * cm[None, :],
                            WvT * cm[None, :]])
            b_rows.extend([bq * cm * scale, bk * cm, bv * cm])

    def add_plain(WT, b):
        w_slabs.append(WT)
        b_rows.append(b)

    # module 0 (self attention): heads, then out-proj          -> slabs 0..6
    add_headed_module(0)
    add_plain(raw["out_proj_w"][0].T, raw["out_proj_b"][0])
    # module 1 (anomaly->global, key length 1): V + out-proj   -> slabs 7..8
    add_plain(raw["in_proj_w"][1][2 * E:].T, raw["in_proj_b"][1][2 * E:])
    add_plain(raw["out_proj_w"][1].T, raw["out_proj_b"][1])
    # module 2 (global->anomaly): heads, then out-proj         -> slabs 9..15
    add_headed_module(2)
    add_plain(raw["out_proj_w"][2].T, raw["out_proj_b"][2])

    wmat = jnp.concatenate(w_slabs, axis=0)                 # (N_SLABS*E, E)
    bvec = jnp.stack(b_rows, axis=0)                        # (N_SLABS, E)
    assert wmat.shape == (N_SLABS * E, E) and bvec.shape == (N_SLABS, E)

    ln = jnp.stack([raw["ln_w"][0], raw["ln_b"][0],
                    raw["ln_w"][1], raw["ln_b"][1]], axis=0)  # (4, E)

    cls_w = jnp.zeros((2 * E, LP), jnp.float32)
    cls_w = cls_w.at[:E, :L].set(raw["cls_w"][:, :E].T)       # pooled half
    cls_w = cls_w.at[E:, :L].set(raw["cls_w"][:, E:].T)       # global half
    cls_b = jnp.zeros((1, LP), jnp.float32).at[:, :L].set(raw["cls_b"][None, :])

    return {"ln": ln, "wmat": wmat, "bvec": bvec,
            "cls_w": cls_w, "cls_b": cls_b, "num_labels": L}


# ---------------------------------------------------------------------------
# faithful pure-JAX reference of the PyTorch module (independent of packing)
# ---------------------------------------------------------------------------
def _layer_norm_ref(x, g, b):
    mu = x.mean(-1, keepdims=True)
    var = ((x - mu) ** 2).mean(-1, keepdims=True)
    return (x - mu) * jax.lax.rsqrt(var + LN_EPS) * g + b


def _mha_ref(q, k, v, in_w, in_b, out_w, out_b):
    E = q.shape[-1]
    hd = E // NUM_HEADS
    Q = q @ in_w[:E].T + in_b[:E]
    K = k @ in_w[E:2 * E].T + in_b[E:2 * E]
    V = v @ in_w[2 * E:].T + in_b[2 * E:]
    heads = []
    for h in range(NUM_HEADS):
        sl = slice(h * hd, (h + 1) * hd)
        s = (Q[:, sl] / math.sqrt(hd)) @ K[:, sl].T
        s = s - jnp.max(s, axis=-1, keepdims=True)
        p = jnp.exp(s)
        p = p / jnp.sum(p, axis=-1, keepdims=True)
        heads.append(p @ V[:, sl])
    o = jnp.concatenate(heads, axis=-1)
    return o @ out_w.T + out_b


def reference(anomaly_feature, global_image_feature, raw):
    def one(anom, glob):
        an = _layer_norm_ref(anom, raw["ln_w"][0], raw["ln_b"][0])
        sa = _mha_ref(an, an, an, raw["in_proj_w"][0], raw["in_proj_b"][0],
                      raw["out_proj_w"][0], raw["out_proj_b"][0])
        anom_sa = anom + sa
        gn = _layer_norm_ref(glob, raw["ln_w"][1], raw["ln_b"][1])
        a2g = _mha_ref(anom_sa, gn, gn, raw["in_proj_w"][1], raw["in_proj_b"][1],
                       raw["out_proj_w"][1], raw["out_proj_b"][1])
        enhanced_anom = anom_sa + a2g
        g2a = _mha_ref(gn, enhanced_anom, enhanced_anom,
                       raw["in_proj_w"][2], raw["in_proj_b"][2],
                       raw["out_proj_w"][2], raw["out_proj_b"][2])
        enhanced_glob = glob + g2a
        pooled = enhanced_anom.mean(axis=0)
        feat = jnp.concatenate([pooled, enhanced_glob[0]], axis=-1)
        logits = feat @ raw["cls_w"].T + raw["cls_b"]
        return jax.nn.sigmoid(logits)

    return jax.vmap(lambda a, g: one(a, g[None, :]))(
        anomaly_feature, global_image_feature)


# ---------------------------------------------------------------------------
if __name__ == "__main__":
    # batch=16, anomaly seq = 5 (fixed by the module), embed_dim=32, labels=14
    B, S, E, L = 16, 5, 32, 14

    key = jax.random.PRNGKey(0)
    k_a, k_g, k_p = jax.random.split(key, 3)
    anomaly_feature = jax.random.normal(k_a, (B, S, E), jnp.float32)
    global_image_feature = jax.random.normal(k_g, (B, E), jnp.float32)

    raw = make_raw_params(k_p, E, L)
    params = pack_params(raw)

    out = mutual_cross_attention(anomaly_feature, global_image_feature, params)
    out = jax.block_until_ready(out)

    ref = reference(anomaly_feature, global_image_feature, raw)
    assert out.shape == (B, L), out.shape
    max_err = float(jnp.max(jnp.abs(out - ref)))
    # scale-folding / reciprocal change only last-bit rounding vs the reference
    assert max_err < 5e-5, max_err

    print("KERNEL_OK")
</pallas_src>

<mosaic_0001>
module attributes {stable_mosaic.version = 11 : i64} {
  func.func @mca_kernel(%arg0: i32, %arg1: memref<80x32xf32, #tpu.memory_space<vmem>>, %arg2: memref<16x32xf32, #tpu.memory_space<vmem>>, %arg3: memref<4x32xf32, #tpu.memory_space<vmem>>, %arg4: memref<512x32xf32, #tpu.memory_space<vmem>>, %arg5: memref<16x32xf32, #tpu.memory_space<vmem>>, %arg6: memref<64x128xf32, #tpu.memory_space<vmem>>, %arg7: memref<1x128xf32, #tpu.memory_space<vmem>>, %arg8: memref<16x128xf32, #tpu.memory_space<vmem>>) attributes {dimension_semantics = [#tpu.dimension_semantics<parallel>], iteration_bounds = array<i64: 1>, scalar_prefetch = 0 : i64, scratch_operands = 0 : i64, tpu.core_type = #tpu.core_type<tc>, window_params = [{transform_indices = @transform_0, window_bounds = array<i64: 80, 32>}, {transform_indices = @transform_1, window_bounds = array<i64: 16, 32>}, {pipeline_mode = #tpu.pipeline_mode<synchronous>, transform_indices = @transform_2, window_bounds = array<i64: 4, 32>}, {pipeline_mode = #tpu.pipeline_mode<synchronous>, transform_indices = @transform_3, window_bounds = array<i64: 512, 32>}, {pipeline_mode = #tpu.pipeline_mode<synchronous>, transform_indices = @transform_4, window_bounds = array<i64: 16, 32>}, {pipeline_mode = #tpu.pipeline_mode<synchronous>, transform_indices = @transform_5, window_bounds = array<i64: 64, 128>}, {pipeline_mode = #tpu.pipeline_mode<synchronous>, transform_indices = @transform_6, window_bounds = array<i64: 1, 128>}, {transform_indices = @transform_7, window_bounds = array<i64: 16, 128>}]} {
    %c0 = arith.constant 0 : index
    %c0_0 = arith.constant 0 : index
    %0 = vector.load %arg1[%c0, %c0_0] : memref<80x32xf32, #tpu.memory_space<vmem>>, vector<80x32xf32>
    %c0_1 = arith.constant 0 : index
    %c0_2 = arith.constant 0 : index
    %1 = vector.load %arg2[%c0_1, %c0_2] : memref<16x32xf32, #tpu.memory_space<vmem>>, vector<16x32xf32>
    %c0_3 = arith.constant 0 : index
    %c0_4 = arith.constant 0 : index
    %2 = vector.load %arg3[%c0_3, %c0_4] : memref<4x32xf32, #tpu.memory_space<vmem>>, vector<4x32xf32>
    %3 = vector.extract_strided_slice %2 {offsets = [0, 0], sizes = [1, 32], strides = [1, 1]} : vector<4x32xf32> to vector<1x32xf32>
    %4 = vector.extract_strided_slice %2 {offsets = [1, 0], sizes = [1, 32], strides = [1, 1]} : vector<4x32xf32> to vector<1x32xf32>
    %cst = arith.constant dense<0.000000e+00> : vector<80xf32>
    %5 = vector.multi_reduction <add>, %0, %cst [1] : vector<80x32xf32> to vector<80xf32>
    %6 = vector.shape_cast %5 : vector<80xf32> to vector<80x1xf32>
    %cst_5 = arith.constant 3.200000e+01 : f32
    %7 = vector.broadcast %cst_5 : f32 to vector<80x1xf32>
    %8 = arith.divf %6, %7 : vector<80x1xf32>
    %9 = vector.broadcast %8 : vector<80x1xf32> to vector<80x32xf32>
    %10 = arith.subf %0, %9 : vector<80x32xf32>
    %11 = arith.mulf %10, %10 : vector<80x32xf32>
    %cst_6 = arith.constant dense<0.000000e+00> : vector<80xf32>
    %12 = vector.multi_reduction <add>, %11, %cst_6 [1] : vector<80x32xf32> to vector<80xf32>
    %13 = vector.shape_cast %12 : vector<80xf32> to vector<80x1xf32>
    %cst_7 = arith.constant 3.200000e+01 : f32
    %14 = vector.broadcast %cst_7 : f32 to vector<80x1xf32>
    %15 = arith.divf %13, %14 : vector<80x1xf32>
    %16 = vector.broadcast %8 : vector<80x1xf32> to vector<80x32xf32>
    %17 = arith.subf %0, %16 : vector<80x32xf32>
    %cst_8 = arith.constant 9.99999974E-6 : f32
    %18 = vector.broadcast %cst_8 : f32 to vector<80x1xf32>
    %19 = arith.addf %15, %18 : vector<80x1xf32>
    %20 = math.rsqrt %19 : vector<80x1xf32>
    %21 = vector.broadcast %20 : vector<80x1xf32> to vector<80x32xf32>
    %22 = arith.mulf %17, %21 : vector<80x32xf32>
    %23 = vector.broadcast %3 : vector<1x32xf32> to vector<80x32xf32>
    %24 = arith.mulf %22, %23 : vector<80x32xf32>
    %25 = vector.broadcast %4 : vector<1x32xf32> to vector<80x32xf32>
    %26 = arith.addf %24, %25 : vector<80x32xf32>
    %27 = vector.extract_strided_slice %2 {offsets = [2, 0], sizes = [1, 32], strides = [1, 1]} : vector<4x32xf32> to vector<1x32xf32>
    %28 = vector.extract_strided_slice %2 {offsets = [3, 0], sizes = [1, 32], strides = [1, 1]} : vector<4x32xf32> to vector<1x32xf32>
    %cst_9 = arith.constant dense<0.000000e+00> : vector<16xf32>
    %29 = vector.multi_reduction <add>, %1, %cst_9 [1] : vector<16x32xf32> to vector<16xf32>
    %30 = vector.shape_cast %29 : vector<16xf32> to vector<16x1xf32>
    %cst_10 = arith.constant 3.200000e+01 : f32
    %31 = vector.broadcast %cst_10 : f32 to vector<16x1xf32>
    %32 = arith.divf %30, %31 : vector<16x1xf32>
    %33 = vector.broadcast %32 : vector<16x1xf32> to vector<16x32xf32>
    %34 = arith.subf %1, %33 : vector<16x32xf32>
    %35 = arith.mulf %34, %34 : vector<16x32xf32>
    %cst_11 = arith.constant dense<0.000000e+00> : vector<16xf32>
    %36 = vector.multi_reduction <add>, %35, %cst_11 [1] : vector<16x32xf32> to vector<16xf32>
    %37 = vector.shape_cast %36 : vector<16xf32> to vector<16x1xf32>
    %cst_12 = arith.constant 3.200000e+01 : f32
    %38 = vector.broadcast %cst_12 : f32 to vector<16x1xf32>
    %39 = arith.divf %37, %38 : vector<16x1xf32>
    %40 = vector.broadcast %32 : vector<16x1xf32> to vector<16x32xf32>
    %41 = arith.subf %1, %40 : vector<16x32xf32>
    %cst_13 = arith.constant 9.99999974E-6 : f32
    %42 = vector.broadcast %cst_13 : f32 to vector<16x1xf32>
    %43 = arith.addf %39, %42 : vector<16x1xf32>
    %44 = math.rsqrt %43 : vector<16x1xf32>
    %45 = vector.broadcast %44 : vector<16x1xf32> to vector<16x32xf32>
    %46 = arith.mulf %41, %45 : vector<16x32xf32>
    %47 = vector.broadcast %27 : vector<1x32xf32> to vector<16x32xf32>
    %48 = arith.mulf %46, %47 : vector<16x32xf32>
    %49 = vector.broadcast %28 : vector<1x32xf32> to vector<16x32xf32>
    %50 = arith.addf %48, %49 : vector<16x32xf32>
    %51 = tpu.iota {dimensions = array<i32: 0>} : vector<80x16xi32>
    %52 = tpu.iota {dimensions = array<i32: 1>} : vector<80x16xi32>
    %c5_i32 = arith.constant 5 : i32
    %53 = vector.broadcast %c5_i32 : i32 to vector<80x16xi32>
    %54 = arith.muli %52, %53 : vector<80x16xi32>
    %55 = arith.cmpi sge, %51, %54 : vector<80x16xi32>
    %c5_i32_14 = arith.constant 5 : i32
    %56 = vector.broadcast %c5_i32_14 : i32 to vector<80x16xi32>
    %57 = arith.addi %54, %56 : vector<80x16xi32>
    %58 = arith.cmpi slt, %51, %57 : vector<80x16xi32>
    %59 = arith.andi %55, %58 : vector<80x16xi1>
    %cst_15 = arith.constant 1.000000e+00 : f32
    %cst_16 = arith.constant 0.000000e+00 : f32
    %60 = vector.broadcast %cst_15 : f32 to vector<80x16xf32>
    %61 = vector.broadcast %cst_16 : f32 to vector<80x16xf32>
    %62 = arith.select %59, %60, %61 : vector<80x16xi1>, vector<80x16xf32>
    %63 = tpu.iota {dimensions = array<i32: 1>} : vector<16x80xi32>
    %64 = tpu.iota {dimensions = array<i32: 0>} : vector<16x80xi32>
    %c5_i32_17 = arith.constant 5 : i32
    %65 = vector.broadcast %c5_i32_17 : i32 to vector<16x80xi32>
    %66 = arith.muli %64, %65 : vector<16x80xi32>
    %67 = arith.cmpi sge, %63, %66 : vector<16x80xi32>
    %c5_i32_18 = arith.constant 5 : i32
    %68 = vector.broadcast %c5_i32_18 : i32 to vector<16x80xi32>
    %69 = arith.addi %66, %68 : vector<16x80xi32>
    %70 = arith.cmpi slt, %63, %69 : vector<16x80xi32>
    %71 = arith.andi %67, %70 : vector<16x80xi1>
    %cst_19 = arith.constant 1.000000e+00 : f32
    %cst_20 = arith.constant 0.000000e+00 : f32
    %72 = vector.broadcast %cst_19 : f32 to vector<16x80xf32>
    %73 = vector.broadcast %cst_20 : f32 to vector<16x80xf32>
    %74 = arith.select %71, %72, %73 : vector<16x80xi1>, vector<16x80xf32>
    %cst_21 = arith.constant 5.000000e-01 : f32
    %75 = vector.broadcast %cst_21 : f32 to vector<16x80xf32>
    %76 = arith.cmpf ogt, %74, %75 : vector<16x80xf32>
    %cst_22 = arith.constant 0.000000e+00 : f32
    %cst_23 = arith.constant -1.000000e+30 : f32
    %77 = vector.broadcast %cst_22 : f32 to vector<16x80xf32>
    %78 = vector.broadcast %cst_23 : f32 to vector<16x80xf32>
    %79 = arith.select %76, %77, %78 : vector<16x80xi1>, vector<16x80xf32>
    %cst_24 = arith.constant dense<0.000000e+00> : vector<80x80xf32>
    %80 = tpu.matmul %62, %74, %cst_24 {dimension_numbers = #tpu.dot_dimension_numbers<[1], [0], [0], [1], [0, 0, 1, 1], [], []>} : vector<80x16xf32>, vector<16x80xf32>, vector<80x80xf32> -> vector<80x80xf32>
    %cst_25 = arith.constant 5.000000e-01 : f32
    %81 = vector.broadcast %cst_25 : f32 to vector<80x80xf32>
    %82 = arith.cmpf ogt, %80, %81 : vector<80x80xf32>
    %cst_26 = arith.constant 0.000000e+00 : f32
    %cst_27 = arith.constant -1.000000e+30 : f32
    %83 = vector.broadcast %cst_26 : f32 to vector<80x80xf32>
    %84 = vector.broadcast %cst_27 : f32 to vector<80x80xf32>
    %85 = arith.select %82, %83, %84 : vector<80x80xi1>, vector<80x80xf32>
    %cst_28 = arith.constant 2.000000e-01 : f32
    %86 = vector.broadcast %cst_28 : f32 to vector<16x80xf32>
    %87 = arith.mulf %74, %86 : vector<16x80xf32>
    %c0_29 = arith.constant 0 : index
    %c0_30 = arith.constant 0 : index
    %88 = vector.load %arg4[%c0_29, %c0_30] : memref<512x32xf32, #tpu.memory_space<vmem>>, vector<32x32xf32>
    %c0_31 = arith.constant 0 : index
    %c0_32 = arith.constant 0 : index
    %89 = vector.load %arg5[%c0_31, %c0_32] : memref<16x32xf32, #tpu.memory_space<vmem>>, vector<1x32xf32>
    %cst_33 = arith.constant dense<0.000000e+00> : vector<80x32xf32>
    %90 = tpu.matmul %26, %88, %cst_33 {dimension_numbers = #tpu.dot_dimension_numbers<[1], [0], [0], [1], [0, 0, 1, 1], [], []>} : vector<80x32xf32>, vector<32x32xf32>, vector<80x32xf32> -> vector<80x32xf32>
    %91 = vector.broadcast %89 : vector<1x32xf32> to vector<80x32xf32>
    %92 = arith.addf %90, %91 : vector<80x32xf32>
    %c32 = arith.constant 32 : index
    %c0_34 = arith.constant 0 : index
    %93 = vector.load %arg4[%c32, %c0_34] : memref<512x32xf32, #tpu.memory_space<vmem>>, vector<32x32xf32>
    %c1 = arith.constant 1 : index
    %c0_35 = arith.constant 0 : index
    %94 = vector.load %arg5[%c1, %c0_35] : memref<16x32xf32, #tpu.memory_space<vmem>>, vector<1x32xf32>
    %cst_36 = arith.constant dense<0.000000e+00> : vector<80x32xf32>
    %95 = tpu.matmul %26, %93, %cst_36 {dimension_numbers = #tpu.dot_dimension_numbers<[1], [0], [0], [1], [0, 0, 1, 1], [], []>} : vector<80x32xf32>, vector<32x32xf32>, vector<80x32xf32> -> vector<80x32xf32>
    %96 = vector.broadcast %94 : vector<1x32xf32> to vector<80x32xf32>
    %97 = arith.addf %95, %96 : vector<80x32xf32>
    %c64 = arith.constant 64 : index
    %c0_37 = arith.constant 0 : index
    %98 = vector.load %arg4[%c64, %c0_37] : memref<512x32xf32, #tpu.memory_space<vmem>>, vector<32x32xf32>
    %c2 = arith.constant 2 : index
    %c0_38 = arith.constant 0 : index
    %99 = vector.load %arg5[%c2, %c0_38] : memref<16x32xf32, #tpu.memory_space<vmem>>, vector<1x32xf32>
    %cst_39 = arith.constant dense<0.000000e+00> : vector<80x32xf32>
    %100 = tpu.matmul %26, %98, %cst_39 {dimension_numbers = #tpu.dot_dimension_numbers<[1], [0], [0], [1], [0, 0, 1, 1], [], []>} : vector<80x32xf32>, vector<32x32xf32>, vector<80x32xf32> -> vector<80x32xf32>
    %101 = vector.broadcast %99 : vector<1x32xf32> to vector<80x32xf32>
    %102 = arith.addf %100, %101 : vector<80x32xf32>
    %cst_40 = arith.constant dense<0.000000e+00> : vector<80x80xf32>
    %103 = tpu.matmul %92, %97, %cst_40 {dimension_numbers = #tpu.dot_dimension_numbers<[1], [1], [0], [0], [0, 0, 1, 0], [], []>} : vector<80x32xf32>, vector<80x32xf32>, vector<80x80xf32> -> vector<80x80xf32>
    %104 = arith.addf %103, %85 : vector<80x80xf32>
    %cst_41 = arith.constant dense<0xFF800000> : vector<80xf32>
    %105 = vector.multi_reduction <maximumf>, %104, %cst_41 [1] : vector<80x80xf32> to vector<80xf32>
    %106 = vector.shape_cast %105 : vector<80xf32> to vector<80x1xf32>
    %107 = vector.broadcast %106 : vector<80x1xf32> to vector<80x80xf32>
    %108 = arith.subf %104, %107 : vector<80x80xf32>
    %109 = math.exp %108 : vector<80x80xf32>
    %cst_42 = arith.constant dense<0.000000e+00> : vector<80xf32>
    %110 = vector.multi_reduction <add>, %109, %cst_42 [1] : vector<80x80xf32> to vector<80xf32>
    %111 = vector.shape_cast %110 : vector<80xf32> to vector<80x1xf32>
    %112 = tpu.reciprocal %111 : vector<80x1xf32> -> vector<80x1xf32>
    %113 = vector.broadcast %112 : vector<80x1xf32> to vector<80x80xf32>
    %114 = arith.mulf %109, %113 : vector<80x80xf32>
    %cst_43 = arith.constant dense<0.000000e+00> : vector<80x32xf32>
    %115 = tpu.matmul %114, %102, %cst_43 {dimension_numbers = #tpu.dot_dimension_numbers<[1], [0], [0], [1], [0, 0, 1, 1], [], []>} : vector<80x80xf32>, vector<80x32xf32>, vector<80x32xf32> -> vector<80x32xf32>
    %c96 = arith.constant 96 : index
    %c0_44 = arith.constant 0 : index
    %116 = vector.load %arg4[%c96, %c0_44] : memref<512x32xf32, #tpu.memory_space<vmem>>, vector<32x32xf32>
    %c3 = arith.constant 3 : index
    %c0_45 = arith.constant 0 : index
    %117 = vector.load %arg5[%c3, %c0_45] : memref<16x32xf32, #tpu.memory_space<vmem>>, vector<1x32xf32>
    %cst_46 = arith.constant dense<0.000000e+00> : vector<80x32xf32>
    %118 = tpu.matmul %26, %116, %cst_46 {dimension_numbers = #tpu.dot_dimension_numbers<[1], [0], [0], [1], [0, 0, 1, 1], [], []>} : vector<80x32xf32>, vector<32x32xf32>, vector<80x32xf32> -> vector<80x32xf32>
    %119 = vector.broadcast %117 : vector<1x32xf32> to vector<80x32xf32>
    %120 = arith.addf %118, %119 : vector<80x32xf32>
    %c128 = arith.constant 128 : index
    %c0_47 = arith.constant 0 : index
    %121 = vector.load %arg4[%c128, %c0_47] : memref<512x32xf32, #tpu.memory_space<vmem>>, vector<32x32xf32>
    %c4 = arith.constant 4 : index
    %c0_48 = arith.constant 0 : index
    %122 = vector.load %arg5[%c4, %c0_48] : memref<16x32xf32, #tpu.memory_space<vmem>>, vector<1x32xf32>
    %cst_49 = arith.constant dense<0.000000e+00> : vector<80x32xf32>
    %123 = tpu.matmul %26, %121, %cst_49 {dimension_numbers = #tpu.dot_dimension_numbers<[1], [0], [0], [1], [0, 0, 1, 1], [], []>} : vector<80x32xf32>, vector<32x32xf32>, vector<80x32xf32> -> vector<80x32xf32>
    %124 = vector.broadcast %122 : vector<1x32xf32> to vector<80x32xf32>
    %125 = arith.addf %123, %124 : vector<80x32xf32>
    %c160 = arith.constant 160 : index
    %c0_50 = arith.constant 0 : index
    %126 = vector.load %arg4[%c160, %c0_50] : memref<512x32xf32, #tpu.memory_space<vmem>>, vector<32x32xf32>
    %c5 = arith.constant 5 : index
    %c0_51 = arith.constant 0 : index
    %127 = vector.load %arg5[%c5, %c0_51] : memref<16x32xf32, #tpu.memory_space<vmem>>, vector<1x32xf32>
    %cst_52 = arith.constant dense<0.000000e+00> : vector<80x32xf32>
    %128 = tpu.matmul %26, %126, %cst_52 {dimension_numbers = #tpu.dot_dimension_numbers<[1], [0], [0], [1], [0, 0, 1, 1], [], []>} : vector<80x32xf32>, vector<32x32xf32>, vector<80x32xf32> -> vector<80x32xf32>
    %129 = vector.broadcast %127 : vector<1x32xf32> to vector<80x32xf32>
    %130 = arith.addf %128, %129 : vector<80x32xf32>
    %cst_53 = arith.constant dense<0.000000e+00> : vector<80x80xf32>
    %131 = tpu.matmul %120, %125, %cst_53 {dimension_numbers = #tpu.dot_dimension_numbers<[1], [1], [0], [0], [0, 0, 1, 0], [], []>} : vector<80x32xf32>, vector<80x32xf32>, vector<80x80xf32> -> vector<80x80xf32>
    %132 = arith.addf %131, %85 : vector<80x80xf32>
    %cst_54 = arith.constant dense<0xFF800000> : vector<80xf32>
    %133 = vector.multi_reduction <maximumf>, %132, %cst_54 [1] : vector<80x80xf32> to vector<80xf32>
    %134 = vector.shape_cast %133 : vector<80xf32> to vector<80x1xf32>
    %135 = vector.broadcast %134 : vector<80x1xf32> to vector<80x80xf32>
    %136 = arith.subf %132, %135 : vector<80x80xf32>
    %137 = math.exp %136 : vector<80x80xf32>
    %cst_55 = arith.constant dense<0.000000e+00> : vector<80xf32>
    %138 = vector.multi_reduction <add>, %137, %cst_55 [1] : vector<80x80xf32> to vector<80xf32>
    %139 = vector.shape_cast %138 : vector<80xf32> to vector<80x1xf32>
    %140 = tpu.reciprocal %139 : vector<80x1xf32> -> vector<80x1xf32>
    %141 = vector.broadcast %140 : vector<80x1xf32> to vector<80x80xf32>
    %142 = arith.mulf %137, %141 : vector<80x80xf32>
    %cst_56 = arith.constant dense<0.000000e+00> : vector<80x32xf32>
    %143 = tpu.matmul %142, %130, %cst_56 {dimension_numbers = #tpu.dot_dimension_numbers<[1], [0], [0], [1], [0, 0, 1, 1], [], []>} : vector<80x80xf32>, vector<80x32xf32>, vector<80x32xf32> -> vector<80x32xf32>
    %144 = arith.addf %115, %143 : vector<80x32xf32>
    %c192 = arith.constant 192 : index
    %c0_57 = arith.constant 0 : index
    %145 = vector.load %arg4[%c192, %c0_57] : memref<512x32xf32, #tpu.memory_space<vmem>>, vector<32x32xf32>
    %c6 = arith.constant 6 : index
    %c0_58 = arith.constant 0 : index
    %146 = vector.load %arg5[%c6, %c0_58] : memref<16x32xf32, #tpu.memory_space<vmem>>, vector<1x32xf32>
    %cst_59 = arith.constant dense<0.000000e+00> : vector<80x32xf32>
    %147 = tpu.matmul %144, %145, %cst_59 {dimension_numbers = #tpu.dot_dimension_numbers<[1], [0], [0], [1], [0, 0, 1, 1], [], []>} : vector<80x32xf32>, vector<32x32xf32>, vector<80x32xf32> -> vector<80x32xf32>
    %148 = vector.broadcast %146 : vector<1x32xf32> to vector<80x32xf32>
    %149 = arith.addf %147, %148 : vector<80x32xf32>
    %150 = arith.addf %0, %149 : vector<80x32xf32>
    %c224 = arith.constant 224 : index
    %c0_60 = arith.constant 0 : index
    %151 = vector.load %arg4[%c224, %c0_60] : memref<512x32xf32, #tpu.memory_space<vmem>>, vector<32x32xf32>
    %c7 = arith.constant 7 : index
    %c0_61 = arith.constant 0 : index
    %152 = vector.load %arg5[%c7, %c0_61] : memref<16x32xf32, #tpu.memory_space<vmem>>, vector<1x32xf32>
    %cst_62 = arith.constant dense<0.000000e+00> : vector<16x32xf32>
    %153 = tpu.matmul %50, %151, %cst_62 {dimension_numbers = #tpu.dot_dimension_numbers<[1], [0], [0], [1], [0, 0, 1, 1], [], []>} : vector<16x32xf32>, vector<32x32xf32>, vector<16x32xf32> -> vector<16x32xf32>
    %154 = vector.broadcast %152 : vector<1x32xf32> to vector<16x32xf32>
    %155 = arith.addf %153, %154 : vector<16x32xf32>
    %c256 = arith.constant 256 : index
    %c0_63 = arith.constant 0 : index
    %156 = vector.load %arg4[%c256, %c0_63] : memref<512x32xf32, #tpu.memory_space<vmem>>, vector<32x32xf32>
    %c8 = arith.constant 8 : index
    %c0_64 = arith.constant 0 : index
    %157 = vector.load %arg5[%c8, %c0_64] : memref<16x32xf32, #tpu.memory_space<vmem>>, vector<1x32xf32>
    %cst_65 = arith.constant dense<0.000000e+00> : vector<16x32xf32>
    %158 = tpu.matmul %155, %156, %cst_65 {dimension_numbers = #tpu.dot_dimension_numbers<[1], [0], [0], [1], [0, 0, 1, 1], [], []>} : vector<16x32xf32>, vector<32x32xf32>, vector<16x32xf32> -> vector<16x32xf32>
    %159 = vector.broadcast %157 : vector<1x32xf32> to vector<16x32xf32>
    %160 = arith.addf %158, %159 : vector<16x32xf32>
    %cst_66 = arith.constant dense<0.000000e+00> : vector<80x32xf32>
    %161 = tpu.matmul %62, %160, %cst_66 {dimension_numbers = #tpu.dot_dimension_numbers<[1], [0], [0], [1], [0, 0, 1, 1], [], []>} : vector<80x16xf32>, vector<16x32xf32>, vector<80x32xf32> -> vector<80x32xf32>
    %162 = arith.addf %150, %161 : vector<80x32xf32>
    %c288 = arith.constant 288 : index
    %c0_67 = arith.constant 0 : index
    %163 = vector.load %arg4[%c288, %c0_67] : memref<512x32xf32, #tpu.memory_space<vmem>>, vector<32x32xf32>
    %c9 = arith.constant 9 : index
    %c0_68 = arith.constant 0 : index
    %164 = vector.load %arg5[%c9, %c0_68] : memref<16x32xf32, #tpu.memory_space<vmem>>, vector<1x32xf32>
    %cst_69 = arith.constant dense<0.000000e+00> : vector<16x32xf32>
    %165 = tpu.matmul %50, %163, %cst_69 {dimension_numbers = #tpu.dot_dimension_numbers<[1], [0], [0], [1], [0, 0, 1, 1], [], []>} : vector<16x32xf32>, vector<32x32xf32>, vector<16x32xf32> -> vector<16x32xf32>
    %166 = vector.broadcast %164 : vector<1x32xf32> to vector<16x32xf32>
    %167 = arith.addf %165, %166 : vector<16x32xf32>
    %c320 = arith.constant 320 : index
    %c0_70 = arith.constant 0 : index
    %168 = vector.load %arg4[%c320, %c0_70] : memref<512x32xf32, #tpu.memory_space<vmem>>, vector<32x32xf32>
    %c10 = arith.constant 10 : index
    %c0_71 = arith.constant 0 : index
    %169 = vector.load %arg5[%c10, %c0_71] : memref<16x32xf32, #tpu.memory_space<vmem>>, vector<1x32xf32>
    %cst_72 = arith.constant dense<0.000000e+00> : vector<80x32xf32>
    %170 = tpu.matmul %162, %168, %cst_72 {dimension_numbers = #tpu.dot_dimension_numbers<[1], [0], [0], [1], [0, 0, 1, 1], [], []>} : vector<80x32xf32>, vector<32x32xf32>, vector<80x32xf32> -> vector<80x32xf32>
    %171 = vector.broadcast %169 : vector<1x32xf32> to vector<80x32xf32>
    %172 = arith.addf %170, %171 : vector<80x32xf32>
    %c352 = arith.constant 352 : index
    %c0_73 = arith.constant 0 : index
    %173 = vector.load %arg4[%c352, %c0_73] : memref<512x32xf32, #tpu.memory_space<vmem>>, vector<32x32xf32>
    %c11 = arith.constant 11 : index
    %c0_74 = arith.constant 0 : index
    %174 = vector.load %arg5[%c11, %c0_74] : memref<16x32xf32, #tpu.memory_space<vmem>>, vector<1x32xf32>
    %cst_75 = arith.constant dense<0.000000e+00> : vector<80x32xf32>
    %175 = tpu.matmul %162, %173, %cst_75 {dimension_numbers = #tpu.dot_dimension_numbers<[1], [0], [0], [1], [0, 0, 1, 1], [], []>} : vector<80x32xf32>, vector<32x32xf32>, vector<80x32xf32> -> vector<80x32xf32>
    %176 = vector.broadcast %174 : vector<1x32xf32> to vector<80x32xf32>
    %177 = arith.addf %175, %176 : vector<80x32xf32>
    %cst_76 = arith.constant dense<0.000000e+00> : vector<16x80xf32>
    %178 = tpu.matmul %167, %172, %cst_76 {dimension_numbers = #tpu.dot_dimension_numbers<[1], [1], [0], [0], [0, 0, 1, 0], [], []>} : vector<16x32xf32>, vector<80x32xf32>, vector<16x80xf32> -> vector<16x80xf32>
    %179 = arith.addf %178, %79 : vector<16x80xf32>
    %cst_77 = arith.constant dense<0xFF800000> : vector<16xf32>
    %180 = vector.multi_reduction <maximumf>, %179, %cst_77 [1] : vector<16x80xf32> to vector<16xf32>
    %181 = vector.shape_cast %180 : vector<16xf32> to vector<16x1xf32>
    %182 = vector.broadcast %181 : vector<16x1xf32> to vector<16x80xf32>
    %183 = arith.subf %179, %182 : vector<16x80xf32>
    %184 = math.exp %183 : vector<16x80xf32>
    %cst_78 = arith.constant dense<0.000000e+00> : vector<16xf32>
    %185 = vector.multi_reduction <add>, %184, %cst_78 [1] : vector<16x80xf32> to vector<16xf32>
    %186 = vector.shape_cast %185 : vector<16xf32> to vector<16x1xf32>
    %187 = tpu.reciprocal %186 : vector<16x1xf32> -> vector<16x1xf32>
    %188 = vector.broadcast %187 : vector<16x1xf32> to vector<16x80xf32>
    %189 = arith.mulf %184, %188 : vector<16x80xf32>
    %cst_79 = arith.constant dense<0.000000e+00> : vector<16x32xf32>
    %190 = tpu.matmul %189, %177, %cst_79 {dimension_numbers = #tpu.dot_dimension_numbers<[1], [0], [0], [1], [0, 0, 1, 1], [], []>} : vector<16x80xf32>, vector<80x32xf32>, vector<16x32xf32> -> vector<16x32xf32>
    %c384 = arith.constant 384 : index
    %c0_80 = arith.constant 0 : index
    %191 = vector.load %arg4[%c384, %c0_80] : memref<512x32xf32, #tpu.memory_space<vmem>>, vector<32x32xf32>
    %c12 = arith.constant 12 : index
    %c0_81 = arith.constant 0 : index
    %192 = vector.load %arg5[%c12, %c0_81] : memref<16x32xf32, #tpu.memory_space<vmem>>, vector<1x32xf32>
    %cst_82 = arith.constant dense<0.000000e+00> : vector<16x32xf32>
    %193 = tpu.matmul %50, %191, %cst_82 {dimension_numbers = #tpu.dot_dimension_numbers<[1], [0], [0], [1], [0, 0, 1, 1], [], []>} : vector<16x32xf32>, vector<32x32xf32>, vector<16x32xf32> -> vector<16x32xf32>
    %194 = vector.broadcast %192 : vector<1x32xf32> to vector<16x32xf32>
    %195 = arith.addf %193, %194 : vector<16x32xf32>
    %c416 = arith.constant 416 : index
    %c0_83 = arith.constant 0 : index
    %196 = vector.load %arg4[%c416, %c0_83] : memref<512x32xf32, #tpu.memory_space<vmem>>, vector<32x32xf32>
    %c13 = arith.constant 13 : index
    %c0_84 = arith.constant 0 : index
    %197 = vector.load %arg5[%c13, %c0_84] : memref<16x32xf32, #tpu.memory_space<vmem>>, vector<1x32xf32>
    %cst_85 = arith.constant dense<0.000000e+00> : vector<80x32xf32>
    %198 = tpu.matmul %162, %196, %cst_85 {dimension_numbers = #tpu.dot_dimension_numbers<[1], [0], [0], [1], [0, 0, 1, 1], [], []>} : vector<80x32xf32>, vector<32x32xf32>, vector<80x32xf32> -> vector<80x32xf32>
    %199 = vector.broadcast %197 : vector<1x32xf32> to vector<80x32xf32>
    %200 = arith.addf %198, %199 : vector<80x32xf32>
    %c448 = arith.constant 448 : index
    %c0_86 = arith.constant 0 : index
    %201 = vector.load %arg4[%c448, %c0_86] : memref<512x32xf32, #tpu.memory_space<vmem>>, vector<32x32xf32>
    %c14 = arith.constant 14 : index
    %c0_87 = arith.constant 0 : index
    %202 = vector.load %arg5[%c14, %c0_87] : memref<16x32xf32, #tpu.memory_space<vmem>>, vector<1x32xf32>
    %cst_88 = arith.constant dense<0.000000e+00> : vector<80x32xf32>
    %203 = tpu.matmul %162, %201, %cst_88 {dimension_numbers = #tpu.dot_dimension_numbers<[1], [0], [0], [1], [0, 0, 1, 1], [], []>} : vector<80x32xf32>, vector<32x32xf32>, vector<80x32xf32> -> vector<80x32xf32>
    %204 = vector.broadcast %202 : vector<1x32xf32> to vector<80x32xf32>
    %205 = arith.addf %203, %204 : vector<80x32xf32>
    %cst_89 = arith.constant dense<0.000000e+00> : vector<16x80xf32>
    %206 = tpu.matmul %195, %200, %cst_89 {dimension_numbers = #tpu.dot_dimension_numbers<[1], [1], [0], [0], [0, 0, 1, 0], [], []>} : vector<16x32xf32>, vector<80x32xf32>, vector<16x80xf32> -> vector<16x80xf32>
    %207 = arith.addf %206, %79 : vector<16x80xf32>
    %cst_90 = arith.constant dense<0xFF800000> : vector<16xf32>
    %208 = vector.multi_reduction <maximumf>, %207, %cst_90 [1] : vector<16x80xf32> to vector<16xf32>
    %209 = vector.shape_cast %208 : vector<16xf32> to vector<16x1xf32>
    %210 = vector.broadcast %209 : vector<16x1xf32> to vector<16x80xf32>
    %211 = arith.subf %207, %210 : vector<16x80xf32>
    %212 = math.exp %211 : vector<16x80xf32>
    %cst_91 = arith.constant dense<0.000000e+00> : vector<16xf32>
    %213 = vector.multi_reduction <add>, %212, %cst_91 [1] : vector<16x80xf32> to vector<16xf32>
    %214 = vector.shape_cast %213 : vector<16xf32> to vector<16x1xf32>
    %215 = tpu.reciprocal %214 : vector<16x1xf32> -> vector<16x1xf32>
    %216 = vector.broadcast %215 : vector<16x1xf32> to vector<16x80xf32>
    %217 = arith.mulf %212, %216 : vector<16x80xf32>
    %cst_92 = arith.constant dense<0.000000e+00> : vector<16x32xf32>
    %218 = tpu.matmul %217, %205, %cst_92 {dimension_numbers = #tpu.dot_dimension_numbers<[1], [0], [0], [1], [0, 0, 1, 1], [], []>} : vector<16x80xf32>, vector<80x32xf32>, vector<16x32xf32> -> vector<16x32xf32>
    %219 = arith.addf %190, %218 : vector<16x32xf32>
    %c480 = arith.constant 480 : index
    %c0_93 = arith.constant 0 : index
    %220 = vector.load %arg4[%c480, %c0_93] : memref<512x32xf32, #tpu.memory_space<vmem>>, vector<32x32xf32>
    %c15 = arith.constant 15 : index
    %c0_94 = arith.constant 0 : index
    %221 = vector.load %arg5[%c15, %c0_94] : memref<16x32xf32, #tpu.memory_space<vmem>>, vector<1x32xf32>
    %cst_95 = arith.constant dense<0.000000e+00> : vector<16x32xf32>
    %222 = tpu.matmul %219, %220, %cst_95 {dimension_numbers = #tpu.dot_dimension_numbers<[1], [0], [0], [1], [0, 0, 1, 1], [], []>} : vector<16x32xf32>, vector<32x32xf32>, vector<16x32xf32> -> vector<16x32xf32>
    %223 = vector.broadcast %221 : vector<1x32xf32> to vector<16x32xf32>
    %224 = arith.addf %222, %223 : vector<16x32xf32>
    %225 = arith.addf %1, %224 : vector<16x32xf32>
    %cst_96 = arith.constant dense<0.000000e+00> : vector<16x32xf32>
    %226 = tpu.matmul %87, %162, %cst_96 {dimension_numbers = #tpu.dot_dimension_numbers<[1], [0], [0], [1], [0, 0, 1, 1], [], []>} : vector<16x80xf32>, vector<80x32xf32>, vector<16x32xf32> -> vector<16x32xf32>
    %c0_97 = arith.constant 0 : index
    %c0_98 = arith.constant 0 : index
    %227 = vector.load %arg6[%c0_97, %c0_98] : memref<64x128xf32, #tpu.memory_space<vmem>>, vector<32x128xf32>
    %cst_99 = arith.constant dense<0.000000e+00> : vector<16x128xf32>
    %228 = tpu.matmul %226, %227, %cst_99 {dimension_numbers = #tpu.dot_dimension_numbers<[1], [0], [0], [1], [0, 0, 1, 1], [], []>} : vector<16x32xf32>, vector<32x128xf32>, vector<16x128xf32> -> vector<16x128xf32>
    %c32_100 = arith.constant 32 : index
    %c0_101 = arith.constant 0 : index
    %229 = vector.load %arg6[%c32_100, %c0_101] : memref<64x128xf32, #tpu.memory_space<vmem>>, vector<32x128xf32>
    %cst_102 = arith.constant dense<0.000000e+00> : vector<16x128xf32>
    %230 = tpu.matmul %225, %229, %cst_102 {dimension_numbers = #tpu.dot_dimension_numbers<[1], [0], [0], [1], [0, 0, 1, 1], [], []>} : vector<16x32xf32>, vector<32x128xf32>, vector<16x128xf32> -> vector<16x128xf32>
    %231 = arith.addf %228, %230 : vector<16x128xf32>
    %c0_103 = arith.constant 0 : index
    %c0_104 = arith.constant 0 : index
    %232 = vector.load %arg7[%c0_103, %c0_104] : memref<1x128xf32, #tpu.memory_space<vmem>>, vector<1x128xf32>
    %233 = vector.broadcast %232 : vector<1x128xf32> to vector<16x128xf32>
    %234 = arith.addf %231, %233 : vector<16x128xf32>
    %235 = arith.negf %234 : vector<16x128xf32>
    %236 = math.exp %235 : vector<16x128xf32>
    %cst_105 = arith.constant 1.000000e+00 : f32
    %237 = vector.broadcast %cst_105 : f32 to vector<16x128xf32>
    %238 = arith.addf %237, %236 : vector<16x128xf32>
    %239 = arith.divf %237, %238 : vector<16x128xf32>
    %c0_106 = arith.constant 0 : index
    %c0_107 = arith.constant 0 : index
    %240 = vector.load %arg8[%c0_106, %c0_107] : memref<16x128xf32, #tpu.memory_space<vmem>>, vector<16x128xf32>
    tpu.vector_store %arg8[%c0_106, %c0_107], %239 {strides = array<i32>} : memref<16x128xf32, #tpu.memory_space<vmem>>, vector<16x128xf32>,
    return
  }
  func.func @transform_0(%arg0: i32) -> (i32, i32) {
    %c0_i32 = arith.constant 0 : i32
    %c0_i32_0 = arith.constant 0 : i32
    return %arg0, %c0_i32 : i32, i32
  }
  func.func @transform_1(%arg0: i32) -> (i32, i32) {
    %c0_i32 = arith.constant 0 : i32
    %c0_i32_0 = arith.constant 0 : i32
    return %arg0, %c0_i32 : i32, i32
  }
  func.func @transform_2(%arg0: i32) -> (i32, i32) {
    %c0_i32 = arith.constant 0 : i32
    %c0_i32_0 = arith.constant 0 : i32
    %c0_i32_1 = arith.constant 0 : i32
    return %c0_i32, %c0_i32_0 : i32, i32
  }
  func.func @transform_3(%arg0: i32) -> (i32, i32) {
    %c0_i32 = arith.constant 0 : i32
    %c0_i32_0 = arith.constant 0 : i32
    %c0_i32_1 = arith.constant 0 : i32
    return %c0_i32, %c0_i32_0 : i32, i32
  }
  func.func @transform_4(%arg0: i32) -> (i32, i32) {
    %c0_i32 = arith.constant 0 : i32
    %c0_i32_0 = arith.constant 0 : i32
    %c0_i32_1 = arith.constant 0 : i32
    return %c0_i32, %c0_i32_0 : i32, i32
  }
  func.func @transform_5(%arg0: i32) -> (i32, i32) {
    %c0_i32 = arith.constant 0 : i32
    %c0_i32_0 = arith.constant 0 : i32
    %c0_i32_1 = arith.constant 0 : i32
    return %c0_i32, %c0_i32_0 : i32, i32
  }
  func.func @transform_6(%arg0: i32) -> (i32, i32) {
    %c0_i32 = arith.constant 0 : i32
    %c0_i32_0 = arith.constant 0 : i32
    %c0_i32_1 = arith.constant 0 : i32
    return %c0_i32, %c0_i32_0 : i32, i32
  }
  func.func @transform_7(%arg0: i32) -> (i32, i32) {
    %c0_i32 = arith.constant 0 : i32
    %c0_i32_0 = arith.constant 0 : i32
    return %arg0, %c0_i32 : i32, i32
  }
}

</mosaic_0001>

<bundles_post_ra>
// kernel: tpu_custom_call.1
= control target key start
LH: loop header
LB: loop body
LE: loop exit
PB: predicated region body
PF: predicated region fallthrough
CT: control target
= control target key end

     0   :  { %vm40_vm0 = vcmask 261120   ;;  %s7422_s0 = inlined_call_operand.vmem [shape: f32[80,32], index: 0, kind: input, shape index: {}]   ;;  %s7423_s1 = inlined_call_operand.vmem [shape: f32[16,32], index: 1, kind: input, shape index: {}]   ;;  %s7424_s2 = inlined_call_operand.vmem [shape: f32[4,32], index: 2, kind: input, shape index: {}]   ;;  %s7425_s3 = inlined_call_operand.vmem [shape: f32[512,32], index: 3, kind: input, shape index: {}]   ;;  %s7426_s4 = inlined_call_operand.vmem [shape: f32[16,32], index: 4, kind: input, shape index: {}]   ;;  %s7427_s5 = inlined_call_operand.vmem [shape: f32[64,128], index: 5, kind: input, shape index: {}]   ;;  %s7428_s6 = inlined_call_operand.vmem [shape: f32[1,128], index: 6, kind: input, shape index: {}]   ;;  %s7429_s7 = inlined_call_operand.hbm [shape: f32[16,128], index: 7, kind: output, shape index: {}]  }
   0x1   :  { %v27_v0 = vld [vmem:[%s7422_s0] sm:$0xff]  ;;  %v29_v1 = vld [vmem:[%s7422_s0 + $0x10] sm:$0xff]  ;;  %v28_v2 = vld [vmem:[%s7422_s0 + $0x8] sm:$0xff] }
   0x2   :  { %v41_v3 = vsel %vm40_vm0, %v27_v0, 0.0  ;;  %v47_v4 = vsel %vm40_vm0, %v29_v1, 0.0  ;;  %v30_v5 = vld [vmem:[%s7422_s0 + $0x18] sm:$0xff]  ;;  %v44_v6 = vsel %vm40_vm0, %v28_v2, 0.0 }
   0x3   :  { %42 = vadd.xlane.f32.xlu0 %v41_v3  ;;  %48 = vadd.xlane.f32.xlu1 %v47_v4  ;;  %v50_v7 = vsel %vm40_vm0, %v30_v5, 0.0 }
   0x4   :  { %12 = vsyncpa [#allocation3], 0  ;;  %v31_v8 = vld [vmem:[%s7422_s0 + $0x20] sm:$0xff]  ;;  %v32_v9 = vld [vmem:[%s7422_s0 + $0x28] sm:$0xff]  ;;  %v172_v32 = vlaneseq  ;;  %vm309_vm11 = vcmask 130048  }
   0x5   :  { %v53_v10 = vsel %vm40_vm0, %v31_v8, 0.0  ;;  %v56_v11 = vsel %vm40_vm0, %v32_v9, 0.0  ;;  %v33_v12 = vld [vmem:[%s7422_s0 + $0x30] sm:$0xff]  ;;  %v34_v13 = vld [vmem:[%s7422_s0 + $0x38] sm:$0xff]  ;;  %v5991_v16 = vld [vmem:[%s7422_s0 + $0x40] sm:$0xff] }
   0x6   :  { %v59_v14 = vsel %vm40_vm0, %v33_v12, 0.0  ;;  %v62_v15 = vsel %vm40_vm0, %v34_v13, 0.0  ;;  %v5996_v17 = vld [vmem:[%s7422_s0 + $0x48] sm:$0xff]  ;;  %v65_v18 = vsel %vm40_vm0, %v5991_v16, 0.0  ;;  %v6020_v43 = vshrl.u32 %v172_v32, 7 }
   0x7   :  { %45 = vadd.xlane.f32.xlu0 %v44_v6  ;;  %51 = vadd.xlane.f32.xlu1 %v50_v7  ;;  %v68_v19 = vsel %vm40_vm0, %v5996_v17, 0.0  ;;  %v250_v61 = vand.u32 127, %v172_v32 }
   0x8   :  { %v240_v54 = vadd.s32 8, %v6020_v43  ;;  %v293_v62 = vmul.u32 5, %v6020_v43 }
   0x9   :  { %v6044_v4 = vmul.u32 5, %v250_v61 }
   0xa   :  { %v294_v63 = vmul.u32 5, %v240_v54  ;;  %vm295_vm1 = vcmp.ge.s32.totalorder %v250_v61, %v293_v62 }
   0xb   :  { %54 = vadd.xlane.f32.xlu0 %v53_v10  ;;  %57 = vadd.xlane.f32.xlu1 %v56_v11  ;;  %v6054_v10 = vadd.s32 5, %v6044_v4  ;;  %vm252_vm7 = vcmp.ge.s32.totalorder %v6020_v43, %v6044_v4  ;;  %vm253_vm12 = vcmp.ge.s32.totalorder %v240_v54, %v6044_v4 }
   0xc   :  { %v298_v6 = vadd.s32 5, %v294_v63  ;;  %vm296_vm2 = vcmp.ge.s32.totalorder %v250_v61, %v294_v63 }
   0xd   :  { %vm263_vm8 = vcmp.lt.s32.totalorder %v6020_v43, %v6054_v10  ;;  %vm264_vm13 = vcmp.lt.s32.totalorder %v240_v54, %v6054_v10 }
   0xe   :  { %vm300_vm4 = vcmp.lt.s32.totalorder %v250_v61, %v298_v6  ;;  %vm273_vm10 = vmand %vm252_vm7, %vm263_vm8 }
   0xf   :  { %60 = vadd.xlane.f32.xlu0 %v59_v14  ;;  %63 = vadd.xlane.f32.xlu1 %v62_v15  ;;  %vm6065_vm6 = vmand %vm296_vm2, %vm300_vm4  ;;  %v174_v15 = vsub.s32 0, %v6020_v43 }
  0x10   :  { %vm274_vm14 = vmand %vm253_vm12, %vm264_vm13 }
  0x13   :  { %66 = vadd.xlane.f32.xlu0 %v65_v18  ;;  %69 = vadd.xlane.f32.xlu1 %v68_v19  ;;  %v5910_v18 = vmov 1.0|1.0   ;;  %v5911_v19 = vmov 0.0  }
  0x90   :  { %v43_v20 = vpop.xlane.xlu0 %42  ;;  %v49_v21 = vpop.xlane.xlu1 %48 }
  0x91   :  { %v72_v22 = vmul.f32 0.03125, %v43_v20  ;;  %v74_v23 = vmul.f32 0.03125, %v49_v21  ;;  %v6082_v20 = vsel %vm273_vm10, 1.0, %v5911_v19  ;;  %v241_v21 = vadd.s32 16, %v6020_v43 }
  0x92   :  { %4704 = vmatprep.mubr.msk.f32.mxu0 %vm309_vm11, %v6082_v20 }
  0x93   :  { %v6002_v24 = vsub.f32 %v27_v0, %v72_v22  ;;  %v6004_v25 = vsub.f32 %v29_v1, %v74_v23  ;;  %v6088_v22 = vsel %vm274_vm14, 1.0, %v5911_v19  ;;  %v242_v23 = vadd.s32 24, %v6020_v43 }
  0x94   :  { %v46_v26 = vpop.xlane.xlu0 %45  ;;  %v52_v27 = vpop.xlane.xlu1 %51  ;;  %vm254_vm15 = vcmp.ge.s32.totalorder %v241_v21, %v6044_v4 }
  0x95   :  { %v73_v28 = vmul.f32 0.03125, %v46_v26  ;;  %v75_v29 = vmul.f32 0.03125, %v52_v27  ;;  %v92_v30 = vmul.f32 %v6002_v24, %v6002_v24  ;;  %v94_v31 = vmul.f32 %v6004_v25, %v6004_v25 }
  0x96   :  { %vm266_vm4 = vcmp.lt.s32.totalorder %v242_v23, %v6054_v10  ;;  %v243_v27 = vadd.s32 32, %v6020_v43 }
  0x97   :  { %v6010_v33 = vsub.f32 %v28_v2, %v73_v28  ;;  %v6012_v34 = vsub.f32 %v30_v5, %v75_v29  ;;  %v102_v35 = vsel %vm40_vm0, %v92_v30, 0.0  ;;  %v108_v38 = vsel %vm40_vm0, %v94_v31, 0.0 }
  0x98   :  { %103 = vadd.xlane.f32.xlu0 %v102_v35  ;;  %v55_v36 = vpop.xlane.xlu0 %54  ;;  %v58_v37 = vpop.xlane.xlu1 %57  ;;  %v297_v5 = vadd.s32 5, %v293_v62  ;;  %v244_v29 = vadd.s32 40, %v6020_v43  ;;  %vm256_vm8 = vcmp.ge.s32.totalorder %v243_v27, %v6044_v4  ;;  %v245_v31 = vadd.s32 48, %v6020_v43  ;;  %v756_v62 = vld [vmem:[%s7425_s3 + $0x48] sm:$0xff] }
  0x99   :  { %v76_v39 = vmul.f32 0.03125, %v55_v36  ;;  %v77_v40 = vmul.f32 0.03125, %v58_v37  ;;  %v93_v41 = vmul.f32 %v6010_v33, %v6010_v33  ;;  %v95_v42 = vmul.f32 %v6012_v34, %v6012_v34  ;;  %v477_v37 = vld [vmem:[%s7425_s3] sm:$0xff] }
  0x9a   :  { %vm299_vm3 = vcmp.lt.s32.totalorder %v250_v61, %v297_v5  ;;  %vm257_vm12 = vcmp.ge.s32.totalorder %v244_v29, %v6044_v4  ;;  %vm268_vm13 = vcmp.lt.s32.totalorder %v244_v29, %v6054_v10  ;;  %v246_v35 = vadd.s32 56, %v6020_v43  ;;  %v755_v61 = vld [vmem:[%s7425_s3 + $0x40] sm:$0xff] }
  0x9b   :  { %v6022_v44 = vsub.f32 %v31_v8, %v76_v39  ;;  %v6024_v45 = vsub.f32 %v32_v9, %v77_v40  ;;  %v105_v46 = vsel %vm40_vm0, %v93_v41, 0.0  ;;  %v111_v49 = vsel %vm40_vm0, %v95_v42, 0.0  ;;  %vm6061_vm5 = vmand %vm295_vm1, %vm299_vm3  ;;  %v631_v42 = vld [vmem:[%s7425_s3 + $0x20] sm:$0xff] }
  0x9c   :  { %109 = vadd.xlane.f32.xlu0 %v108_v38  ;;  %106 = vadd.xlane.f32.xlu1 %v105_v46  ;;  %v61_v47 = vpop.xlane.xlu0 %60  ;;  %v64_v48 = vpop.xlane.xlu1 %63  ;;  %vm5323_vm9 = vmpackc.low %vm6065_vm6, %vm6061_vm5  ;;  %vm265_vm1 = vcmp.lt.s32.totalorder %v241_v21, %v6054_v10  ;;  %vm255_vm3 = vcmp.ge.s32.totalorder %v242_v23, %v6044_v4  ;;  %v478_v38 = vld [vmem:[%s7425_s3 + $0x8] sm:$0xff]  ;;  %v247_v39 = vadd.s32 64, %v6020_v43  ;;  %v6195_v63 = vpack.c.bf16 %v756_v62, %v755_v61 }
  0x9d   :  { %v78_v50 = vmul.f32 0.03125, %v61_v47  ;;  %v79_v51 = vmul.f32 0.03125, %v64_v48  ;;  %v96_v52 = vmul.f32 %v6022_v44, %v6022_v44  ;;  %v97_v53 = vmul.f32 %v6024_v45, %v6024_v45  ;;  %5324 = vmatprep.subr.msk.bf16.mxu0 %vm5323_vm9, %v5910_v18  ;;  %vm275_vm2 = vmand %vm254_vm15, %vm265_vm1  ;;  %v632_v46 = vld [vmem:[%s7425_s3 + $0x28] sm:$0xff] }
  0x9e   :  { %5326 = vmatpush3.bf16.msk.msra.mxu0 %vm5323_vm9, %v5910_v18  ;;  %v6098_v26 = vsel %vm275_vm2, 1.0, %v5911_v19  ;;  %vm276_vm7 = vmand %vm255_vm3, %vm266_vm4  ;;  %vm267_vm9 = vcmp.lt.s32.totalorder %v243_v27, %v6054_v10  ;;  %vm258_vm15 = vcmp.ge.s32.totalorder %v245_v31, %v6044_v4  ;;  %vm269_vm1 = vcmp.lt.s32.totalorder %v245_v31, %v6054_v10 }
  0x9f   :  { %v6033_v55 = vsub.f32 %v33_v12, %v78_v50  ;;  %v6035_v56 = vsub.f32 %v34_v13, %v79_v51  ;;  %v114_v57 = vsel %vm40_vm0, %v96_v52, 0.0  ;;  %v117_v60 = vsel %vm40_vm0, %v97_v53, 0.0  ;;  %vm277_vm10 = vmand %vm256_vm8, %vm267_vm9  ;;  %v479_v52 = vld [vmem:[%s7425_s3 + $0x10] sm:$0xff]  ;;  %v480_v53 = vld [vmem:[%s7425_s3 + $0x18] sm:$0xff] }
  0xa0   :  { %112 = vadd.xlane.f32.xlu1 %v111_v49  ;;  %115 = vadd.xlane.f32.xlu0 %v114_v57  ;;  %v67_v58 = vpop.xlane.xlu0 %66  ;;  %v70_v59 = vpop.xlane.xlu1 %69  ;;  %v6104_v28 = vsel %vm276_vm7, 1.0, %v5911_v19  ;;  %v6114_v30 = vsel %vm277_vm10, 1.0, %v5911_v19  ;;  %vm278_vm14 = vmand %vm257_vm12, %vm268_vm13  ;;  %vm259_vm3 = vcmp.ge.s32.totalorder %v246_v35, %v6044_v4  ;;  %vm270_vm4 = vcmp.lt.s32.totalorder %v246_v35, %v6054_v10 }
  0xa1   :  { %v80_v0 = vmul.f32 0.03125, %v67_v58  ;;  %v81_v1 = vmul.f32 0.03125, %v70_v59  ;;  %v98_v2 = vmul.f32 %v6033_v55, %v6033_v55  ;;  %v99_v3 = vmul.f32 %v6035_v56, %v6035_v56  ;;  %4705 = vmatmul.mubr.msk.f32.vlgmr.msra.gmra.mrb[0].mxu0 %vm309_vm11, %v6088_v22  ;;  %vm279_vm2 = vmand %vm258_vm15, %vm269_vm1  ;;  %v633_v58 = vld [vmem:[%s7425_s3 + $0x30] sm:$0xff]  ;;  %v634_v59 = vld [vmem:[%s7425_s3 + $0x38] sm:$0xff] }
  0xa2   :  { %4707 = vmatprep.mubr.msk.f32.mxu0 %vm309_vm11, %v6098_v26  ;;  %v6120_v32 = vsel %vm278_vm14, 1.0, %v5911_v19  ;;  %v6130_v36 = vsel %vm279_vm2, 1.0, %v5911_v19  ;;  %vm280_vm7 = vmand %vm259_vm3, %vm270_vm4  ;;  %v5327_v41 = vpack.c.bf16 %v478_v38, %v477_v37  ;;  %v248_v47 = vadd.s32 72, %v6020_v43 }
  0xa3   :  { %v6047_v7 = vsub.f32 %v5991_v16, %v80_v0  ;;  %v6050_v8 = vsub.f32 %v5996_v17, %v81_v1  ;;  %v120_v9 = vsel %vm40_vm0, %v98_v2, 0.0  ;;  %v123_v11 = vsel %vm40_vm0, %v99_v3, 0.0 }
  0xa4   :  { %118 = vadd.xlane.f32.xlu1 %v117_v60  ;;  %121 = vadd.xlane.f32.xlu0 %v120_v9  ;;  %v6142_v40 = vsel %vm280_vm7, 1.0, %v5911_v19  ;;  %v5335_v48 = vpack.c.bf16 %v632_v46, %v631_v42  ;;  %vm260_vm8 = vcmp.ge.s32.totalorder %v247_v39, %v6044_v4  ;;  %vm271_vm9 = vcmp.lt.s32.totalorder %v247_v39, %v6054_v10 }
  0xa5   :  { %v100_v12 = vmul.f32 %v6047_v7, %v6047_v7  ;;  %v101_v13 = vmul.f32 %v6050_v8, %v6050_v8  ;;  %4708 = vmatmul.mubr.msk.f32.gmra.mrb[2].mxu0 %vm309_vm11, %v6104_v28  ;;  %5328 = vmatprep.subr.bf16.mxu1 %v5327_v41  ;;  %vm281_vm10 = vmand %vm260_vm8, %vm271_vm9  ;;  %vm261_vm12 = vcmp.ge.s32.totalorder %v248_v47, %v6044_v4  ;;  %v6158_v49 = vsel %vm6061_vm5, 1.0, %v5911_v19 }
  0xa6   :  { %4710 = vmatprep.mubr.msk.f32.mxu0 %vm309_vm11, %v6114_v30  ;;  %vm272_vm13 = vcmp.lt.s32.totalorder %v248_v47, %v6054_v10  ;;  %v6163_v50 = vsel %vm6065_vm6, 1.0, %v5911_v19  ;;  %5336 = vmatprep.subr.bf16.mxu0 %v5335_v48  ;;  %v6168_v51 = vsel %vm281_vm10, 1.0, %v5911_v19  ;;  %v5331_v57 = vpack.c.bf16 %v480_v53, %v479_v52  ;;  %vm6421_vm5 = vmpackc.low %vm40_vm0, %vm40_vm0 }
  0xa7   :  { %v126_v16 = vsel %vm40_vm0, %v100_v12, 0.0  ;;  %v129_v17 = vsel %vm40_vm0, %v101_v13, 0.0  ;;  %vm282_vm14 = vmand %vm261_vm12, %vm272_vm13  ;;  %5330 = vmatpush3.bf16.msra.mxu1 %v5327_v41  ;;  %5338 = vmatpush3.bf16.msra.mxu0 %v5335_v48  ;;  %v5339_v60 = vpack.c.bf16 %v634_v59, %v633_v58  ;;  %vm1054_vm12 = vcmask 654336  }
  0xa8   :  { %124 = vadd.xlane.f32.xlu1 %v123_v11  ;;  %127 = vadd.xlane.f32.xlu0 %v126_v16  ;;  %v6177_v54 = vsel %vm282_vm14, 1.0, %v5911_v19  ;;  %v39_v16 = vld [vmem:[%s7424_s2] sm:$0xf]  ;;  %v188_v19 = vsub.s32 1, %v6020_v43  ;;  %vm305_vm13 = vcmp.gt.f32.partialorder %v6158_v49, 0.5 }
  0xa9   :  { %4711 = vmatmul.mubr.msk.f32.gmra.mrb[4].mxu0 %vm309_vm11, %v6120_v32  ;;  %5332 = vmatprep.subr.bf16.mxu1 %v5331_v57  ;;  %v6203_v31 = vrot.slane %v39_v16, %v174_v15 }
  0xaa   :  { %4713 = vmatprep.mubr.msk.f32.mxu0 %vm309_vm11, %v6130_v36  ;;  %5340 = vmatprep.subr.bf16.mxu0 %v5339_v60  ;;  %v6205_v39 = vrot.slane %v39_v16, %v188_v19 }
  0xab   :  { %5334 = vmatpush3.bf16.msra.mxu1 %v5331_v57  ;;  %5342 = vmatpush3.bf16.msra.mxu0 %v5339_v60 }
  0xac   :  { %130 = vadd.xlane.f32.xlu1 %v129_v17  ;;  %5344 = vmatprep.subr.bf16.mxu1 %v6195_v63 }
  0xad   :  { %4714 = vmatmul.mubr.msk.f32.gmra.mrb[6].mxu0 %vm309_vm11, %v6142_v40 }
  0xae   :  { %4716 = vmatprep.mubr.msk.f32.mxu0 %vm309_vm11, %v6168_v51 }
  0xb1   :  { %4717 = vmatmul.mubr.msk.f32.gmra.mrb[8].mxu0 %vm309_vm11, %v6177_v54 }
 0x125   :  { %v104_v0 = vpop.xlane.xlu0 %103 }
 0x126   :  { %v132_v1 = vmul.f32 0.03125, %v104_v0 }
 0x128   :  { %v142_v2 = vadd.f32 1e-05, %v132_v1 }
 0x129   :  { %v107_v3 = vpop.xlane.xlu1 %106  ;;  %v110_v4 = vpop.xlane.xlu0 %109 }
 0x12a   :  { %5745 = vrsqrt.f32 %v142_v2  ;;  %v133_v5 = vmul.f32 0.03125, %v107_v3  ;;  %v134_v6 = vmul.f32 0.03125, %v110_v4  ;;  %v757_v2 = vld [vmem:[%s7425_s3 + $0x50] sm:$0xff] }
 0x12c   :  { %v143_v9 = vadd.f32 1e-05, %v133_v5  ;;  %v144_v10 = vadd.f32 1e-05, %v134_v6 }
 0x12d   :  { %v113_v11 = vpop.xlane.xlu1 %112  ;;  %v116_v12 = vpop.xlane.xlu0 %115 }
 0x12e   :  { %5747 = vrsqrt.f32 %v143_v9  ;;  %v135_v13 = vmul.f32 0.03125, %v113_v11  ;;  %v136_v14 = vmul.f32 0.03125, %v116_v12 }
 0x12f   :  { %5749 = vrsqrt.f32 %v144_v10 }
 0x130   :  { %v145_v17 = vadd.f32 1e-05, %v135_v13  ;;  %v146_v18 = vadd.f32 1e-05, %v136_v14  ;;  %v1165_v14 = vld [vmem:[%s7425_s3 + $0x60] sm:$0xff] }
 0x131   :  { %v119_v21 = vpop.xlane.xlu1 %118  ;;  %v122_v23 = vpop.xlane.xlu0 %121 }
 0x132   :  { %5751 = vrsqrt.f32 %v145_v17  ;;  %v137_v27 = vmul.f32 0.03125, %v119_v21  ;;  %v138_v29 = vmul.f32 0.03125, %v122_v23 }
 0x133   :  { %5753 = vrsqrt.f32 %v146_v18 }
 0x134   :  { %v5746_v35 = vpop.eup %5745  ;;  %v147_v37 = vadd.f32 1e-05, %v137_v27  ;;  %v148_v38 = vadd.f32 1e-05, %v138_v29 }
 0x135   :  { %v162_v41 = vmul.f32 %v5746_v35, %v6002_v24  ;;  %v125_v42 = vpop.xlane.xlu1 %124  ;;  %v128_v46 = vpop.xlane.xlu0 %127 }
 0x136   :  { %5755 = vrsqrt.f32 %v147_v37  ;;  %v139_v47 = vmul.f32 0.03125, %v125_v42  ;;  %v140_v48 = vmul.f32 0.03125, %v128_v46 }
 0x137   :  { %v176_v52 = vmul.f32 %v6203_v31, %v162_v41  ;;  %5757 = vrsqrt.f32 %v148_v38 }
 0x138   :  { %v5748_v53 = vpop.eup %5747  ;;  %v149_v57 = vadd.f32 1e-05, %v139_v47  ;;  %v150_v58 = vadd.f32 1e-05, %v140_v48 }
 0x139   :  { %v5750_v59 = vpop.eup %5749  ;;  %v6210_v60 = vadd.f32 %v6205_v39, %v176_v52  ;;  %v163_v61 = vmul.f32 %v5748_v53, %v6010_v33  ;;  %v131_v62 = vpop.xlane.xlu1 %130  ;;  %v758_v33 = vld [vmem:[%s7425_s3 + $0x58] sm:$0xff] }
 0x13a   :  { %v164_v24 = vmul.f32 %v5750_v59, %v6004_v25  ;;  %5759 = vrsqrt.f32 %v149_v57  ;;  %v141_v0 = vmul.f32 0.03125, %v131_v62  ;;  %v5347_v12 = vpack.c.bf16 %v758_v33, %v757_v2  ;;  %v1290_v57 = vld [vmem:[%s7425_s3 + $0x88] sm:$0xff]  ;;  %v1291_v59 = vld [vmem:[%s7425_s3 + $0x90] sm:$0xff] }
 0x13b   :  { %v177_v1 = vmul.f32 %v6203_v31, %v163_v61  ;;  %5761 = vrsqrt.f32 %v150_v58  ;;  %4727 = vmatprep.mubr.msk.f32.mxu1 %vm40_vm0, %v6210_v60  ;;  %4750 = vmatprep.mubr.msk.f32.mxu0 %vm40_vm0, %v6210_v60  ;;  %v1292_v61 = vld [vmem:[%s7425_s3 + $0x98] sm:$0xff] }
 0x13c   :  { %v5752_v25 = vpop.eup %5751  ;;  %v178_v3 = vmul.f32 %v6203_v31, %v164_v24  ;;  %v151_v4 = vadd.f32 1e-05, %v141_v0  ;;  %v5393_v62 = vpack.c.bf16 %v1292_v61, %v1291_v59 }
 0x13d   :  { %v5754_v5 = vpop.eup %5753  ;;  %v6227_v6 = vadd.f32 %v6205_v39, %v177_v1  ;;  %v165_v9 = vmul.f32 %v5752_v25, %v6012_v34  ;;  %v1166_v34 = vld [vmem:[%s7425_s3 + $0x68] sm:$0xff] }
 0x13e   :  { %v6231_v10 = vadd.f32 %v6205_v39, %v178_v3  ;;  %v166_v11 = vmul.f32 %v5754_v5, %v6022_v44  ;;  %5763 = vrsqrt.f32 %v151_v4  ;;  %v5381_v23 = vpack.c.bf16 %v1166_v34, %v1165_v14 }
 0x13f   :  { %v179_v13 = vmul.f32 %v6203_v31, %v165_v9  ;;  %4728 = vmatmul.mubr.msk.f32.vlgmr.msra.gmra.mrb[0].mxu1 %vm40_vm0, %v6227_v6  ;;  %4751 = vmatmul.mubr.msk.f32.vlgmr.msra.gmra.mrb[10].mxu0 %vm40_vm0, %v6227_v6 }
 0x140   :  { %v5756_v15 = vpop.eup %5755  ;;  %v180_v44 = vmul.f32 %v6203_v31, %v166_v11  ;;  %4730 = vmatprep.mubr.msk.f32.mxu1 %vm40_vm0, %v6231_v10  ;;  %4753 = vmatprep.mubr.msk.f32.mxu0 %vm40_vm0, %v6231_v10  ;;  %v4108_v11 = vld [vmem:[%s7426_s4 + $0x1] ss:$0 sm:$0xff] }
 0x141   :  { %v5758_v16 = vpop.eup %5757  ;;  %v6251_v17 = vadd.f32 %v6205_v39, %v179_v13  ;;  %v167_v18 = vmul.f32 %v5756_v15, %v6024_v45  ;;  %5346 = vmatpush3.bf16.msra.mxu1 %v6195_v63 }
 0x142   :  { %v6256_v19 = vadd.f32 %v6205_v39, %v180_v44  ;;  %v168_v21 = vmul.f32 %v5758_v16, %v6033_v55  ;;  %5348 = vmatprep.subr.bf16.mxu1 %v5347_v12 }
 0x143   :  { %v181_v27 = vmul.f32 %v6203_v31, %v167_v18  ;;  %4731 = vmatmul.mubr.msk.f32.gmra.mrb[2].mxu1 %vm40_vm0, %v6251_v17  ;;  %4754 = vmatmul.mubr.msk.f32.gmra.mrb[12].mxu0 %vm40_vm0, %v6251_v17 }
 0x144   :  { %v5760_v29 = vpop.eup %5759  ;;  %v182_v45 = vmul.f32 %v6203_v31, %v168_v21  ;;  %4733 = vmatprep.mubr.msk.f32.mxu1 %vm40_vm0, %v6256_v19  ;;  %4756 = vmatprep.mubr.msk.f32.mxu0 %vm40_vm0, %v6256_v19 }
 0x145   :  { %v5762_v55 = vpop.eup %5761  ;;  %v6270_v63 = vadd.f32 %v6205_v39, %v181_v27  ;;  %v169_v35 = vmul.f32 %v5760_v29, %v6035_v56  ;;  %5350 = vmatpush3.bf16.msra.mxu1 %v5347_v12  ;;  %v6414_v12 = vld [vmem:[%s7426_s4] ss:$0 sm:$0xff] }
 0x146   :  { %v6274_v37 = vadd.f32 %v6205_v39, %v182_v45  ;;  %v170_v38 = vmul.f32 %v5762_v55, %v6047_v7  ;;  %5382 = vmatprep.subr.bf16.mxu1 %v5381_v23 }
 0x147   :  { %v183_v41 = vmul.f32 %v6203_v31, %v169_v35  ;;  %4734 = vmatmul.mubr.msk.f32.gmra.mrb[4].mxu1 %vm40_vm0, %v6270_v63  ;;  %4757 = vmatmul.mubr.msk.f32.gmra.mrb[14].mxu0 %vm40_vm0, %v6270_v63 }
 0x148   :  { %v5764_v42 = vpop.eup %5763  ;;  %v184_v46 = vmul.f32 %v6203_v31, %v170_v38  ;;  %4736 = vmatprep.mubr.msk.f32.mxu1 %vm40_vm0, %v6274_v37  ;;  %4759 = vmatprep.mubr.msk.f32.mxu0 %vm40_vm0, %v6274_v37 }
 0x149   :  { %v6288_v56 = vadd.f32 %v6205_v39, %v183_v41  ;;  %v171_v7 = vmul.f32 %v5764_v42, %v6050_v8  ;;  %v1167_v8 = vld [vmem:[%s7425_s3 + $0x70] sm:$0xff] }
 0x14a   :  { %v6292_v47 = vadd.f32 %v6205_v39, %v184_v46 }
 0x14b   :  { %v185_v48 = vmul.f32 %v6203_v31, %v171_v7  ;;  %4737 = vmatmul.mubr.msk.f32.gmra.mrb[6].mxu1 %vm40_vm0, %v6288_v56  ;;  %4760 = vmatmul.mubr.msk.f32.gmra.mrb[16].mxu0 %vm40_vm0, %v6288_v56  ;;  %v1168_v31 = vld [vmem:[%s7425_s3 + $0x78] sm:$0xff] }
 0x14c   :  { %4739 = vmatprep.mubr.msk.f32.mxu1 %vm40_vm0, %v6292_v47  ;;  %4762 = vmatprep.mubr.msk.f32.mxu0 %vm40_vm0, %v6292_v47  ;;  %v5385_v53 = vpack.c.bf16 %v1168_v31, %v1167_v8 }
 0x14d   :  { %v6304_v52 = vadd.f32 %v6205_v39, %v185_v48  ;;  %v1289_v39 = vld [vmem:[%s7425_s3 + $0x80] sm:$0xff] }
 0x14e   :  { %v5389_v58 = vpack.c.bf16 %v1290_v57, %v1289_v39 }
 0x14f   :  { %4740 = vmatmul.mubr.msk.f32.gmra.mrb[8].mxu1 %vm40_vm0, %v6304_v52  ;;  %4763 = vmatmul.mubr.msk.f32.gmra.mrb[18].mxu0 %vm40_vm0, %v6304_v52 }
 0x150   :  { %4773 = vmatprep.mubr.msk.f32.mxu1 %vm40_vm0, %v6210_v60 }
 0x153   :  { %4774 = vmatmul.mubr.msk.f32.vlgmr.msra.gmra.mrb[10].mxu1 %vm40_vm0, %v6227_v6 }
 0x154   :  { %4776 = vmatprep.mubr.msk.f32.mxu1 %vm40_vm0, %v6231_v10  ;;  %5384 = vmatpush3.bf16.msra.mxu1 %v5381_v23 }
 0x155   :  { %5386 = vmatprep.subr.bf16.mxu1 %v5385_v53 }
 0x157   :  { %4777 = vmatmul.mubr.msk.f32.gmra.mrb[12].mxu1 %vm40_vm0, %v6251_v17 }
 0x158   :  { %4779 = vmatprep.mubr.msk.f32.mxu1 %vm40_vm0, %v6256_v19  ;;  %5388 = vmatpush3.bf16.msra.mxu1 %v5385_v53 }
 0x159   :  { %5390 = vmatprep.subr.bf16.mxu1 %v5389_v58 }
 0x15b   :  { %4780 = vmatmul.mubr.msk.f32.gmra.mrb[14].mxu1 %vm40_vm0, %v6270_v63 }
 0x15c   :  { %4782 = vmatprep.mubr.msk.f32.mxu1 %vm40_vm0, %v6274_v37 }
 0x15f   :  { %4783 = vmatmul.mubr.msk.f32.gmra.mrb[16].mxu1 %vm40_vm0, %v6288_v56 }
 0x160   :  { %4785 = vmatprep.mubr.msk.f32.mxu1 %vm40_vm0, %v6292_v47 }
 0x163   :  { %4786 = vmatmul.mubr.msk.f32.gmra.mrb[18].mxu1 %vm40_vm0, %v6304_v52 }
 0x164   :  { %4831 = vmatprep.mubr.msk.f32.mxu1 %vm40_vm0, %v6210_v60 }
 0x167   :  { %4832 = vmatmul.mubr.msk.f32.vlgmr.msra.gmra.mrb[20].mxu1 %vm40_vm0, %v6227_v6 }
 0x168   :  { %4834 = vmatprep.mubr.msk.f32.mxu1 %vm40_vm0, %v6231_v10  ;;  %5392 = vmatpush3.bf16.msra.mxu1 %v5389_v58 }
 0x169   :  { %5394 = vmatprep.subr.bf16.mxu1 %v5393_v62 }
 0x16b   :  { %4835 = vmatmul.mubr.msk.f32.gmra.mrb[22].mxu1 %vm40_vm0, %v6251_v17 }
 0x16c   :  { %4837 = vmatprep.mubr.msk.f32.mxu1 %vm40_vm0, %v6256_v19  ;;  %5396 = vmatpush3.bf16.msra.mxu1 %v5393_v62 }
 0x16f   :  { %4838 = vmatmul.mubr.msk.f32.gmra.mrb[24].mxu1 %vm40_vm0, %v6270_v63 }
 0x170   :  { %4840 = vmatprep.mubr.msk.f32.mxu1 %vm40_vm0, %v6274_v37 }
 0x173   :  { %4841 = vmatmul.mubr.msk.f32.gmra.mrb[26].mxu1 %vm40_vm0, %v6288_v56 }
 0x174   :  { %4843 = vmatprep.mubr.msk.f32.mxu1 %vm40_vm0, %v6292_v47  ;;  %v6378_v24 = vpop.f32.mrb[0].mxu0 }
 0x175   :  { %v6380_v0 = vpop.f32.mrb[1].mxu0  ;;  %vm456_vm6 = vcmp.gt.f32.partialorder %v6378_v24, 0.5 }
 0x176   :  { %vm455_vm15 = vcmp.gt.f32.partialorder %v6380_v0, 0.5 }
 0x177   :  { %4844 = vmatmul.mubr.msk.f32.gmra.mrb[28].mxu1 %vm40_vm0, %v6304_v52 }
 0x178   :  { %4854 = vmatprep.mubr.msk.f32.mxu1 %vm40_vm0, %v6210_v60  ;;  %v6386_v1 = vpop.f32.mrb[2].mxu0 }
 0x179   :  { %v6388_v2 = vpop.f32.mrb[3].mxu0  ;;  %vm458_vm1 = vcmp.gt.f32.partialorder %v6386_v1, 0.5 }
 0x17a   :  { %vm457_vm2 = vcmp.gt.f32.partialorder %v6388_v2, 0.5 }
 0x17b   :  { %4855 = vmatmul.mubr.msk.f32.vlgmr.msra.gmra.mrb[30].mxu1 %vm40_vm0, %v6227_v6 }
 0x17c   :  { %4857 = vmatprep.mubr.msk.f32.mxu1 %vm40_vm0, %v6231_v10  ;;  %v6394_v33 = vpop.f32.mrb[4].mxu0 }
 0x17d   :  { %v6396_v25 = vpop.f32.mrb[5].mxu0  ;;  %vm460_vm3 = vcmp.gt.f32.partialorder %v6394_v33, 0.5 }
 0x17e   :  { %vm459_vm4 = vcmp.gt.f32.partialorder %v6396_v25, 0.5 }
 0x17f   :  { %4858 = vmatmul.mubr.msk.f32.gmra.mrb[32].mxu1 %vm40_vm0, %v6251_v17 }
 0x180   :  { %4860 = vmatprep.mubr.msk.f32.mxu1 %vm40_vm0, %v6256_v19  ;;  %v6400_v3 = vpop.f32.mrb[6].mxu0 }
 0x181   :  { %v6402_v4 = vpop.f32.mrb[7].mxu0  ;;  %vm462_vm7 = vcmp.gt.f32.partialorder %v6400_v3, 0.5 }
 0x182   :  { %vm461_vm8 = vcmp.gt.f32.partialorder %v6402_v4, 0.5 }
 0x183   :  { %4861 = vmatmul.mubr.msk.f32.gmra.mrb[34].mxu1 %vm40_vm0, %v6270_v63 }
 0x184   :  { %4863 = vmatprep.mubr.msk.f32.mxu1 %vm40_vm0, %v6274_v37  ;;  %v6404_v5 = vpop.f32.mrb[8].mxu0 }
 0x185   :  { %v6406_v9 = vpop.f32.mrb[9].mxu0  ;;  %vm464_vm9 = vcmp.gt.f32.partialorder %v6404_v5, 0.5 }
 0x186   :  { %vm463_vm10 = vcmp.gt.f32.partialorder %v6406_v9, 0.5  ;;  %v4172_v9 = vld [vmem:[%s7426_s4 + $0x5] ss:$0 sm:$0xff] }
 0x187   :  { %4864 = vmatmul.mubr.msk.f32.gmra.mrb[36].mxu1 %vm40_vm0, %v6288_v56 }
 0x188   :  { %4866 = vmatprep.mubr.msk.f32.mxu1 %vm40_vm0, %v6292_v47 }
 0x18b   :  { %4867 = vmatmul.mubr.msk.f32.gmra.mrb[38].mxu1 %vm40_vm0, %v6304_v52 }
 0x212   :  { %v6416_v13 = vpop.f32.mrb[0].mxu1  ;;  %v4752_v14 = vpop.f32.mrb[10].mxu0 }
 0x213   :  { %v712_v34 = vadd.f32 %v4752_v14, %v4108_v11  ;;  %v582_v15 = vpop.f32.mrb[1].mxu1  ;;  %v706_v44 = vpop.f32.mrb[11].mxu0 }
 0x214   :  { %v583_v16 = vadd.f32 %v6414_v12, %v582_v15  ;;  %v707_v18 = vadd.f32 %v4108_v11, %v706_v44 }
 0x216   :  { %v5351_v23 = vpack.c.bf16 %v712_v34, %v707_v18  ;;  %v6425_v27 = vpop.f32.mrb[2].mxu1  ;;  %v4755_v29 = vpop.f32.mrb[12].mxu0  ;;  %4808 = vmatprep.mubr.msk.f32.mxu0 %vm40_vm0, %v583_v16 }
 0x217   :  { %v722_v45 = vadd.f32 %v4755_v29, %v4108_v11  ;;  %v6428_v55 = vpop.f32.mrb[3].mxu1  ;;  %v716_v35 = vpop.f32.mrb[13].mxu0  ;;  %v4119_v29 = vld [vmem:[%s7426_s4 + $0x2] ss:$0 sm:$0xff] }
 0x218   :  { %v717_v38 = vadd.f32 %v4108_v11, %v716_v35  ;;  %5353 = vmatprep.subr.msk.bf16.mxu0 %vm6421_vm5, %v5351_v23 }
 0x219   :  { %5356 = vmatpush3.bf16.xpose.msk.msra.mxu0 %vm6421_vm5, %v5351_v23 }
 0x21a   :  { %v5357_v41 = vpack.c.bf16 %v722_v45, %v717_v38  ;;  %v6434_v42 = vpop.f32.mrb[4].mxu1  ;;  %v4758_v46 = vpop.f32.mrb[14].mxu0 }
 0x21b   :  { %v732_v7 = vadd.f32 %v4758_v46, %v4108_v11  ;;  %v6436_v48 = vpop.f32.mrb[5].mxu1  ;;  %v726_v8 = vpop.f32.mrb[15].mxu0 }
 0x21c   :  { %v727_v31 = vadd.f32 %v4108_v11, %v726_v8  ;;  %5359 = vmatprep.subr.msk.bf16.mxu0 %vm6421_vm5, %v5357_v41 }
 0x21e   :  { %v5363_v53 = vpack.c.bf16 %v732_v7, %v727_v31  ;;  %v6440_v39 = vpop.f32.mrb[6].mxu1  ;;  %v4761_v57 = vpop.f32.mrb[16].mxu0 }
 0x21f   :  { %v742_v58 = vadd.f32 %v4761_v57, %v4108_v11  ;;  %v6442_v59 = vpop.f32.mrb[7].mxu1  ;;  %v736_v61 = vpop.f32.mrb[17].mxu0 }
 0x220   :  { %v737_v62 = vadd.f32 %v4108_v11, %v736_v61 }
 0x221   :  { %5362 = vmatpush3.bf16.xpose.msk.msra.mxu0 %vm6421_vm5, %v5357_v41 }
 0x222   :  { %v5369_v14 = vpack.c.bf16 %v742_v58, %v737_v62  ;;  %v6446_v34 = vpop.f32.mrb[8].mxu1  ;;  %v4764_v15 = vpop.f32.mrb[18].mxu0  ;;  %5365 = vmatprep.subr.msk.bf16.mxu0 %vm6421_vm5, %v5363_v53 }
 0x223   :  { %v752_v44 = vadd.f32 %v4764_v15, %v4108_v11  ;;  %v6450_v16 = vpop.f32.mrb[9].mxu1  ;;  %v746_v18 = vpop.f32.mrb[19].mxu0 }
 0x224   :  { %v747_v23 = vadd.f32 %v4108_v11, %v746_v18 }
 0x226   :  { %v5375_v45 = vpack.c.bf16 %v752_v44, %v747_v23  ;;  %v4775_v35 = vpop.f32.mrb[10].mxu1 }
 0x227   :  { %v836_v38 = vadd.f32 %v4775_v35, %v4119_v29  ;;  %v830_v41 = vpop.f32.mrb[11].mxu1 }
 0x228   :  { %v831_v46 = vadd.f32 %v4119_v29, %v830_v41  ;;  %v1414_v41 = vld [vmem:[%s7425_s3 + $0xa8] sm:$0xff] }
 0x229   :  { %5368 = vmatpush3.bf16.xpose.msk.msra.mxu0 %vm6421_vm5, %v5363_v53 }
 0x22a   :  { %v6457_v7 = vpack.c.bf16 %v836_v38, %v831_v46  ;;  %v4778_v8 = vpop.f32.mrb[12].mxu1  ;;  %5371 = vmatprep.subr.msk.bf16.mxu0 %vm6421_vm5, %v5369_v14  ;;  %v1413_v38 = vld [vmem:[%s7425_s3 + $0xa0] sm:$0xff] }
 0x22b   :  { %v846_v31 = vadd.f32 %v4778_v8, %v4119_v29  ;;  %v840_v11 = vpop.f32.mrb[13].mxu1 }
 0x22c   :  { %v841_v57 = vadd.f32 %v4119_v29, %v840_v11 }
 0x22e   :  { %v6461_v58 = vpack.c.bf16 %v846_v31, %v841_v57  ;;  %v4781_v61 = vpop.f32.mrb[14].mxu1  ;;  %v5397_v31 = vpack.c.bf16 %v1414_v41, %v1413_v38 }
 0x22f   :  { %v856_v62 = vadd.f32 %v4781_v61, %v4119_v29  ;;  %v850_v15 = vpop.f32.mrb[15].mxu1 }
 0x230   :  { %v851_v44 = vadd.f32 %v4119_v29, %v850_v15 }
 0x231   :  { %5374 = vmatpush3.bf16.xpose.msk.msra.mxu0 %vm6421_vm5, %v5369_v14 }
 0x232   :  { %v6465_v18 = vpack.c.bf16 %v856_v62, %v851_v44  ;;  %v4784_v53 = vpop.f32.mrb[16].mxu1  ;;  %5377 = vmatprep.subr.msk.bf16.mxu0 %vm6421_vm5, %v5375_v45  ;;  %v6482_v62 = vld [vmem:[%s7426_s4 + $0x3] ss:$0 sm:$0xff] }
 0x233   :  { %v866_v23 = vadd.f32 %v4784_v53, %v4119_v29  ;;  %v860_v35 = vpop.f32.mrb[17].mxu1 }
 0x234   :  { %v861_v46 = vadd.f32 %v4119_v29, %v860_v35  ;;  %v588_v35 = vadd.f32 %v6416_v13, %v6414_v12  ;;  %v598_v13 = vadd.f32 %v6425_v27, %v6414_v12  ;;  %v608_v27 = vadd.f32 %v6434_v42, %v6414_v12 }
 0x235   :  { %v623_v42 = vadd.f32 %v6414_v12, %v6450_v16 }
 0x236   :  { %v6475_v8 = vpack.c.bf16 %v866_v23, %v861_v46  ;;  %v4787_v14 = vpop.f32.mrb[18].mxu1  ;;  %v1415_v23 = vld [vmem:[%s7425_s3 + $0xb0] sm:$0xff]  ;;  %v593_v46 = vadd.f32 %v6414_v12, %v6428_v55 }
 0x237   :  { %v876_v11 = vadd.f32 %v4787_v14, %v4119_v29  ;;  %v870_v57 = vpop.f32.mrb[19].mxu1 }
 0x238   :  { %v871_v61 = vadd.f32 %v4119_v29, %v870_v57  ;;  %v1416_v29 = vld [vmem:[%s7425_s3 + $0xb8] sm:$0xff] }
 0x239   :  { %5380 = vmatpush3.bf16.xpose.msk.msra.mxu0 %vm6421_vm5, %v5375_v45  ;;  %v5401_v41 = vpack.c.bf16 %v1416_v29, %v1415_v23  ;;  %v613_v29 = vadd.f32 %v6414_v12, %v6442_v59 }
 0x23a   :  { %v6484_v15 = vpack.c.bf16 %v876_v11, %v871_v61  ;;  %v6486_v44 = vpop.f32.mrb[20].mxu1  ;;  %5398 = vmatprep.subr.bf16.mxu0 %v5397_v31  ;;  %v603_v61 = vadd.f32 %v6414_v12, %v6436_v48 }
 0x23b   :  { %v1240_v53 = vpop.f32.mrb[21].mxu1 }
 0x23c   :  { %v1241_v45 = vadd.f32 %v6482_v62, %v1240_v53 }
 0x23e   :  { %v4836_v38 = vpop.f32.mrb[22].mxu1  ;;  %4912 = vmatprep.mubr.msk.f32.mxu1 %vm40_vm0, %v1241_v45 }
 0x23f   :  { %v6501_v14 = vadd.f32 %v4836_v38, %v6482_v62  ;;  %v6503_v11 = vpop.f32.mrb[23].mxu1  ;;  %v618_v38 = vadd.f32 %v6440_v39, %v6414_v12  ;;  %v628_v39 = vadd.f32 %v6446_v34, %v6414_v12 }
 0x240   :  { %4809 = vmatmul.mubr.msk.f32.vlgmr.msra.gmra.mrb[20].mxu0 %vm40_vm0, %v588_v35 }
 0x241   :  { %4811 = vmatprep.mubr.msk.f32.mxu0 %vm40_vm0, %v593_v46  ;;  %5400 = vmatpush3.bf16.msra.mxu0 %v5397_v31 }
 0x242   :  { %v4839_v57 = vpop.f32.mrb[24].mxu1  ;;  %5402 = vmatprep.subr.bf16.mxu0 %v5401_v41 }
 0x243   :  { %v6512_v55 = vadd.f32 %v4839_v57, %v6482_v62  ;;  %v1260_v53 = vpop.f32.mrb[25].mxu1  ;;  %v4161_v57 = vld [vmem:[%s7426_s4 + $0x4] ss:$0 sm:$0xff] }
 0x244   :  { %v6515_v23 = vadd.f32 %v6482_v62, %v1260_v53  ;;  %4812 = vmatmul.mubr.msk.f32.gmra.mrb[22].mxu0 %vm40_vm0, %v598_v13 }
 0x245   :  { %4814 = vmatprep.mubr.msk.f32.mxu0 %vm40_vm0, %v603_v61  ;;  %5404 = vmatpush3.bf16.msra.mxu0 %v5401_v41 }
 0x246   :  { %v4842_v31 = vpop.f32.mrb[26].mxu1 }
 0x247   :  { %v6524_v48 = vadd.f32 %v4842_v31, %v6482_v62  ;;  %v1270_v45 = vpop.f32.mrb[27].mxu1 }
 0x248   :  { %v6527_v35 = vadd.f32 %v6482_v62, %v1270_v45  ;;  %4815 = vmatmul.mubr.msk.f32.gmra.mrb[24].mxu0 %vm40_vm0, %v608_v27 }
 0x249   :  { %4817 = vmatprep.mubr.msk.f32.mxu0 %vm40_vm0, %v613_v29 }
 0x24a   :  { %v4845_v41 = vpop.f32.mrb[28].mxu1 }
 0x24b   :  { %v6536_v59 = vadd.f32 %v4845_v41, %v6482_v62  ;;  %v1280_v46 = vpop.f32.mrb[29].mxu1 }
 0x24c   :  { %v1281_v13 = vadd.f32 %v6482_v62, %v1280_v46  ;;  %4818 = vmatmul.mubr.msk.f32.gmra.mrb[26].mxu0 %vm40_vm0, %v618_v38 }
 0x24d   :  { %4820 = vmatprep.mubr.msk.f32.mxu0 %vm40_vm0, %v623_v42 }
 0x24e   :  { %v4856_v61 = vpop.f32.mrb[30].mxu1 }
 0x24f   :  { %v1370_v53 = vadd.f32 %v4856_v61, %v4161_v57  ;;  %v1364_v16 = vpop.f32.mrb[31].mxu1 }
 0x250   :  { %v1365_v27 = vadd.f32 %v4161_v57, %v1364_v16  ;;  %4821 = vmatmul.mubr.msk.f32.gmra.mrb[28].mxu0 %vm40_vm0, %v628_v39 }
 0x251   :  { %4877 = vmatprep.mubr.msk.f32.mxu0 %vm40_vm0, %v6210_v60 }
 0x252   :  { %v5405_v31 = vpack.c.bf16 %v1370_v53, %v1365_v27  ;;  %v4859_v29 = vpop.f32.mrb[32].mxu1 }
 0x253   :  { %v1380_v45 = vadd.f32 %v4859_v29, %v4161_v57  ;;  %v1374_v38 = vpop.f32.mrb[33].mxu1 }
 0x254   :  { %v1375_v41 = vadd.f32 %v4161_v57, %v1374_v38  ;;  %4878 = vmatmul.mubr.msk.f32.vlgmr.msra.gmra.mrb[30].mxu0 %vm40_vm0, %v6227_v6  ;;  %5407 = vmatprep.subr.msk.bf16.mxu1 %vm6421_vm5, %v5405_v31 }
 0x255   :  { %4880 = vmatprep.mubr.msk.f32.mxu0 %vm40_vm0, %v6231_v10  ;;  %5410 = vmatpush3.bf16.xpose.msk.msra.mxu1 %vm6421_vm5, %v5405_v31 }
 0x256   :  { %v5411_v12 = vpack.c.bf16 %v1380_v45, %v1375_v41  ;;  %v4862_v34 = vpop.f32.mrb[34].mxu1 }
 0x257   :  { %v1390_v60 = vadd.f32 %v4862_v34, %v4161_v57  ;;  %v1384_v42 = vpop.f32.mrb[35].mxu1 }
 0x258   :  { %v1385_v46 = vadd.f32 %v4161_v57, %v1384_v42  ;;  %4881 = vmatmul.mubr.msk.f32.gmra.mrb[32].mxu0 %vm40_vm0, %v6251_v17  ;;  %5413 = vmatprep.subr.msk.bf16.mxu1 %vm6421_vm5, %v5411_v12 }
 0x259   :  { %4883 = vmatprep.mubr.msk.f32.mxu0 %vm40_vm0, %v6256_v19 }
 0x25a   :  { %v5417_v6 = vpack.c.bf16 %v1390_v60, %v1385_v46  ;;  %v4865_v39 = vpop.f32.mrb[36].mxu1 }
 0x25b   :  { %v1400_v10 = vadd.f32 %v4865_v39, %v4161_v57  ;;  %v1394_v61 = vpop.f32.mrb[37].mxu1 }
 0x25c   :  { %v1395_v53 = vadd.f32 %v4161_v57, %v1394_v61  ;;  %4884 = vmatmul.mubr.msk.f32.gmra.mrb[34].mxu0 %vm40_vm0, %v6270_v63 }
 0x25d   :  { %4886 = vmatprep.mubr.msk.f32.mxu0 %vm40_vm0, %v6274_v37  ;;  %5416 = vmatpush3.bf16.xpose.msk.msra.mxu1 %vm6421_vm5, %v5411_v12  ;;  %v1246_v37 = vadd.f32 %v6486_v44, %v6482_v62 }
 0x25e   :  { %v5423_v17 = vpack.c.bf16 %v1400_v10, %v1395_v53  ;;  %v4868_v16 = vpop.f32.mrb[38].mxu1  ;;  %5419 = vmatprep.subr.msk.bf16.mxu1 %vm6421_vm5, %v5417_v6 }
 0x25f   :  { %v1410_v19 = vadd.f32 %v4868_v16, %v4161_v57  ;;  %v1404_v27 = vpop.f32.mrb[39].mxu1 }
 0x260   :  { %v1405_v31 = vadd.f32 %v4161_v57, %v1404_v27  ;;  %4887 = vmatmul.mubr.msk.f32.gmra.mrb[36].mxu0 %vm40_vm0, %v6288_v56  ;;  %v1251_v56 = vadd.f32 %v6482_v62, %v6503_v11 }
 0x261   :  { %4889 = vmatprep.mubr.msk.f32.mxu0 %vm40_vm0, %v6292_v47  ;;  %v5912_v47 = vmov -1e+30  }
 0x262   :  { %v5429_v63 = vpack.c.bf16 %v1410_v19, %v1405_v31  ;;  %v6623_v0 = vsel %vm458_vm1, 0.0, %v5912_v47  ;;  %v6651_v29 = vsel %vm462_vm7, 0.0, %v5912_v47  ;;  %v6658_v38 = vsel %vm461_vm8, 0.0, %v5912_v47 }
 0x263   :  { %v6665_v12 = vsel %vm464_vm9, 0.0, %v5912_v47  ;;  %v6671_v5 = vsel %vm463_vm10, 0.0, %v5912_v47 }
 0x264   :  { %4890 = vmatmul.mubr.msk.f32.gmra.mrb[38].mxu0 %vm40_vm0, %v6304_v52  ;;  %v6609_v52 = vsel %vm456_vm6, 0.0, %v5912_v47 }
 0x265   :  { %5422 = vmatpush3.bf16.xpose.msk.msra.mxu1 %vm6421_vm5, %v5417_v6 }
 0x266   :  { %5425 = vmatprep.subr.msk.bf16.mxu1 %vm6421_vm5, %v5423_v17 }
 0x26d   :  { %5428 = vmatpush3.bf16.xpose.msk.msra.mxu1 %vm6421_vm5, %v5423_v17 }
 0x26e   :  { %5431 = vmatprep.subr.msk.bf16.mxu1 %vm6421_vm5, %v5429_v63 }
 0x275   :  { %5434 = vmatpush3.bf16.xpose.msk.msra.mxu1 %vm6421_vm5, %v5429_v63 }
 0x27c   :  { %4913 = vmatmul.mubr.msk.f32.vlgmr.msra.gmra.mrb[40].mxu1 %vm40_vm0, %v1246_v37 }
 0x27d   :  { %4915 = vmatprep.mubr.msk.f32.mxu1 %vm40_vm0, %v1251_v56 }
 0x280   :  { %4916 = vmatmul.mubr.msk.f32.gmra.mrb[42].mxu1 %vm40_vm0, %v6501_v14  ;;  %v6616_v14 = vsel %vm455_vm15, 0.0, %v5912_v47 }
 0x281   :  { %4918 = vmatprep.mubr.msk.f32.mxu1 %vm40_vm0, %v6515_v23  ;;  %v6630_v23 = vsel %vm457_vm2, 0.0, %v5912_v47 }
 0x284   :  { %4919 = vmatmul.mubr.msk.f32.gmra.mrb[44].mxu1 %vm40_vm0, %v6512_v55 }
 0x285   :  { %4921 = vmatprep.mubr.msk.f32.mxu1 %vm40_vm0, %v6527_v35  ;;  %v6637_v35 = vsel %vm460_vm3, 0.0, %v5912_v47 }
 0x288   :  { %4922 = vmatmul.mubr.msk.f32.gmra.mrb[46].mxu1 %vm40_vm0, %v6524_v48 }
 0x289   :  { %4924 = vmatprep.mubr.msk.f32.mxu1 %vm40_vm0, %v1281_v13  ;;  %v6644_v13 = vsel %vm459_vm4, 0.0, %v5912_v47 }
 0x28c   :  { %4925 = vmatmul.mubr.msk.f32.gmra.mrb[48].mxu1 %vm40_vm0, %v6536_v59 }
 0x313   :  { %v4810_v62 = vpop.f32.mrb[20].mxu0 }
 0x314   :  { %v6613_v44 = vadd.f32 %v4810_v62, %v6609_v52  ;;  %v1005_v11 = vpop.f32.mrb[21].mxu0 }
 0x315   :  { %v6620_v24 = vadd.f32 %v1005_v11, %v6616_v14 }
 0x317   :  { %v4813_v55 = vpop.f32.mrb[22].mxu0 }
 0x318   :  { %v6627_v1 = vadd.f32 %v4813_v55, %v6623_v0  ;;  %v1015_v48 = vpop.f32.mrb[23].mxu0 }
 0x319   :  { %v6634_v2 = vadd.f32 %v1015_v48, %v6630_v23 }
 0x31b   :  { %v4816_v59 = vpop.f32.mrb[24].mxu0 }
 0x31c   :  { %v6641_v33 = vadd.f32 %v4816_v59, %v6637_v35  ;;  %v1025_v57 = vpop.f32.mrb[25].mxu0 }
 0x31d   :  { %v6648_v25 = vadd.f32 %v1025_v57, %v6644_v13 }
 0x31f   :  { %v4819_v45 = vpop.f32.mrb[26].mxu0 }
 0x320   :  { %v6655_v3 = vadd.f32 %v4819_v45, %v6651_v29  ;;  %v1035_v41 = vpop.f32.mrb[27].mxu0 }
 0x321   :  { %v6662_v4 = vadd.f32 %v1035_v41, %v6658_v38 }
 0x323   :  { %v4822_v34 = vpop.f32.mrb[28].mxu0 }
 0x324   :  { %v6668_v60 = vadd.f32 %v4822_v34, %v6665_v12  ;;  %v1045_v42 = vpop.f32.mrb[29].mxu0 }
 0x325   :  { %v6674_v46 = vadd.f32 %v1045_v42, %v6671_v5 }
 0x327   :  { %v4879_v6 = vpop.f32.mrb[30].mxu0 }
 0x328   :  { %v1494_v39 = vadd.f32 %v4879_v6, %v4172_v9  ;;  %v1488_v10 = vpop.f32.mrb[31].mxu0 }
 0x329   :  { %v1489_v61 = vadd.f32 %v4172_v9, %v1488_v10 }
 0x32b   :  { %v5435_v53 = vpack.c.bf16 %v1494_v39, %v1489_v61  ;;  %v4882_v17 = vpop.f32.mrb[32].mxu0 }
 0x32c   :  { %v1504_v16 = vadd.f32 %v4882_v17, %v4172_v9  ;;  %v1498_v19 = vpop.f32.mrb[33].mxu0 }
 0x32d   :  { %v1499_v27 = vadd.f32 %v4172_v9, %v1498_v19  ;;  %5436 = vmatprep.subr.bf16.mxu0 %v5435_v53 }
 0x32e   :  { %5438 = vmatpush3.bf16.msra.mxu0 %v5435_v53 }
 0x32f   :  { %v5439_v31 = vpack.c.bf16 %v1504_v16, %v1499_v27  ;;  %v4885_v63 = vpop.f32.mrb[34].mxu0 }
 0x330   :  { %v1514_v37 = vadd.f32 %v4885_v63, %v4172_v9  ;;  %v1508_v56 = vpop.f32.mrb[35].mxu0 }
 0x331   :  { %v1509_v62 = vadd.f32 %v4172_v9, %v1508_v56  ;;  %5440 = vmatprep.subr.bf16.mxu0 %v5439_v31 }
 0x332   :  { %5442 = vmatpush3.bf16.msra.mxu0 %v5439_v31 }
 0x333   :  { %v5443_v11 = vpack.c.bf16 %v1514_v37, %v1509_v62  ;;  %v4888_v55 = vpop.f32.mrb[36].mxu0 }
 0x334   :  { %v1524_v48 = vadd.f32 %v4888_v55, %v4172_v9  ;;  %v1518_v59 = vpop.f32.mrb[37].mxu0 }
 0x335   :  { %v1519_v57 = vadd.f32 %v4172_v9, %v1518_v59  ;;  %5444 = vmatprep.subr.bf16.mxu0 %v5443_v11 }
 0x336   :  { %5446 = vmatpush3.bf16.msra.mxu0 %v5443_v11 }
 0x337   :  { %v5447_v45 = vpack.c.bf16 %v1524_v48, %v1519_v57  ;;  %v4891_v41 = vpop.f32.mrb[38].mxu0 }
 0x338   :  { %v1534_v34 = vadd.f32 %v4891_v41, %v4172_v9  ;;  %v1528_v42 = vpop.f32.mrb[39].mxu0 }
 0x339   :  { %v1529_v6 = vadd.f32 %v4172_v9, %v1528_v42  ;;  %5448 = vmatprep.subr.bf16.mxu0 %v5447_v45 }
 0x33a   :  { %5450 = vmatpush3.bf16.msra.mxu0 %v5447_v45 }
 0x33b   :  { %v5451_v39 = vpack.c.bf16 %v1534_v34, %v1529_v6  ;;  %v1058_v6 = vsel %vm1054_vm12, %v6613_v44, -inf }
 0x33d   :  { %5452 = vmatprep.subr.bf16.mxu0 %v5451_v39 }
 0x33e   :  { %5454 = vmatpush3.bf16.msra.mxu0 %v5451_v39  ;;  %v1061_v39 = vsel %vm1054_vm12, %v6634_v2, -inf }
 0x33f   :  { %5456 = vmatprep.subr.bf16.mxu0 %v6457_v7 }
 0x34f   :  { %v4914_v10 = vpop.f32.mrb[40].mxu1 }
 0x350   :  { %v6681_v61 = vadd.f32 %v4914_v10, %v6609_v52  ;;  %v1663_v53 = vpop.f32.mrb[41].mxu1  ;;  %v1070_v10 = vsel %vm1054_vm12, %v6641_v33, -inf }
 0x351   :  { %v6684_v17 = vadd.f32 %v1663_v53, %v6616_v14  ;;  %v1067_v53 = vsel %vm1054_vm12, %v6648_v25, -inf }
 0x352   :  { %v1715_v16 = vsel %vm1054_vm12, %v6681_v61, -inf }
 0x353   :  { %1716 = vmax.xlane.f32.xlu1 %v1715_v16  ;;  %v4917_v9 = vpop.f32.mrb[42].mxu1  ;;  %v1712_v19 = vsel %vm1054_vm12, %v6684_v17, -inf  ;;  %v1076_v16 = vsel %vm1054_vm12, %v6655_v3, -inf }
 0x354   :  { %v6691_v27 = vadd.f32 %v4917_v9, %v6623_v0  ;;  %v1673_v31 = vpop.f32.mrb[43].mxu1  ;;  %1713 = vmax.xlane.f32.xlu0 %v1712_v19  ;;  %v1073_v9 = vsel %vm1054_vm12, %v6662_v4, -inf  ;;  %v6749_v19 = vld [vmem:[%s7423_s1 + $0x8] sm:$0xff] }
 0x355   :  { %v6694_v52 = vadd.f32 %v1673_v31, %v6630_v23  ;;  %v1082_v31 = vsel %vm1054_vm12, %v6668_v60, -inf }
 0x356   :  { %v1721_v14 = vsel %vm1054_vm12, %v6691_v27, -inf }
 0x357   :  { %1722 = vmax.xlane.f32.xlu1 %v1721_v14  ;;  %v4920_v63 = vpop.f32.mrb[44].mxu1  ;;  %v1718_v37 = vsel %vm1054_vm12, %v6694_v52, -inf  ;;  %v6756_v14 = vld [vmem:[%s7423_s1] sm:$0xff] }
 0x358   :  { %v6701_v56 = vadd.f32 %v4920_v63, %v6637_v35  ;;  %v1683_v62 = vpop.f32.mrb[45].mxu1  ;;  %1719 = vmax.xlane.f32.xlu0 %v1718_v37  ;;  %v1079_v63 = vsel %vm1054_vm12, %v6674_v46, -inf  ;;  %v203_v37 = vsel %vm40_vm0, %v6749_v19, 0.0 }
 0x359   :  { %v6704_v0 = vadd.f32 %v1683_v62, %v6644_v13  ;;  %v200_v62 = vsel %vm40_vm0, %v6756_v14, 0.0 }
 0x35a   :  { %v1727_v23 = vsel %vm1054_vm12, %v6701_v56, -inf }
 0x35b   :  { %1728 = vmax.xlane.f32.xlu1 %v1727_v23  ;;  %v4923_v11 = vpop.f32.mrb[46].mxu1  ;;  %v1724_v55 = vsel %vm1054_vm12, %v6704_v0, -inf }
 0x35c   :  { %v6711_v48 = vadd.f32 %v4923_v11, %v6651_v29  ;;  %v1693_v59 = vpop.f32.mrb[47].mxu1  ;;  %1725 = vmax.xlane.f32.xlu0 %v1724_v55 }
 0x35d   :  { %v6714_v35 = vadd.f32 %v1693_v59, %v6658_v38 }
 0x35e   :  { %v1733_v13 = vsel %vm1054_vm12, %v6711_v48, -inf }
 0x35f   :  { %1734 = vmax.xlane.f32.xlu1 %v1733_v13  ;;  %v4926_v57 = vpop.f32.mrb[48].mxu1  ;;  %v1730_v45 = vsel %vm1054_vm12, %v6714_v35, -inf }
 0x360   :  { %v6721_v41 = vadd.f32 %v4926_v57, %v6665_v12  ;;  %v1703_v34 = vpop.f32.mrb[49].mxu1  ;;  %1731 = vmax.xlane.f32.xlu0 %v1730_v45  ;;  %v1055_v12 = vsel %vm1054_vm12, %v6620_v24, -inf }
 0x361   :  { %v6724_v29 = vadd.f32 %v1703_v34, %v6671_v5  ;;  %v1064_v5 = vsel %vm1054_vm12, %v6627_v1, -inf }
 0x362   :  { %v1739_v38 = vsel %vm1054_vm12, %v6721_v41, -inf }
 0x363   :  { %1740 = vmax.xlane.f32.xlu1 %v1739_v38  ;;  %v1736_v42 = vsel %vm1054_vm12, %v6724_v29, -inf }
 0x364   :  { %1737 = vmax.xlane.f32.xlu0 %v1736_v42 }
 0x367   :  { %1059 = vmax.xlane.f32.xlu1 %v1058_v6 }
 0x368   :  { %1056 = vmax.xlane.f32.xlu0 %v1055_v12 }
 0x36b   :  { %1065 = vmax.xlane.f32.xlu1 %v1064_v5 }
 0x36c   :  { %1062 = vmax.xlane.f32.xlu0 %v1061_v39 }
 0x36f   :  { %1071 = vmax.xlane.f32.xlu1 %v1070_v10 }
 0x370   :  { %1068 = vmax.xlane.f32.xlu0 %v1067_v53 }
 0x373   :  { %1077 = vmax.xlane.f32.xlu1 %v1076_v16 }
 0x374   :  { %1074 = vmax.xlane.f32.xlu0 %v1073_v9 }
 0x377   :  { %1083 = vmax.xlane.f32.xlu1 %v1082_v31 }
 0x378   :  { %1080 = vmax.xlane.f32.xlu0 %v1079_v63 }
 0x37b   :  { %204 = vadd.xlane.f32.xlu1 %v203_v37 }
 0x37c   :  { %201 = vadd.xlane.f32.xlu0 %v200_v62 }
 0x3e0   :  { %v1717_v23 = vpop.xlane.xlu1 %1716 }
 0x3e1   :  { %v1714_v11 = vpop.xlane.xlu0 %1713  ;;  %v1743_v6 = vsub.f32 %v6681_v61, %v1717_v23 }
 0x3e2   :  { %v1742_v12 = vsub.f32 %v6684_v17, %v1714_v11 }
 0x3e3   :  { %v1754_v16 = vmul.f32 1.442695, %v1743_v6 }
 0x3e4   :  { %v1723_v55 = vpop.xlane.xlu1 %1722  ;;  %v1752_v63 = vmul.f32 1.442695, %v1742_v12 }
 0x3e5   :  { %v1720_v59 = vpop.xlane.xlu0 %1719  ;;  %v1745_v9 = vsub.f32 %v6691_v27, %v1723_v55 }
 0x3e6   :  { %v1744_v37 = vsub.f32 %v6694_v52, %v1720_v59 }
 0x3e7   :  { %v1758_v61 = vmul.f32 1.442695, %v1745_v9 }
 0x3e8   :  { %v1729_v13 = vpop.xlane.xlu1 %1728  ;;  %v1756_v23 = vmul.f32 1.442695, %v1744_v37 }
 0x3e9   :  { %v1726_v57 = vpop.xlane.xlu0 %1725  ;;  %v1747_v17 = vsub.f32 %v6701_v56, %v1729_v13 }
 0x3ec   :  { %v1735_v45 = vpop.xlane.xlu1 %1734 }
 0x3ed   :  { %v1732_v34 = vpop.xlane.xlu0 %1731  ;;  %v1749_v27 = vsub.f32 %v6711_v48, %v1735_v45 }
 0x3ee   :  { %v1748_v52 = vsub.f32 %v6714_v35, %v1732_v34 }
 0x3ef   :  { %v1766_v12 = vmul.f32 1.442695, %v1749_v27 }
 0x3f0   :  { %v1741_v38 = vpop.xlane.xlu1 %1740 }
 0x3f1   :  { %v1738_v42 = vpop.xlane.xlu0 %1737  ;;  %v1751_v56 = vsub.f32 %v6721_v41, %v1741_v38 }
 0x3f3   :  { %v1770_v41 = vmul.f32 1.442695, %v1751_v56 }
 0x3f4   :  { %v1060_v5 = vpop.xlane.xlu1 %1059 }
 0x3f5   :  { %v1086_v39 = vsub.f32 %v6613_v44, %v1060_v5  ;;  %v1057_v10 = vpop.xlane.xlu0 %1056  ;;  %v1746_v44 = vsub.f32 %v6704_v0, %v1726_v57  ;;  %v1764_v0 = vmul.f32 1.442695, %v1748_v52  ;;  %v1750_v57 = vsub.f32 %v6724_v29, %v1738_v42 }
 0x3f6   :  { %v1085_v53 = vsub.f32 %v6620_v24, %v1057_v10  ;;  %v1762_v24 = vmul.f32 1.442695, %v1747_v17 }
 0x3f7   :  { %v1097_v31 = vmul.f32 1.442695, %v1086_v39  ;;  %v1760_v55 = vmul.f32 1.442695, %v1746_v44  ;;  %v1768_v39 = vmul.f32 1.442695, %v1750_v57 }
 0x3f8   :  { %v1095_v62 = vmul.f32 1.442695, %v1085_v53  ;;  %v1066_v59 = vpop.xlane.xlu1 %1065 }
 0x3f9   :  { %5765 = vpow2.f32 %v1097_v31  ;;  %v1063_v11 = vpop.xlane.xlu0 %1062  ;;  %v1088_v38 = vsub.f32 %v6627_v1, %v1066_v59 }
 0x3fa   :  { %5767 = vpow2.f32 %v1095_v62  ;;  %v1087_v29 = vsub.f32 %v6634_v2, %v1063_v11 }
 0x3fb   :  { %5769 = vpow2.f32 %v1754_v16  ;;  %v1101_v1 = vmul.f32 1.442695, %v1088_v38 }
 0x3fc   :  { %5771 = vpow2.f32 %v1752_v63  ;;  %v1072_v42 = vpop.xlane.xlu1 %1071  ;;  %v1099_v2 = vmul.f32 1.442695, %v1087_v29 }
 0x3fd   :  { %5773 = vpow2.f32 %v1758_v61  ;;  %v1069_v5 = vpop.xlane.xlu0 %1068  ;;  %v1090_v63 = vsub.f32 %v6641_v33, %v1072_v42 }
 0x3fe   :  { %5775 = vpow2.f32 %v1756_v23  ;;  %v1089_v37 = vsub.f32 %v6648_v25, %v1069_v5 }
 0x3ff   :  { %5777 = vpow2.f32 %v1762_v24  ;;  %v1105_v11 = vmul.f32 1.442695, %v1090_v63 }
 0x400   :  { %5779 = vpow2.f32 %v1760_v55  ;;  %v1078_v44 = vpop.xlane.xlu1 %1077  ;;  %v1103_v24 = vmul.f32 1.442695, %v1089_v37 }
 0x401   :  { %5781 = vpow2.f32 %v1766_v12  ;;  %v1075_v31 = vpop.xlane.xlu0 %1074  ;;  %v1092_v12 = vsub.f32 %v6655_v3, %v1078_v44 }
 0x402   :  { %5783 = vpow2.f32 %v1764_v0  ;;  %v1091_v33 = vsub.f32 %v6662_v4, %v1075_v31 }
 0x403   :  { %v6774_v6 = vpop.eup %5765  ;;  %5785 = vpow2.f32 %v1770_v41  ;;  %v1109_v41 = vmul.f32 1.442695, %v1092_v12 }
 0x404   :  { %v6777_v13 = vpop.eup %5767  ;;  %v1118_v48 = vsel %vm1054_vm12, %v6774_v6, 0.0  ;;  %5787 = vpow2.f32 %v1768_v39  ;;  %v1107_v56 = vmul.f32 1.442695, %v1091_v33  ;;  %v1084_v4 = vpop.xlane.xlu1 %1083 }
 0x405   :  { %v6782_v45 = vpop.eup %5769  ;;  %1119 = vadd.xlane.f32.xlu1 %v1118_v48  ;;  %v1115_v35 = vsel %vm1054_vm12, %v6777_v13, 0.0  ;;  %5789 = vpow2.f32 %v1101_v1  ;;  %v1081_v25 = vpop.xlane.xlu0 %1080  ;;  %v1094_v3 = vsub.f32 %v6668_v60, %v1084_v4 }
 0x406   :  { %v6786_v34 = vpop.eup %5771  ;;  %1116 = vadd.xlane.f32.xlu0 %v1115_v35  ;;  %v1775_v10 = vsel %vm1054_vm12, %v6782_v45, 0.0  ;;  %5791 = vpow2.f32 %v1099_v2  ;;  %v1093_v39 = vsub.f32 %v6674_v46, %v1081_v25 }
 0x407   :  { %v6792_v53 = vpop.eup %5773  ;;  %v1772_v16 = vsel %vm1054_vm12, %v6786_v34, 0.0  ;;  %5793 = vpow2.f32 %v1105_v11  ;;  %v1113_v1 = vmul.f32 1.442695, %v1094_v3  ;;  %v2113_v3 = vld [vmem:[%s7425_s3 + $0xc8] sm:$0xff] }
 0x408   :  { %v6796_v9 = vpop.eup %5775  ;;  %v1781_v62 = vsel %vm1054_vm12, %v6792_v53, 0.0  ;;  %5795 = vpow2.f32 %v1103_v24  ;;  %v205_v42 = vpop.xlane.xlu1 %204  ;;  %v1111_v46 = vmul.f32 1.442695, %v1093_v39 }
 0x409   :  { %1776 = vadd.xlane.f32.xlu1 %v1775_v10  ;;  %v6802_v61 = vpop.eup %5777  ;;  %v1778_v17 = vsel %vm1054_vm12, %v6796_v9, 0.0  ;;  %v202_v57 = vpop.xlane.xlu0 %201  ;;  %5797 = vpow2.f32 %v1107_v56  ;;  %v207_v63 = vmul.f32 0.03125, %v205_v42 }
 0x40a   :  { %1773 = vadd.xlane.f32.xlu0 %v1772_v16  ;;  %v6806_v23 = vpop.eup %5779  ;;  %v1787_v27 = vsel %vm1054_vm12, %v6802_v61, 0.0  ;;  %v206_v38 = vmul.f32 0.03125, %v202_v57  ;;  %5799 = vpow2.f32 %v1109_v41  ;;  %v2112_v41 = vld [vmem:[%s7425_s3 + $0xc0] sm:$0xff] }
 0x40b   :  { %v6811_v55 = vpop.eup %5781  ;;  %v1784_v52 = vsel %vm1054_vm12, %v6806_v23, 0.0  ;;  %5801 = vpow2.f32 %v1113_v1  ;;  %v6848_v44 = vsub.f32 %v6749_v19, %v207_v63  ;;  %v5475_v39 = vpack.c.bf16 %v2113_v3, %v2112_v41 }
 0x40c   :  { %v6815_v59 = vpop.eup %5783  ;;  %v1793_v0 = vsel %vm1054_vm12, %v6811_v55, 0.0  ;;  %v6837_v60 = vsub.f32 %v6756_v14, %v206_v38  ;;  %5803 = vpow2.f32 %v1111_v46  ;;  %v2114_v38 = vld [vmem:[%s7425_s3 + $0xd0] sm:$0xff] }
 0x40d   :  { %1782 = vadd.xlane.f32.xlu1 %v1781_v62  ;;  %v6820_v5 = vpop.eup %5785  ;;  %v1790_v48 = vsel %vm1054_vm12, %v6815_v59, 0.0  ;;  %v211_v19 = vmul.f32 %v6848_v44, %v6848_v44  ;;  %5476 = vmatprep.subr.bf16.mxu1 %v5475_v39 }
 0x40e   :  { %1779 = vadd.xlane.f32.xlu0 %v1778_v17  ;;  %v6824_v35 = vpop.eup %5787  ;;  %v1799_v29 = vsel %vm1054_vm12, %v6820_v5, 0.0  ;;  %v210_v14 = vmul.f32 %v6837_v60, %v6837_v60  ;;  %5478 = vmatpush3.bf16.msra.mxu1 %v5475_v39 }
 0x40f   :  { %v6830_v10 = vpop.eup %5789  ;;  %v1796_v16 = vsel %vm1054_vm12, %v6824_v35, 0.0  ;;  %v215_v12 = vsel %vm40_vm0, %v211_v19, 0.0 }
 0x410   :  { %v6834_v31 = vpop.eup %5791  ;;  %v1124_v2 = vsel %vm1054_vm12, %v6830_v10, 0.0  ;;  %v212_v25 = vsel %vm40_vm0, %v210_v14, 0.0 }
 0x411   :  { %1788 = vadd.xlane.f32.xlu1 %v1787_v27  ;;  %v6841_v37 = vpop.eup %5793  ;;  %v1121_v62 = vsel %vm1054_vm12, %v6834_v31, 0.0 }
 0x412   :  { %1785 = vadd.xlane.f32.xlu0 %v1784_v52  ;;  %v6845_v17 = vpop.eup %5795  ;;  %v1130_v11 = vsel %vm1054_vm12, %v6841_v37, 0.0 }
 0x413   :  { %v6854_v33 = vpop.eup %5797  ;;  %v1127_v24 = vsel %vm1054_vm12, %v6845_v17, 0.0 }
 0x414   :  { %v1133_v27 = vsel %vm1054_vm12, %v6854_v33, 0.0  ;;  %v6863_v52 = vpop.eup %5799 }
 0x415   :  { %1794 = vadd.xlane.f32.xlu1 %v1793_v0  ;;  %v1136_v56 = vsel %vm1054_vm12, %v6863_v52, 0.0  ;;  %v6868_v4 = vpop.eup %5801 }
 0x416   :  { %1791 = vadd.xlane.f32.xlu0 %v1790_v48  ;;  %v6870_v0 = vpop.eup %5803  ;;  %v1142_v57 = vsel %vm1054_vm12, %v6868_v4, 0.0 }
 0x417   :  { %v1139_v48 = vsel %vm1054_vm12, %v6870_v0, 0.0 }
 0x419   :  { %1800 = vadd.xlane.f32.xlu1 %v1799_v29  ;;  %v2115_v29 = vld [vmem:[%s7425_s3 + $0xd8] sm:$0xff] }
 0x41a   :  { %1797 = vadd.xlane.f32.xlu0 %v1796_v16  ;;  %v5479_v42 = vpack.c.bf16 %v2115_v29, %v2114_v38 }
 0x41c   :  { %5480 = vmatprep.subr.bf16.mxu1 %v5479_v42 }
 0x41d   :  { %1125 = vadd.xlane.f32.xlu1 %v1124_v2  ;;  %5482 = vmatpush3.bf16.msra.mxu1 %v5479_v42 }
 0x41e   :  { %1122 = vadd.xlane.f32.xlu0 %v1121_v62 }
 0x421   :  { %1131 = vadd.xlane.f32.xlu1 %v1130_v11 }
 0x422   :  { %1128 = vadd.xlane.f32.xlu0 %v1127_v24 }
 0x425   :  { %1134 = vadd.xlane.f32.xlu1 %v1133_v27 }
 0x426   :  { %213 = vadd.xlane.f32.xlu0 %v212_v25 }
 0x429   :  { %1137 = vadd.xlane.f32.xlu1 %v1136_v56 }
 0x42a   :  { %216 = vadd.xlane.f32.xlu0 %v215_v12 }
 0x42d   :  { %1143 = vadd.xlane.f32.xlu1 %v1142_v57 }
 0x42e   :  { %1140 = vadd.xlane.f32.xlu0 %v1139_v48 }
 0x492   :  { %v1120_v16 = vpop.xlane.xlu1 %1119 }
 0x493   :  { %v1117_v1 = vpop.xlane.xlu0 %1116 }
 0x496   :  { %v1777_v63 = vpop.xlane.xlu1 %1776 }
 0x497   :  { %5805 = vrcp.f32 %v1777_v63  ;;  %v1774_v46 = vpop.xlane.xlu0 %1773 }
 0x498   :  { %5807 = vrcp.f32 %v1774_v46 }
 0x49a   :  { %v1783_v2 = vpop.xlane.xlu1 %1782 }
 0x49b   :  { %5809 = vrcp.f32 %v1783_v2  ;;  %v1780_v62 = vpop.xlane.xlu0 %1779  ;;  %v2276_v2 = vld [vmem:[%s7425_s3 + $0xe0] sm:$0xff] }
 0x49c   :  { %5811 = vrcp.f32 %v1780_v62 }
 0x49e   :  { %v1789_v14 = vpop.xlane.xlu1 %1788 }
 0x49f   :  { %5813 = vrcp.f32 %v1789_v14  ;;  %v1786_v11 = vpop.xlane.xlu0 %1785 }
 0x4a0   :  { %5815 = vrcp.f32 %v1786_v11 }
 0x4a1   :  { %v5806_v24 = vpop.eup %5805 }
 0x4a2   :  { %v5808_v25 = vpop.eup %5807  ;;  %v1795_v19 = vpop.xlane.xlu1 %1794  ;;  %v1813_v56 = vmul.f32 %v5806_v24, %v6782_v45 }
 0x4a3   :  { %5817 = vrcp.f32 %v1795_v19  ;;  %v1792_v27 = vpop.xlane.xlu0 %1791  ;;  %v1812_v12 = vmul.f32 %v5808_v25, %v6786_v34 }
 0x4a4   :  { %5819 = vrcp.f32 %v1792_v27 }
 0x4a5   :  { %v5810_v57 = vpop.eup %5809  ;;  %4947 = vmatprep.mubr.msk.f32.mxu0 %vm1054_vm12, %v1812_v12  ;;  %5821 = vrcp.f32 %v1117_v1  ;;  %v2278_v12 = vld [vmem:[%s7425_s3 + $0xf0] sm:$0xff] }
 0x4a6   :  { %v5812_v48 = vpop.eup %5811  ;;  %v1801_v41 = vpop.xlane.xlu1 %1800  ;;  %4948 = vmatmul.mubr.msk.f32.vlgmr.msra.gmra.mrb[40].mxu0 %vm1054_vm12, %v1813_v56  ;;  %v1815_v45 = vmul.f32 %v5810_v57, %v6792_v53 }
 0x4a7   :  { %5823 = vrcp.f32 %v1801_v41  ;;  %5458 = vmatpush3.bf16.msra.mxu0 %v6457_v7  ;;  %v1798_v3 = vpop.xlane.xlu0 %1797  ;;  %v1814_v38 = vmul.f32 %v5812_v48, %v6796_v9 }
 0x4a8   :  { %5460 = vmatprep.subr.bf16.mxu0 %v6461_v58  ;;  %5825 = vrcp.f32 %v1798_v3 }
 0x4a9   :  { %v5814_v34 = vpop.eup %5813  ;;  %4950 = vmatprep.mubr.msk.f32.mxu0 %vm1054_vm12, %v1814_v38  ;;  %5827 = vrcp.f32 %v1120_v16 }
 0x4aa   :  { %v5816_v39 = vpop.eup %5815  ;;  %v1126_v29 = vpop.xlane.xlu1 %1125  ;;  %4951 = vmatmul.mubr.msk.f32.gmra.mrb[42].mxu0 %vm1054_vm12, %v1815_v45  ;;  %v1817_v9 = vmul.f32 %v5814_v34, %v6802_v61  ;;  %v2581_v45 = vld [vmem:[%s7425_s3 + $0x120] sm:$0xff] }
 0x4ab   :  { %5462 = vmatpush3.bf16.msra.mxu0 %v6461_v58  ;;  %v1123_v42 = vpop.xlane.xlu0 %1122  ;;  %v1816_v7 = vmul.f32 %v5816_v39, %v6806_v23 }
 0x4ac   :  { %5464 = vmatprep.subr.bf16.mxu0 %v6465_v18  ;;  %5829 = vrcp.f32 %v1123_v42 }
 0x4ad   :  { %v5818_v1 = vpop.eup %5817  ;;  %4953 = vmatprep.mubr.msk.f32.mxu0 %vm1054_vm12, %v1816_v7  ;;  %5831 = vrcp.f32 %v1126_v29 }
 0x4ae   :  { %v5820_v53 = vpop.eup %5819  ;;  %v1132_v63 = vpop.xlane.xlu1 %1131  ;;  %4954 = vmatmul.mubr.msk.f32.gmra.mrb[44].mxu0 %vm1054_vm12, %v1817_v9  ;;  %v1819_v23 = vmul.f32 %v5818_v1, %v6811_v55 }
 0x4af   :  { %5466 = vmatpush3.bf16.msra.mxu0 %v6465_v18  ;;  %v1129_v16 = vpop.xlane.xlu0 %1128  ;;  %v1818_v58 = vmul.f32 %v5820_v53, %v6815_v59  ;;  %v5822_v46 = vpop.eup %5821  ;;  %v2277_v18 = vld [vmem:[%s7425_s3 + $0xe8] sm:$0xff]  ;;  %v228_v53 = vsub.s32 2, %v6020_v43 }
 0x4b0   :  { %5468 = vmatprep.subr.bf16.mxu0 %v6475_v8  ;;  %5833 = vrcp.f32 %v1129_v16  ;;  %v5483_v25 = vpack.c.bf16 %v2277_v18, %v2276_v2  ;;  %v1155_v27 = vmul.f32 %v5822_v46, %v6777_v13 }
 0x4b1   :  { %v5824_v61 = vpop.eup %5823  ;;  %4956 = vmatprep.mubr.msk.f32.mxu0 %vm1054_vm12, %v1818_v58  ;;  %5835 = vrcp.f32 %v1132_v63 }
 0x4b2   :  { %v5826_v62 = vpop.eup %5825  ;;  %v1135_v14 = vpop.xlane.xlu1 %1134  ;;  %4957 = vmatmul.mubr.msk.f32.gmra.mrb[46].mxu0 %vm1054_vm12, %v1819_v23  ;;  %v1821_v24 = vmul.f32 %v5824_v61, %v6820_v5  ;;  %v234_v23 = vsub.s32 3, %v6020_v43 }
 0x4b3   :  { %5470 = vmatpush3.bf16.msra.mxu0 %v6475_v8  ;;  %v214_v59 = vpop.xlane.xlu0 %213  ;;  %v1820_v55 = vmul.f32 %v5826_v62, %v6824_v35  ;;  %5837 = vrcp.f32 %v1135_v14  ;;  %v5828_v19 = vpop.eup %5827  ;;  %v2279_v8 = vld [vmem:[%s7425_s3 + $0xf8] sm:$0xff] }
 0x4b4   :  { %5472 = vmatprep.subr.bf16.mxu0 %v6484_v15  ;;  %v218_v11 = vmul.f32 0.03125, %v214_v59  ;;  %v1156_v13 = vmul.f32 %v5828_v19, %v6774_v6  ;;  %v5487_v41 = vpack.c.bf16 %v2279_v8, %v2278_v12  ;;  %v2369_v12 = vld [vmem:[%s7425_s3 + $0x118] sm:$0xff] }
 0x4b5   :  { %4959 = vmatprep.mubr.msk.f32.mxu0 %vm1054_vm12, %v1820_v55 }
 0x4b6   :  { %v5830_v35 = vpop.eup %5829  ;;  %v220_v56 = vadd.f32 1e-05, %v218_v11  ;;  %v1138_v57 = vpop.xlane.xlu1 %1137  ;;  %4960 = vmatmul.mubr.msk.f32.gmra.mrb[48].mxu0 %vm1054_vm12, %v1821_v24 }
 0x4b7   :  { %5839 = vrcp.f32 %v1138_v57  ;;  %5474 = vmatpush3.bf16.msra.mxu0 %v6484_v15  ;;  %4982 = vmatprep.mubr.msk.f32.mxu0 %vm1054_vm12, %v1155_v27  ;;  %v217_v5 = vpop.xlane.xlu0 %216  ;;  %v5832_v3 = vpop.eup %5831  ;;  %v1157_v38 = vmul.f32 %v5830_v35, %v6834_v31  ;;  %v2582_v15 = vld [vmem:[%s7425_s3 + $0x128] sm:$0xff]  ;;  %v2368_v27 = vld [vmem:[%s7425_s3 + $0x110] sm:$0xff] }
 0x4b8   :  { %5841 = vrsqrt.f32 %v220_v56  ;;  %v219_v48 = vmul.f32 0.03125, %v217_v5  ;;  %5484 = vmatprep.subr.bf16.mxu0 %v5483_v25  ;;  %v1158_v31 = vmul.f32 %v5832_v3, %v6830_v10  ;;  %v5503_v42 = vpack.c.bf16 %v2582_v15, %v2581_v45  ;;  %v4234_v15 = vld [vmem:[%s7426_s4 + $0x7] ss:$0 sm:$0xff] }
 0x4b9   :  { %v5495_v56 = vpack.c.bf16 %v2369_v12, %v2368_v27 }
 0x4ba   :  { %v5834_v34 = vpop.eup %5833  ;;  %v221_v39 = vadd.f32 1e-05, %v219_v48  ;;  %v1144_v29 = vpop.xlane.xlu1 %1143  ;;  %4983 = vmatmul.mubr.msk.f32.vlgmr.msra.gmra.mrb[40].mxu0 %vm1054_vm12, %v1156_v13 }
 0x4bb   :  { %5843 = vrcp.f32 %v1144_v29  ;;  %4985 = vmatprep.mubr.msk.f32.mxu0 %vm1054_vm12, %v1157_v38  ;;  %5486 = vmatpush3.bf16.msra.mxu0 %v5483_v25  ;;  %v1141_v6 = vpop.xlane.xlu0 %1140  ;;  %v5836_v7 = vpop.eup %5835  ;;  %v1159_v9 = vmul.f32 %v5834_v34, %v6845_v17  ;;  %v5873_v17 = vld [vmem:[%s7424_s2] sm:$0xf]  ;;  %v2367_v25 = vld [vmem:[%s7425_s3 + $0x108] sm:$0xff] }
 0x4bc   :  { %5845 = vrsqrt.f32 %v221_v39  ;;  %5488 = vmatprep.subr.bf16.mxu0 %v5487_v41  ;;  %v1160_v63 = vmul.f32 %v5836_v7, %v6841_v37  ;;  %v229_v46 = vrot.slane %v5873_v17, %v228_v53  ;;  %v235_v62 = vrot.slane %v5873_v17, %v234_v23  ;;  %v2666_v53 = vld [vmem:[%s7425_s3 + $0x148] sm:$0xff]  ;;  %v2819_v17 = vld [vmem:[%s7425_s3 + $0x160] sm:$0xff] }
 0x4bd   :  { %5847 = vrcp.f32 %v1141_v6  ;;  %v5838_v1 = vpop.eup %5837 }
 0x4be   :  { %4986 = vmatmul.mubr.msk.f32.gmra.mrb[42].mxu0 %vm1054_vm12, %v1158_v31  ;;  %v1161_v10 = vmul.f32 %v5838_v1, %v6854_v33  ;;  %v7010_v31 = vld [vmem:[%s7426_s4 + $0x9] ss:$0 sm:$0xff]  ;;  %v2665_v1 = vld [vmem:[%s7425_s3 + $0x140] sm:$0xff] }
 0x4bf   :  { %4988 = vmatprep.mubr.msk.f32.mxu0 %vm1054_vm12, %v1159_v9  ;;  %5490 = vmatpush3.bf16.msra.mxu0 %v5487_v41 }
 0x4c0   :  { %5504 = vmatprep.subr.bf16.mxu0 %v5503_v42 }
 0x4c1   :  { %v5840_v16 = vpop.eup %5839 }
 0x4c2   :  { %v5842_v58 = vpop.eup %5841  ;;  %4989 = vmatmul.mubr.msk.f32.gmra.mrb[44].mxu0 %vm1054_vm12, %v1160_v63  ;;  %v1162_v37 = vmul.f32 %v5840_v16, %v6863_v52  ;;  %v2584_v52 = vld [vmem:[%s7425_s3 + $0x138] sm:$0xff]  ;;  %v5511_v63 = vpack.c.bf16 %v2666_v53, %v2665_v1 }
 0x4c3   :  { %4991 = vmatprep.mubr.msk.f32.mxu0 %vm1054_vm12, %v1161_v10  ;;  %v224_v61 = vmul.f32 %v5842_v58, %v6837_v60  ;;  %v2583_v60 = vld [vmem:[%s7425_s3 + $0x130] sm:$0xff] }
 0x4c5   :  { %v5844_v2 = vpop.eup %5843  ;;  %v230_v33 = vmul.f32 %v229_v46, %v224_v61 }
 0x4c6   :  { %v5846_v18 = vpop.eup %5845  ;;  %4992 = vmatmul.mubr.msk.f32.gmra.mrb[46].mxu0 %vm1054_vm12, %v1162_v37  ;;  %v1164_v11 = vmul.f32 %v5844_v2, %v6868_v4  ;;  %v5507_v4 = vpack.c.bf16 %v2584_v52, %v2583_v60  ;;  %v2821_v2 = vld [vmem:[%s7425_s3 + $0x170] sm:$0xff] }
 0x4c7   :  { %v5848_v14 = vpop.eup %5847  ;;  %v225_v59 = vmul.f32 %v5846_v18, %v6848_v44  ;;  %v6961_v24 = vadd.f32 %v235_v62, %v230_v33  ;;  %v2822_v18 = vld [vmem:[%s7425_s3 + $0x178] sm:$0xff]  ;;  %v5876_v52 = vld [vmem:[%s7422_s0 + $0x10] sm:$0xff] }
 0x4c8   :  { %v1163_v55 = vmul.f32 %v5848_v14, %v6870_v0  ;;  %v2366_v0 = vld [vmem:[%s7425_s3 + $0x100] sm:$0xff]  ;;  %v5523_v33 = vpack.c.bf16 %v2822_v18, %v2821_v2 }
 0x4c9   :  { %v231_v43 = vmul.f32 %v229_v46, %v225_v59  ;;  %v5491_v19 = vpack.c.bf16 %v2367_v25, %v2366_v0  ;;  %v2820_v46 = vld [vmem:[%s7425_s3 + $0x168] sm:$0xff]  ;;  %v5877_v25 = vld [vmem:[%s7422_s0 + $0x18] sm:$0xff] }
 0x4ca   :  { %4994 = vmatprep.mubr.msk.f32.mxu0 %vm1054_vm12, %v1163_v55  ;;  %v5519_v37 = vpack.c.bf16 %v2820_v46, %v2819_v17  ;;  %v3078_v55 = vld [vmem:[%s7425_s3 + $0x190] sm:$0xff]  ;;  %v5883_v17 = vld [vmem:[%s7422_s0 + $0x48] sm:$0xff] }
 0x4cb   :  { %4995 = vmatmul.mubr.msk.f32.gmra.mrb[48].mxu0 %vm1054_vm12, %v1164_v11  ;;  %v6970_v44 = vadd.f32 %v235_v62, %v231_v43  ;;  %5492 = vmatprep.subr.bf16.mxu1 %v5491_v19  ;;  %v5875_v62 = vld [vmem:[%s7422_s0 + $0x8] sm:$0xff]  ;;  %v3079_v11 = vld [vmem:[%s7425_s3 + $0x198] sm:$0xff] }
 0x4cc   :  { %5028 = vmatprep.mubr.msk.f32.mxu0 %vm40_vm0, %v6961_v24  ;;  %v5561_v27 = vpack.c.bf16 %v3079_v11, %v3078_v55 }
 0x4cf   :  { %5029 = vmatmul.mubr.msk.f32.vlgmr.msra.gmra.mrb[50].mxu0 %vm40_vm0, %v6970_v44 }
 0x4d0   :  { %5506 = vmatpush3.bf16.msra.mxu0 %v5503_v42  ;;  %5069 = vmatprep.mubr.msk.f32.mxu0 %vm40_vm0, %v6961_v24 }
 0x4d1   :  { %5508 = vmatprep.subr.bf16.mxu0 %v5507_v4 }
 0x4d4   :  { %5510 = vmatpush3.bf16.msra.mxu0 %v5507_v4 }
 0x4d5   :  { %5512 = vmatprep.subr.bf16.mxu0 %v5511_v63 }
 0x4d7   :  { %5070 = vmatmul.mubr.msk.f32.vlgmr.msra.gmra.mrb[52].mxu0 %vm40_vm0, %v6970_v44 }
 0x4d8   :  { %5514 = vmatpush3.bf16.msra.mxu0 %v5511_v63 }
 0x58d   :  { %v4984_v8 = vpop.f32.mrb[40].mxu0 }
 0x58e   :  { %v2063_v35 = vpop.f32.mrb[41].mxu0 }
 0x58f   :  { %5005 = vmatprep.mubr.msk.f32.mxu1 %vm40_vm0, %v2063_v35  ;;  %v3161_v35 = vld [vmem:[%s7425_s3 + $0x1a8] sm:$0xff] }
 0x590   :  { %5006 = vmatmul.mubr.msk.f32.vlgmr.msra.gmra.mrb[50].mxu1 %vm40_vm0, %v4984_v8  ;;  %v3160_v8 = vld [vmem:[%s7425_s3 + $0x1a0] sm:$0xff] }
 0x591   :  { %v4987_v57 = vpop.f32.mrb[42].mxu0  ;;  %5494 = vmatpush3.bf16.msra.mxu1 %v5491_v19 }
 0x592   :  { %v2073_v5 = vpop.f32.mrb[43].mxu0  ;;  %5496 = vmatprep.subr.bf16.mxu1 %v5495_v56 }
 0x593   :  { %5008 = vmatprep.mubr.msk.f32.mxu1 %vm40_vm0, %v2073_v5  ;;  %v5878_v5 = vld [vmem:[%s7422_s0 + $0x20] sm:$0xff] }
 0x594   :  { %5009 = vmatmul.mubr.msk.f32.gmra.mrb[52].mxu1 %vm40_vm0, %v4987_v57 }
 0x595   :  { %v4990_v13 = vpop.f32.mrb[44].mxu0  ;;  %5498 = vmatpush3.bf16.msra.mxu1 %v5495_v56 }
 0x596   :  { %v2083_v48 = vpop.f32.mrb[45].mxu0 }
 0x597   :  { %5011 = vmatprep.mubr.msk.f32.mxu1 %vm40_vm0, %v2083_v48 }
 0x598   :  { %5012 = vmatmul.mubr.msk.f32.gmra.mrb[54].mxu1 %vm40_vm0, %v4990_v13 }
 0x599   :  { %v4993_v41 = vpop.f32.mrb[46].mxu0 }
 0x59a   :  { %v2093_v3 = vpop.f32.mrb[47].mxu0 }
 0x59b   :  { %5014 = vmatprep.mubr.msk.f32.mxu1 %vm40_vm0, %v2093_v3 }
 0x59c   :  { %5015 = vmatmul.mubr.msk.f32.gmra.mrb[56].mxu1 %vm40_vm0, %v4993_v41  ;;  %v5879_v41 = vld [vmem:[%s7422_s0 + $0x28] sm:$0xff] }
 0x59e   :  { %v4996_v38 = vpop.f32.mrb[48].mxu0 }
 0x59f   :  { %v2103_v45 = vpop.f32.mrb[49].mxu0 }
 0x5a0   :  { %5017 = vmatprep.mubr.msk.f32.mxu1 %vm40_vm0, %v2103_v45 }
 0x5a1   :  { %5018 = vmatmul.mubr.msk.f32.gmra.mrb[58].mxu1 %vm40_vm0, %v4996_v38  ;;  %v5565_v38 = vpack.c.bf16 %v3161_v35, %v3160_v8 }
 0x5a2   :  { %v5030_v34 = vpop.f32.mrb[50].mxu0 }
 0x5a3   :  { %v2357_v39 = vpop.f32.mrb[51].mxu0  ;;  %v2363_v6 = vadd.f32 %v5030_v34, %v4234_v15 }
 0x5a4   :  { %v2358_v29 = vadd.f32 %v4234_v15, %v2357_v39  ;;  %v5880_v39 = vld [vmem:[%s7422_s0 + $0x30] sm:$0xff] }
 0x5a6   :  { %5039 = vmatprep.mubr.msk.f32.mxu1 %vm40_vm0, %v2358_v29 }
 0x5a7   :  { %5040 = vmatmul.mubr.msk.f32.vlgmr.msra.gmra.mrb[60].mxu1 %vm40_vm0, %v2363_v6 }
 0x5a8   :  { %5046 = vmatprep.mubr.msk.f32.mxu1 %vm309_vm11, %v6082_v20  ;;  %v4237_v20 = vld [vmem:[%s7426_s4 + $0x8] ss:$0 sm:$0xff] }
 0x5aa   :  { %v5071_v42 = vpop.f32.mrb[52].mxu0 }
 0x5ab   :  { %v7015_v7 = vadd.f32 %v5071_v42, %v7010_v31  ;;  %v7017_v9 = vpop.f32.mrb[53].mxu0  ;;  %v5881_v42 = vld [vmem:[%s7422_s0 + $0x38] sm:$0xff] }
 0x5ac   :  { %v2657_v18 = vadd.f32 %v7010_v31, %v7017_v9 }
 0x67a   :  { %v5041_v16 = vpop.f32.mrb[60].mxu1 }
 0x67b   :  { %v2453_v10 = vadd.f32 %v5041_v16, %v4237_v20  ;;  %v2447_v58 = vpop.f32.mrb[61].mxu1  ;;  %v5882_v16 = vld [vmem:[%s7422_s0 + $0x40] sm:$0xff] }
 0x67c   :  { %v2448_v23 = vadd.f32 %v4237_v20, %v2447_v58 }
 0x67e   :  { %v5499_v61 = vpack.c.bf16 %v2453_v10, %v2448_v23 }
 0x680   :  { %5500 = vmatprep.subr.bf16.mxu1 %v5499_v61 }
 0x681   :  { %5502 = vmatpush3.bf16.msra.mxu1 %v5499_v61 }
 0x682   :  { %5520 = vmatprep.subr.bf16.mxu1 %v5519_v37 }
 0x684   :  { %5047 = vmatmul.mubr.msk.f32.vlgmr.msra.gmra.mrb[50].mxu1 %vm309_vm11, %v6088_v22  ;;  %v2667_v22 = vld [vmem:[%s7425_s3 + $0x150] sm:$0xff] }
 0x685   :  { %5049 = vmatprep.mubr.msk.f32.mxu1 %vm309_vm11, %v6098_v26  ;;  %5522 = vmatpush3.bf16.msra.mxu1 %v5519_v37  ;;  %v2668_v26 = vld [vmem:[%s7425_s3 + $0x158] sm:$0xff] }
 0x686   :  { %5524 = vmatprep.subr.bf16.mxu1 %v5523_v33 }
 0x688   :  { %5050 = vmatmul.mubr.msk.f32.gmra.mrb[52].mxu1 %vm309_vm11, %v6104_v28  ;;  %v5515_v28 = vpack.c.bf16 %v2668_v26, %v2667_v22  ;;  %v3163_v22 = vld [vmem:[%s7425_s3 + $0x1b8] sm:$0xff] }
 0x689   :  { %5052 = vmatprep.mubr.msk.f32.mxu1 %vm309_vm11, %v6114_v30  ;;  %5526 = vmatpush3.bf16.msra.mxu1 %v5523_v33  ;;  %v3076_v30 = vld [vmem:[%s7425_s3 + $0x180] sm:$0xff]  ;;  %v3162_v33 = vld [vmem:[%s7425_s3 + $0x1b0] sm:$0xff] }
 0x68a   :  { %5516 = vmatprep.subr.bf16.mxu0 %v5515_v28  ;;  %v5569_v31 = vpack.c.bf16 %v3163_v22, %v3162_v33 }
 0x68b   :  { %5518 = vmatpush3.bf16.msra.mxu0 %v5515_v28 }
 0x68c   :  { %5053 = vmatmul.mubr.msk.f32.gmra.mrb[54].mxu1 %vm309_vm11, %v6120_v32  ;;  %v3077_v32 = vld [vmem:[%s7425_s3 + $0x188] sm:$0xff] }
 0x68d   :  { %5055 = vmatprep.mubr.msk.f32.mxu1 %vm309_vm11, %v6130_v36  ;;  %v5557_v36 = vpack.c.bf16 %v3077_v32, %v3076_v30 }
 0x68f   :  { %5558 = vmatprep.subr.bf16.mxu1 %v5557_v36 }
 0x690   :  { %5056 = vmatmul.mubr.msk.f32.gmra.mrb[56].mxu1 %vm309_vm11, %v6142_v40  ;;  %v4223_v40 = vld [vmem:[%s7426_s4 + $0x6] ss:$0 sm:$0xff] }
 0x691   :  { %5058 = vmatprep.mubr.msk.f32.mxu1 %vm309_vm11, %v6168_v51  ;;  %v5874_v51 = vld [vmem:[%s7422_s0] sm:$0xff]  ;;  %v5695_v14 = vadd.f32 %v5875_v62, %v4223_v40  ;;  %v5701_v4 = vadd.f32 %v5876_v52, %v4223_v40  ;;  %v5699_v19 = vadd.f32 %v5877_v25, %v4223_v40  ;;  %v5705_v13 = vadd.f32 %v5878_v5, %v4223_v40 }
 0x692   :  { %v5703_v3 = vadd.f32 %v5879_v41, %v4223_v40  ;;  %v5709_v29 = vadd.f32 %v5880_v39, %v4223_v40  ;;  %v5707_v1 = vadd.f32 %v5881_v42, %v4223_v40  ;;  %v5713_v10 = vadd.f32 %v5882_v16, %v4223_v40 }
 0x693   :  { %v5711_v46 = vadd.f32 %v5883_v17, %v4223_v40 }
 0x694   :  { %5059 = vmatmul.mubr.msk.f32.gmra.mrb[58].mxu1 %vm309_vm11, %v6177_v54  ;;  %v5697_v54 = vadd.f32 %v5874_v51, %v4223_v40  ;;  %vm306_vm11 = vcmp.gt.f32.partialorder %v6163_v50, 0.5 }
 0x757   :  { %v5048_v59 = vpop.f32.mrb[50].mxu1 }
 0x758   :  { %v2522_v43 = vpop.f32.mrb[51].mxu1  ;;  %v7090_v0 = vadd.f32 %v5695_v14, %v5048_v59 }
 0x759   :  { %v7085_v60 = vadd.f32 %v5697_v54, %v2522_v43 }
 0x75b   :  { %v5051_v12 = vpop.f32.mrb[52].mxu1  ;;  %5080 = vmatprep.mubr.msk.f32.mxu0 %vm40_vm0, %v7085_v60  ;;  %5103 = vmatprep.mubr.msk.f32.mxu1 %vm40_vm0, %v7085_v60 }
 0x75c   :  { %v2532_v56 = vpop.f32.mrb[53].mxu1  ;;  %5081 = vmatmul.mubr.msk.f32.vlgmr.msra.gmra.mrb[54].mxu0 %vm40_vm0, %v7090_v0  ;;  %5104 = vmatmul.mubr.msk.f32.vlgmr.msra.gmra.mrb[62].mxu1 %vm40_vm0, %v7090_v0  ;;  %v7114_v48 = vadd.f32 %v5699_v19, %v5051_v12 }
 0x75d   :  { %v7109_v57 = vadd.f32 %v5701_v4, %v2532_v56  ;;  %5560 = vmatpush3.bf16.msra.mxu1 %v5557_v36 }
 0x75e   :  { %5562 = vmatprep.subr.bf16.mxu1 %v5561_v27 }
 0x75f   :  { %v5054_v45 = vpop.f32.mrb[54].mxu1  ;;  %5083 = vmatprep.mubr.msk.f32.mxu0 %vm40_vm0, %v7109_v57  ;;  %5106 = vmatprep.mubr.msk.f32.mxu1 %vm40_vm0, %v7109_v57 }
 0x760   :  { %v2542_v15 = vpop.f32.mrb[55].mxu1  ;;  %5084 = vmatmul.mubr.msk.f32.gmra.mrb[56].mxu0 %vm40_vm0, %v7114_v48  ;;  %5107 = vmatmul.mubr.msk.f32.gmra.mrb[64].mxu1 %vm40_vm0, %v7114_v48  ;;  %v7132_v6 = vadd.f32 %v5703_v3, %v5054_v45 }
 0x761   :  { %v7127_v34 = vadd.f32 %v5705_v13, %v2542_v15  ;;  %5564 = vmatpush3.bf16.msra.mxu1 %v5561_v27 }
 0x762   :  { %5566 = vmatprep.subr.bf16.mxu1 %v5565_v38 }
 0x763   :  { %v5057_v53 = vpop.f32.mrb[56].mxu1  ;;  %5086 = vmatprep.mubr.msk.f32.mxu0 %vm40_vm0, %v7127_v34  ;;  %5109 = vmatprep.mubr.msk.f32.mxu1 %vm40_vm0, %v7127_v34 }
 0x764   :  { %v2552_v63 = vpop.f32.mrb[57].mxu1  ;;  %5087 = vmatmul.mubr.msk.f32.gmra.mrb[58].mxu0 %vm40_vm0, %v7132_v6  ;;  %5110 = vmatmul.mubr.msk.f32.gmra.mrb[66].mxu1 %vm40_vm0, %v7132_v6  ;;  %v7150_v58 = vadd.f32 %v5707_v1, %v5057_v53 }
 0x765   :  { %v7145_v20 = vadd.f32 %v5709_v29, %v2552_v63 }
 0x767   :  { %v5060_v23 = vpop.f32.mrb[58].mxu1  ;;  %5089 = vmatprep.mubr.msk.f32.mxu0 %vm40_vm0, %v7145_v20  ;;  %5112 = vmatprep.mubr.msk.f32.mxu1 %vm40_vm0, %v7145_v20 }
 0x768   :  { %v2562_v61 = vpop.f32.mrb[59].mxu1  ;;  %5090 = vmatmul.mubr.msk.f32.gmra.mrb[60].mxu0 %vm40_vm0, %v7150_v58  ;;  %5113 = vmatmul.mubr.msk.f32.gmra.mrb[68].mxu1 %vm40_vm0, %v7150_v58  ;;  %v7165_v2 = vadd.f32 %v5711_v46, %v5060_v23 }
 0x769   :  { %v7163_v37 = vadd.f32 %v5713_v10, %v2562_v61 }
 0x76b   :  { %5092 = vmatprep.mubr.msk.f32.mxu0 %vm40_vm0, %v7163_v37  ;;  %5115 = vmatprep.mubr.msk.f32.mxu1 %vm40_vm0, %v7163_v37 }
 0x76c   :  { %5093 = vmatmul.mubr.msk.f32.gmra.mrb[62].mxu0 %vm40_vm0, %v7165_v2  ;;  %5116 = vmatmul.mubr.msk.f32.gmra.mrb[70].mxu1 %vm40_vm0, %v7165_v2 }
 0x76d   :  { %5138 = vmatprep.mubr.msk.f32.mxu0 %vm40_vm0, %v2657_v18  ;;  %5149 = vmatprep.mubr.msk.f32.mxu1 %vm40_vm0, %v6961_v24  ;;  %v4253_v24 = vld [vmem:[%s7426_s4 + $0xa] ss:$0 sm:$0xff] }
 0x770   :  { %5150 = vmatmul.mubr.msk.f32.vlgmr.msra.gmra.mrb[72].mxu1 %vm40_vm0, %v6970_v44  ;;  %v4264_v44 = vld [vmem:[%s7426_s4 + $0xb] ss:$0 sm:$0xff] }
 0x771   :  { %5568 = vmatpush3.bf16.msra.mxu1 %v5565_v38  ;;  %5160 = vmatprep.mubr.msk.f32.mxu1 %vm40_vm0, %v7085_v60 }
 0x772   :  { %5570 = vmatprep.subr.bf16.mxu1 %v5569_v31 }
 0x775   :  { %5572 = vmatpush3.bf16.msra.mxu1 %v5569_v31 }
 0x778   :  { %5161 = vmatmul.mubr.msk.f32.vlgmr.msra.gmra.mrb[74].mxu1 %vm40_vm0, %v7090_v0 }
 0x779   :  { %5163 = vmatprep.mubr.msk.f32.mxu1 %vm40_vm0, %v7109_v57 }
 0x77c   :  { %5164 = vmatmul.mubr.msk.f32.gmra.mrb[76].mxu1 %vm40_vm0, %v7114_v48 }
 0x77d   :  { %5166 = vmatprep.mubr.msk.f32.mxu1 %vm40_vm0, %v7127_v34 }
 0x780   :  { %5167 = vmatmul.mubr.msk.f32.gmra.mrb[78].mxu1 %vm40_vm0, %v7132_v6 }
 0x781   :  { %5169 = vmatprep.mubr.msk.f32.mxu1 %vm40_vm0, %v7145_v20 }
 0x784   :  { %5170 = vmatmul.mubr.msk.f32.gmra.mrb[80].mxu1 %vm40_vm0, %v7150_v58 }
 0x785   :  { %5172 = vmatprep.mubr.msk.f32.mxu1 %vm40_vm0, %v7163_v37 }
 0x788   :  { %5173 = vmatmul.mubr.msk.f32.gmra.mrb[82].mxu1 %vm40_vm0, %v7165_v2 }
 0x82f   :  { %v5082_v9 = vpop.f32.mrb[54].mxu0  ;;  %v5105_v26 = vpop.f32.mrb[62].mxu1 }
 0x830   :  { %v2776_v28 = vadd.f32 %v5082_v9, %v4253_v24  ;;  %v2900_v30 = vadd.f32 %v5105_v26, %v4264_v44  ;;  %v2770_v32 = vpop.f32.mrb[55].mxu0  ;;  %v2894_v36 = vpop.f32.mrb[63].mxu1  ;;  %v7235_v26 = vld [vmem:[%s7426_s4 + $0xc] ss:$0 sm:$0xff] }
 0x831   :  { %v2771_v40 = vadd.f32 %v4253_v24, %v2770_v32  ;;  %v2895_v51 = vadd.f32 %v4264_v44, %v2894_v36 }
 0x833   :  { %v5527_v54 = vpack.c.bf16 %v2776_v28, %v2771_v40  ;;  %v7214_v62 = vpack.c.bf16 %v2900_v30, %v2895_v51  ;;  %v5085_v14 = vpop.f32.mrb[56].mxu0  ;;  %v5108_v59 = vpop.f32.mrb[64].mxu1 }
 0x834   :  { %v2786_v55 = vadd.f32 %v5085_v14, %v4253_v24  ;;  %v2910_v11 = vadd.f32 %v5108_v59, %v4264_v44  ;;  %v2780_v43 = vpop.f32.mrb[57].mxu0  ;;  %v2904_v52 = vpop.f32.mrb[65].mxu1 }
 0x835   :  { %v2781_v4 = vadd.f32 %v4253_v24, %v2780_v43  ;;  %v2905_v25 = vadd.f32 %v4264_v44, %v2904_v52  ;;  %5529 = vmatprep.subr.msk.bf16.mxu0 %vm6421_vm5, %v5527_v54  ;;  %v3284_v52 = vld [vmem:[%s7425_s3 + $0x1c0] sm:$0xff] }
 0x836   :  { %5532 = vmatpush3.bf16.xpose.msk.msra.mxu0 %vm6421_vm5, %v5527_v54 }
 0x837   :  { %v5533_v19 = vpack.c.bf16 %v2786_v55, %v2781_v4  ;;  %v7220_v27 = vpack.c.bf16 %v2910_v11, %v2905_v25  ;;  %v5088_v12 = vpop.f32.mrb[58].mxu0  ;;  %v5111_v8 = vpop.f32.mrb[66].mxu1  ;;  %v3285_v4 = vld [vmem:[%s7425_s3 + $0x1c8] sm:$0xff] }
 0x838   :  { %v2796_v35 = vadd.f32 %v5088_v12, %v4253_v24  ;;  %v2920_v56 = vadd.f32 %v5111_v8, %v4264_v44  ;;  %v2790_v5 = vpop.f32.mrb[59].mxu0  ;;  %v2914_v13 = vpop.f32.mrb[67].mxu1  ;;  %v5573_v8 = vpack.c.bf16 %v3285_v4, %v3284_v52 }
 0x839   :  { %v2791_v41 = vadd.f32 %v4253_v24, %v2790_v5  ;;  %v2915_v3 = vadd.f32 %v4264_v44, %v2914_v13  ;;  %5535 = vmatprep.subr.msk.bf16.mxu0 %vm6421_vm5, %v5533_v19 }
 0x83b   :  { %v5539_v38 = vpack.c.bf16 %v2796_v35, %v2791_v41  ;;  %v7224_v45 = vpack.c.bf16 %v2920_v56, %v2915_v3  ;;  %v5091_v15 = vpop.f32.mrb[60].mxu0  ;;  %v5114_v39 = vpop.f32.mrb[68].mxu1 }
 0x83c   :  { %v2806_v29 = vadd.f32 %v5091_v15, %v4253_v24  ;;  %v2930_v42 = vadd.f32 %v5114_v39, %v4264_v44  ;;  %v2800_v1 = vpop.f32.mrb[61].mxu0  ;;  %v2924_v53 = vpop.f32.mrb[69].mxu1  ;;  %v3286_v15 = vld [vmem:[%s7425_s3 + $0x1d0] sm:$0xff]  ;;  %v3287_v39 = vld [vmem:[%s7425_s3 + $0x1d8] sm:$0xff] }
 0x83d   :  { %v2801_v63 = vadd.f32 %v4253_v24, %v2800_v1  ;;  %v2925_v16 = vadd.f32 %v4264_v44, %v2924_v53  ;;  %v5577_v53 = vpack.c.bf16 %v3287_v39, %v3286_v15 }
 0x83e   :  { %5538 = vmatpush3.bf16.xpose.msk.msra.mxu0 %vm6421_vm5, %v5533_v19 }
 0x83f   :  { %v5545_v10 = vpack.c.bf16 %v2806_v29, %v2801_v63  ;;  %v7228_v17 = vpack.c.bf16 %v2930_v42, %v2925_v16  ;;  %v5094_v46 = vpop.f32.mrb[62].mxu0  ;;  %v5117_v23 = vpop.f32.mrb[70].mxu1  ;;  %5541 = vmatprep.subr.msk.bf16.mxu0 %vm6421_vm5, %v5539_v38 }
 0x840   :  { %v2816_v61 = vadd.f32 %v5094_v46, %v4253_v24  ;;  %v2940_v18 = vadd.f32 %v5117_v23, %v4264_v44  ;;  %v2810_v33 = vpop.f32.mrb[63].mxu0  ;;  %v2934_v22 = vpop.f32.mrb[71].mxu1 }
 0x841   :  { %v2811_v31 = vadd.f32 %v4253_v24, %v2810_v33  ;;  %v2935_v9 = vadd.f32 %v4264_v44, %v2934_v22  ;;  %v4290_v24 = vld [vmem:[%s7426_s4 + $0xd] ss:$0 sm:$0xff] }
 0x843   :  { %v5551_v28 = vpack.c.bf16 %v2816_v61, %v2811_v31  ;;  %v7237_v30 = vpack.c.bf16 %v2940_v18, %v2935_v9  ;;  %v7239_v32 = vpop.f32.mrb[72].mxu1  ;;  %v4301_v18 = vld [vmem:[%s7426_s4 + $0xe] ss:$0 sm:$0xff] }
 0x844   :  { %v3151_v36 = vpop.f32.mrb[73].mxu1 }
 0x845   :  { %v3152_v40 = vadd.f32 %v7235_v26, %v3151_v36 }
 0x846   :  { %5544 = vmatpush3.bf16.xpose.msk.msra.mxu0 %vm6421_vm5, %v5539_v38 }
 0x847   :  { %5547 = vmatprep.subr.msk.bf16.mxu0 %vm6421_vm5, %v5545_v10  ;;  %5218 = vmatprep.mubr.msk.f32.mxu1 %vm40_vm0, %v3152_v40 }
 0x84b   :  { %v5162_v44 = vpop.f32.mrb[74].mxu1 }
 0x84c   :  { %v3241_v51 = vadd.f32 %v5162_v44, %v4290_v24  ;;  %v3235_v54 = vpop.f32.mrb[75].mxu1 }
 0x84d   :  { %v3236_v14 = vadd.f32 %v4290_v24, %v3235_v54 }
 0x84e   :  { %5550 = vmatpush3.bf16.xpose.msk.msra.mxu0 %vm6421_vm5, %v5545_v10 }
 0x84f   :  { %v5581_v59 = vpack.c.bf16 %v3241_v51, %v3236_v14  ;;  %v5165_v55 = vpop.f32.mrb[76].mxu1  ;;  %5553 = vmatprep.subr.msk.bf16.mxu0 %vm6421_vm5, %v5551_v28 }
 0x850   :  { %v3251_v11 = vadd.f32 %v5165_v55, %v4290_v24  ;;  %v3245_v43 = vpop.f32.mrb[77].mxu1 }
 0x851   :  { %v3246_v25 = vadd.f32 %v4290_v24, %v3245_v43  ;;  %5583 = vmatprep.subr.msk.bf16.mxu1 %vm6421_vm5, %v5581_v59 }
 0x852   :  { %5586 = vmatpush3.bf16.xpose.msk.msra.mxu1 %vm6421_vm5, %v5581_v59 }
 0x853   :  { %v5587_v19 = vpack.c.bf16 %v3251_v11, %v3246_v25  ;;  %v5168_v12 = vpop.f32.mrb[78].mxu1 }
 0x854   :  { %v3261_v35 = vadd.f32 %v5168_v12, %v4290_v24  ;;  %v3255_v56 = vpop.f32.mrb[79].mxu1 }
 0x855   :  { %v3256_v5 = vadd.f32 %v4290_v24, %v3255_v56  ;;  %5589 = vmatprep.subr.msk.bf16.mxu1 %vm6421_vm5, %v5587_v19 }
 0x856   :  { %5556 = vmatpush3.bf16.xpose.msk.msra.mxu0 %vm6421_vm5, %v5551_v28 }
 0x857   :  { %v5593_v13 = vpack.c.bf16 %v3261_v35, %v3256_v5  ;;  %v5171_v41 = vpop.f32.mrb[80].mxu1  ;;  %5574 = vmatprep.subr.bf16.mxu0 %v5573_v8  ;;  %v307_v5 = vsel %vm305_vm13, 0.0, %v5912_v47 }
 0x858   :  { %v3271_v3 = vadd.f32 %v5171_v41, %v4290_v24  ;;  %v3265_v38 = vpop.f32.mrb[81].mxu1 }
 0x859   :  { %v3266_v29 = vadd.f32 %v4290_v24, %v3265_v38 }
 0x85a   :  { %5592 = vmatpush3.bf16.xpose.msk.msra.mxu1 %vm6421_vm5, %v5587_v19 }
 0x85b   :  { %v5599_v42 = vpack.c.bf16 %v3271_v3, %v3266_v29  ;;  %v5174_v1 = vpop.f32.mrb[82].mxu1  ;;  %5595 = vmatprep.subr.msk.bf16.mxu1 %vm6421_vm5, %v5593_v13 }
 0x85c   :  { %v3281_v63 = vadd.f32 %v5174_v1, %v4290_v24  ;;  %v3275_v16 = vpop.f32.mrb[83].mxu1 }
 0x85d   :  { %v3276_v10 = vadd.f32 %v4290_v24, %v3275_v16  ;;  %5139 = vmatmul.mubr.msk.f32.vlgmr.msra.gmra.mrb[64].mxu0 %vm40_vm0, %v7015_v7  ;;  %v3157_v7 = vadd.f32 %v7239_v32, %v7235_v26 }
 0x85e   :  { %5576 = vmatpush3.bf16.msra.mxu0 %v5573_v8  ;;  %5183 = vmatprep.mubr.msk.f32.mxu0 %vm40_vm0, %v7085_v60  ;;  %v308_v8 = vsel %vm306_vm11, 0.0, %v5912_v47 }
 0x85f   :  { %v5605_v46 = vpack.c.bf16 %v3281_v63, %v3276_v10  ;;  %5578 = vmatprep.subr.bf16.mxu0 %v5577_v53 }
 0x862   :  { %5598 = vmatpush3.bf16.xpose.msk.msra.mxu1 %vm6421_vm5, %v5593_v13  ;;  %5580 = vmatpush3.bf16.msra.mxu0 %v5577_v53 }
 0x863   :  { %5601 = vmatprep.subr.msk.bf16.mxu1 %vm6421_vm5, %v5599_v42 }
 0x865   :  { %5184 = vmatmul.mubr.msk.f32.vlgmr.msra.gmra.mrb[66].mxu0 %vm40_vm0, %v7090_v0 }
 0x866   :  { %5186 = vmatprep.mubr.msk.f32.mxu0 %vm40_vm0, %v7109_v57 }
 0x869   :  { %5187 = vmatmul.mubr.msk.f32.gmra.mrb[68].mxu0 %vm40_vm0, %v7114_v48 }
 0x86a   :  { %5604 = vmatpush3.bf16.xpose.msk.msra.mxu1 %vm6421_vm5, %v5599_v42  ;;  %5189 = vmatprep.mubr.msk.f32.mxu0 %vm40_vm0, %v7127_v34 }
 0x86b   :  { %5607 = vmatprep.subr.msk.bf16.mxu1 %vm6421_vm5, %v5605_v46 }
 0x86d   :  { %5190 = vmatmul.mubr.msk.f32.gmra.mrb[70].mxu0 %vm40_vm0, %v7132_v6 }
 0x86e   :  { %5192 = vmatprep.mubr.msk.f32.mxu0 %vm40_vm0, %v7145_v20 }
 0x871   :  { %5193 = vmatmul.mubr.msk.f32.gmra.mrb[72].mxu0 %vm40_vm0, %v7150_v58 }
 0x872   :  { %5610 = vmatpush3.bf16.xpose.msk.msra.mxu1 %vm6421_vm5, %v5605_v46  ;;  %5195 = vmatprep.mubr.msk.f32.mxu0 %vm40_vm0, %v7163_v37 }
 0x875   :  { %5196 = vmatmul.mubr.msk.f32.gmra.mrb[74].mxu0 %vm40_vm0, %v7165_v2 }
 0x879   :  { %5219 = vmatmul.mubr.msk.f32.vlgmr.msra.gmra.mrb[84].mxu1 %vm40_vm0, %v3157_v7 }
 0x930   :  { %v5140_v23 = vpop.f32.mrb[64].mxu0 }
 0x931   :  { %v3045_v61 = vpop.f32.mrb[65].mxu0  ;;  %v3051_v38 = vadd.f32 %v5140_v23, %v308_v8 }
 0x932   :  { %v3046_v39 = vadd.f32 %v3045_v61, %v307_v5 }
 0x933   :  { %v3057_v42 = vsel %vm1054_vm12, %v3051_v38, -inf }
 0x934   :  { %v3054_v47 = vsel %vm1054_vm12, %v3046_v39, -inf }
 0x938   :  { %v5185_v33 = vpop.f32.mrb[66].mxu0 }
 0x939   :  { %v3365_v21 = vadd.f32 %v5185_v33, %v4301_v18  ;;  %v3359_v22 = vpop.f32.mrb[67].mxu0 }
 0x93a   :  { %v3360_v31 = vadd.f32 %v4301_v18, %v3359_v22 }
 0x93c   :  { %v5611_v9 = vpack.c.bf16 %v3365_v21, %v3360_v31  ;;  %v5188_v28 = vpop.f32.mrb[68].mxu0 }
 0x93d   :  { %v3375_v36 = vadd.f32 %v5188_v28, %v4301_v18  ;;  %v3369_v40 = vpop.f32.mrb[69].mxu0 }
 0x93e   :  { %v3370_v24 = vadd.f32 %v4301_v18, %v3369_v40  ;;  %5612 = vmatprep.subr.bf16.mxu0 %v5611_v9 }
 0x93f   :  { %5614 = vmatpush3.bf16.msra.mxu0 %v5611_v9 }
 0x940   :  { %v5615_v26 = vpack.c.bf16 %v3375_v36, %v3370_v24  ;;  %v5191_v32 = vpop.f32.mrb[70].mxu0 }
 0x941   :  { %v3385_v44 = vadd.f32 %v5191_v32, %v4301_v18  ;;  %v3379_v51 = vpop.f32.mrb[71].mxu0  ;;  %v3703_v32 = vld [vmem:[%s7425_s3 + $0x1e0] sm:$0xff] }
 0x942   :  { %v3380_v54 = vadd.f32 %v4301_v18, %v3379_v51  ;;  %5616 = vmatprep.subr.bf16.mxu0 %v5615_v26  ;;  %v3705_v51 = vld [vmem:[%s7425_s3 + $0x1f0] sm:$0xff] }
 0x943   :  { %5618 = vmatpush3.bf16.msra.mxu0 %v5615_v26 }
 0x944   :  { %v5619_v14 = vpack.c.bf16 %v3385_v44, %v3380_v54  ;;  %v5194_v59 = vpop.f32.mrb[72].mxu0  ;;  %v3704_v44 = vld [vmem:[%s7425_s3 + $0x1e8] sm:$0xff] }
 0x945   :  { %v3395_v55 = vadd.f32 %v5194_v59, %v4301_v18  ;;  %v3389_v11 = vpop.f32.mrb[73].mxu0  ;;  %v5651_v54 = vpack.c.bf16 %v3704_v44, %v3703_v32 }
 0x946   :  { %v3390_v43 = vadd.f32 %v4301_v18, %v3389_v11  ;;  %5620 = vmatprep.subr.bf16.mxu0 %v5619_v14 }
 0x947   :  { %5622 = vmatpush3.bf16.msra.mxu0 %v5619_v14  ;;  %v3706_v14 = vld [vmem:[%s7425_s3 + $0x1f8] sm:$0xff]  ;;  %5652 = vmatprep.subr.bf16.mxu1 %v5651_v54 }
 0x948   :  { %v5623_v52 = vpack.c.bf16 %v3395_v55, %v3390_v43  ;;  %v5197_v4 = vpop.f32.mrb[74].mxu0  ;;  %v5655_v59 = vpack.c.bf16 %v3706_v14, %v3705_v51  ;;  %5654 = vmatpush3.bf16.msra.mxu1 %v5651_v54 }
 0x949   :  { %v3405_v25 = vadd.f32 %v5197_v4, %v4301_v18  ;;  %v3399_v19 = vpop.f32.mrb[75].mxu0 }
 0x94a   :  { %v3400_v12 = vadd.f32 %v4301_v18, %v3399_v19  ;;  %5624 = vmatprep.subr.bf16.mxu0 %v5623_v52  ;;  %5656 = vmatprep.subr.bf16.mxu1 %v5655_v59 }
 0x94b   :  { %5626 = vmatpush3.bf16.msra.mxu0 %v5623_v52 }
 0x94c   :  { %v5627_v35 = vpack.c.bf16 %v3405_v25, %v3400_v12  ;;  %v5220_v56 = vpop.f32.mrb[84].mxu1  ;;  %5658 = vmatpush3.bf16.msra.mxu1 %v5655_v59 }
 0x94d   :  { %v3516_v13 = vadd.f32 %v5220_v56, %v308_v8  ;;  %v3510_v41 = vpop.f32.mrb[85].mxu1  ;;  %v5659_v56 = vpack.c.bf16 %v7090_v0, %v7085_v60  ;;  %v5675_v60 = vpack.c.bf16 %v7165_v2, %v7163_v37  ;;  %v476_v0 = vmul.f32 0.2, %v6163_v50  ;;  %v3882_v50 = vld [vmem:[%s7427_s5 + $0x30] sm:$0xff]  ;;  %v3876_v2 = vld [vmem:[%s7427_s5] sm:$0xff] }
 0x94e   :  { %v3511_v3 = vadd.f32 %v3510_v41, %v307_v5  ;;  %5628 = vmatprep.subr.bf16.mxu0 %v5627_v35  ;;  %v475_v5 = vmul.f32 0.2, %v6158_v49  ;;  %v5671_v49 = vpack.c.bf16 %v7150_v58, %v7145_v20  ;;  %v3883_v58 = vld [vmem:[%s7427_s5 + $0x38] sm:$0xff] }
 0x94f   :  { %v3522_v15 = vsel %vm1054_vm12, %v3516_v13, -inf  ;;  %5630 = vmatpush3.bf16.msra.mxu0 %v5627_v35  ;;  %v5683_v37 = vpack.c.bf16 %v3883_v58, %v3882_v50 }
 0x950   :  { %3523 = vmax.xlane.f32.xlu1 %v3522_v15  ;;  %v3519_v29 = vsel %vm1054_vm12, %v3511_v3, -inf  ;;  %5632 = vmatprep.subr.bf16.mxu0 %v7214_v62 }
 0x951   :  { %3520 = vmax.xlane.f32.xlu0 %v3519_v29 }
 0x954   :  { %3058 = vmax.xlane.f32.xlu1 %v3057_v42 }
 0x955   :  { %3055 = vmax.xlane.f32.xlu0 %v3054_v47  ;;  %v3878_v47 = vld [vmem:[%s7427_s5 + $0x10] sm:$0xff] }
 0x9dd   :  { %v3524_v1 = vpop.xlane.xlu1 %3523 }
 0x9de   :  { %v3526_v53 = vsub.f32 %v3516_v13, %v3524_v1  ;;  %v3521_v63 = vpop.xlane.xlu0 %3520  ;;  %v3879_v1 = vld [vmem:[%s7427_s5 + $0x18] sm:$0xff] }
 0x9df   :  { %v3525_v16 = vsub.f32 %v3511_v3, %v3521_v63 }
 0x9e0   :  { %v3529_v10 = vmul.f32 1.442695, %v3526_v53  ;;  %v5884_v53 = vld [vmem:[%s7423_s1] sm:$0xff] }
 0x9e1   :  { %v3527_v46 = vmul.f32 1.442695, %v3525_v16  ;;  %v3059_v7 = vpop.xlane.xlu1 %3058  ;;  %v5885_v16 = vld [vmem:[%s7423_s1 + $0x8] sm:$0xff]  ;;  %s5913_s1 = smov [#allocation2]  }
 0x9e2   :  { %5849 = vpow2.f32 %v3529_v10  ;;  %v3061_v23 = vsub.f32 %v3051_v38, %v3059_v7  ;;  %v3056_v61 = vpop.xlane.xlu0 %3055  ;;  %v4328_v38 = vld [vmem:[%s7426_s4 + $0xf] ss:$0 sm:$0xff]  ;;  %v4337_v7 = vld [vmem:[%s7428_s6] ss:$0 sm:$0xff]  ;;  %s4074_s13 = sshll.u32 %s5913_s1, 4  ;;  %s4075_s13 = int_to_ptr.vmem [resolvable:$true] %s4074_s13 }
 0x9e3   :  { %5851 = vpow2.f32 %v3527_v46  ;;  %v3060_v18 = vsub.f32 %v3046_v39, %v3056_v61  ;;  %v5691_v46 = vpack.c.bf16 %v3879_v1, %v3878_v47  ;;  %s5886_s6 = scalar_lea.vmem %s4075_s13, 256  ;;  %p5891_p1 = scmp.lt.s32.totalorder %s4075_s13, %s4075_s13 }
 0x9e4   :  { %v3064_v33 = vmul.f32 1.442695, %v3061_v23  ;;  %p5887_p0 = scmp.ne.s32.totalorder %s4075_s13, %s5886_s6  ;;  %p5892_p2 = scmp.lt.s32.totalorder %s5886_s6, %s5886_s6 }
 0x9e5   :  { %v3062_v21 = vmul.f32 1.442695, %v3060_v18 }
 0x9e6   :  { %5853 = vpow2.f32 %v3064_v33  ;;  %p5893_p3 = por %p5892_p2, %p5891_p1 }
 0x9e7   :  { %5855 = vpow2.f32 %v3062_v21 }
 0x9e8   :  { %p5894_p4 = pnand %p5893_p3, %p5887_p0 }
 0x9ec   :  { %v5850_v22 = vpop.eup %5849 }
 0x9ed   :  { %v5852_v31 = vpop.eup %5851  ;;  %v3534_v9 = vsel %vm1054_vm12, %v5850_v22, 0.0 }
 0x9ee   :  { %3535 = vadd.xlane.f32.xlu1 %v3534_v9  ;;  %v3531_v28 = vsel %vm1054_vm12, %v5852_v31, 0.0 }
 0x9ef   :  { %3532 = vadd.xlane.f32.xlu0 %v3531_v28 }
 0x9f0   :  { %v5854_v36 = vpop.eup %5853 }
 0x9f1   :  { %v5856_v40 = vpop.eup %5855  ;;  %v3069_v24 = vsel %vm1054_vm12, %v5854_v36, 0.0 }
 0x9f2   :  { %3070 = vadd.xlane.f32.xlu1 %v3069_v24  ;;  %v3066_v26 = vsel %vm1054_vm12, %v5856_v40, 0.0 }
 0x9f3   :  { %3067 = vadd.xlane.f32.xlu0 %v3066_v26 }
 0xa7b   :  { %v3536_v55 = vpop.xlane.xlu1 %3535 }
 0xa7c   :  { %5857 = vrcp.f32 %v3536_v55  ;;  %v3533_v11 = vpop.xlane.xlu0 %3532 }
 0xa7d   :  { %5859 = vrcp.f32 %v3533_v11 }
 0xa7f   :  { %v3071_v35 = vpop.xlane.xlu1 %3070 }
 0xa80   :  { %v3068_v43 = vpop.xlane.xlu0 %3067 }
 0xa81   :  { %5861 = vrcp.f32 %v3068_v43 }
 0xa82   :  { %5863 = vrcp.f32 %v3071_v35 }
 0xa86   :  { %v5858_v52 = vpop.eup %5857 }
 0xa87   :  { %v5860_v4 = vpop.eup %5859  ;;  %v3540_v19 = vmul.f32 %v5858_v52, %v5850_v22 }
 0xa88   :  { %v3539_v25 = vmul.f32 %v5860_v4, %v5852_v31 }
 0xa8a   :  { %5241 = vmatprep.mubr.msk.f32.mxu0 %vm1054_vm12, %v3539_v25 }
 0xa8b   :  { %v5862_v12 = vpop.eup %5861  ;;  %5242 = vmatmul.mubr.msk.f32.vlgmr.msra.gmra.mrb[76].mxu0 %vm1054_vm12, %v3540_v19 }
 0xa8c   :  { %5634 = vmatpush3.bf16.msra.mxu0 %v7214_v62  ;;  %v3074_v8 = vmul.f32 %v5862_v12, %v5856_v40  ;;  %v5864_v62 = vpop.eup %5863 }
 0xa8d   :  { %5636 = vmatprep.subr.bf16.mxu0 %v7220_v27  ;;  %v3075_v13 = vmul.f32 %v5864_v62, %v5854_v36 }
 0xa8e   :  { %5264 = vmatprep.mubr.msk.f32.mxu0 %vm1054_vm12, %v3074_v8 }
 0xa90   :  { %5638 = vmatpush3.bf16.msra.mxu0 %v7220_v27  ;;  %v5663_v27 = vpack.c.bf16 %v7114_v48, %v7109_v57  ;;  %v3880_v57 = vld [vmem:[%s7427_s5 + $0x20] sm:$0xff]  ;;  %v3881_v48 = vld [vmem:[%s7427_s5 + $0x28] sm:$0xff] }
 0xa91   :  { %5640 = vmatprep.subr.bf16.mxu0 %v7224_v45 }
 0xa94   :  { %5642 = vmatpush3.bf16.msra.mxu0 %v7224_v45  ;;  %v5667_v45 = vpack.c.bf16 %v7132_v6, %v7127_v34  ;;  %v5679_v34 = vpack.c.bf16 %v3881_v48, %v3880_v57 }
 0xa95   :  { %5644 = vmatprep.subr.bf16.mxu0 %v7228_v17 }
 0xa96   :  { %5680 = vmatprep.subr.bf16.mxu1 %v5679_v34 }
 0xa98   :  { %5646 = vmatpush3.bf16.msra.mxu0 %v7228_v17  ;;  %v3877_v17 = vld [vmem:[%s7427_s5 + $0x8] sm:$0xff] }
 0xa99   :  { %5648 = vmatprep.subr.bf16.mxu0 %v7237_v30 }
 0xa9c   :  { %5650 = vmatpush3.bf16.msra.mxu0 %v7237_v30  ;;  %v5687_v30 = vpack.c.bf16 %v3877_v17, %v3876_v2 }
 0xa9d   :  { %5660 = vmatprep.subr.bf16.mxu0 %v5659_v56 }
 0xa9f   :  { %5265 = vmatmul.mubr.msk.f32.vlgmr.msra.gmra.mrb[76].mxu0 %vm1054_vm12, %v3075_v13 }
 0xaa0   :  { %5662 = vmatpush3.bf16.msra.mxu0 %v5659_v56  ;;  %5298 = vmatprep.mubr.msk.f32.mxu0 %vm1054_vm12, %v475_v5 }
 0xaa1   :  { %5664 = vmatprep.subr.bf16.mxu0 %v5663_v27 }
 0xaa4   :  { %5666 = vmatpush3.bf16.msra.mxu0 %v5663_v27 }
 0xaa5   :  { %5668 = vmatprep.subr.bf16.mxu0 %v5667_v45 }
 0xaa8   :  { %5670 = vmatpush3.bf16.msra.mxu0 %v5667_v45 }
 0xaa9   :  { %5672 = vmatprep.subr.bf16.mxu0 %v5671_v49 }
 0xaac   :  { %5674 = vmatpush3.bf16.msra.mxu0 %v5671_v49 }
 0xaad   :  { %5676 = vmatprep.subr.bf16.mxu0 %v5675_v60 }
 0xab0   :  { %5678 = vmatpush3.bf16.msra.mxu0 %v5675_v60 }
 0xab3   :  { %5299 = vmatmul.mubr.msk.f32.vlgmr.msra.gmra.mrb[78].mxu0 %vm1054_vm12, %v476_v0 }
 0xb72   :  { %v5266_v6 = vpop.f32.mrb[76].mxu0 }
 0xb73   :  { %v3694_v20 = vpop.f32.mrb[77].mxu0 }
 0xb74   :  { %5275 = vmatprep.mubr.msk.f32.mxu1 %vm40_vm0, %v3694_v20 }
 0xb75   :  { %5276 = vmatmul.mubr.msk.f32.vlgmr.msra.gmra.mrb[86].mxu1 %vm40_vm0, %v5266_v6 }
 0xb76   :  { %5682 = vmatpush3.bf16.msra.mxu1 %v5679_v34 }
 0xb77   :  { %5684 = vmatprep.subr.bf16.mxu1 %v5683_v37 }
 0xb7a   :  { %5686 = vmatpush3.bf16.msra.mxu1 %v5683_v37 }
 0xb7b   :  { %5688 = vmatprep.subr.bf16.mxu1 %v5687_v30 }
 0xb86   :  { %v5300_v41 = vpop.f32.mrb[78].mxu0 }
 0xb87   :  { %v3867_v3 = vpop.f32.mrb[79].mxu0 }
 0xc48   :  { %v5277_v15 = vpop.f32.mrb[86].mxu1 }
 0xc49   :  { %v3790_v39 = vadd.f32 %v5277_v15, %v4328_v38  ;;  %v3784_v29 = vpop.f32.mrb[87].mxu1 }
 0xc4a   :  { %v3785_v42 = vadd.f32 %v4328_v38, %v3784_v29 }
 0xc4b   :  { %v3794_v10 = vadd.f32 %v5885_v16, %v3790_v39 }
 0xc4c   :  { %v3793_v63 = vadd.f32 %v5884_v53, %v3785_v42 }
 0xc4e   :  { %5309 = vmatprep.mubr.msk.f32.mxu1 %vm40_vm0, %v3793_v63 }
 0xc4f   :  { %5310 = vmatmul.mubr.msk.f32.vlgmr.msra.gmra.mrb[88].mxu1 %vm40_vm0, %v3794_v10 }
 0xc50   :  { %5690 = vmatpush3.bf16.msra.mxu1 %v5687_v30  ;;  %5320 = vmatprep.mubr.msk.f32.mxu1 %vm40_vm0, %v3867_v3 }
 0xc51   :  { %5692 = vmatprep.subr.bf16.mxu1 %v5691_v46 }
 0xc54   :  { %5694 = vmatpush3.bf16.msra.mxu1 %v5691_v46 }
 0xc57   :  { %5321 = vmatmul.mubr.msk.f32.vlgmr.msra.gmra.mrb[88].mxu1 %vm40_vm0, %v5300_v41 }
 0xd2a   :  { %v5322_v23 = vpop.f32.mrb[88].mxu1 }
 0xd2b   :  { %v4054_v61 = vadd.f32 %v5322_v23, %v4337_v7  ;;  %v4037_v18 = vpop.f32.mrb[89].mxu1 }
 0xd2c   :  { %v4053_v33 = vadd.f32 %v4337_v7, %v4037_v18 }
 0xd2d   :  { %v4339_v21 = vmul.f32 -1.442695, %v4054_v61 }
 0xd2e   :  { %v4338_v22 = vmul.f32 -1.442695, %v4053_v33 }
 0xd2f   :  { %5865 = vpow2.f32 %v4339_v21 }
 0xd30   :  { %5867 = vpow2.f32 %v4338_v22 }
 0xd39   :  { %v5866_v31 = vpop.eup %5865 }
 0xd3a   :  { %v5868_v9 = vpop.eup %5867  ;;  %v4062_v28 = vadd.f32 1.0, %v5866_v31 }
 0xd3b   :  { %v4061_v36 = vadd.f32 1.0, %v5868_v9 }
 0xd3c   :  { %5869 = vrcp.f32 %v4062_v28 }
 0xd3d   :  { %5871 = vrcp.f32 %v4061_v36 }
 0xd46   :  { %v5870_v40 = vpop.eup %5869 }
 0xd47   :  { %v5872_v24 = vpop.eup %5871  ;;  %4068 = vst [vmem:[#allocation2 + $0x8] sm:$0xff] %v5870_v40 }
 0xd48   :  { %4067 = vst [vmem:[#allocation2] sm:$0xff] %v5872_v24 }
 0xd49   :  { %5897 = shalt.err (!%p5894_p4)
}
 0xd4a   :  { %s5898_s16 = scalar_lea.hbm %s7429_s7, 256 }
 0xd4b   :  { %p5899_p5 = scmp.ne.s32.totalorder %s7429_s7, %s5898_s16  ;;  %p5902_p6 = scmp.lt.u32.totalorder %s5898_s16, %s7429_s7 }
 0xd4d   :  { %p5904_p7 = pnand %p5902_p6, %p5899_p5 }
 0xd4f   :  { %5907 = shalt.err (!%p5904_p7)
}
 0xd50   :  { %s5914_s19 = smov 128   ;;  %s5915_s20 = smov 8  }
 0xd51   :  { %4080 = dma.vmem_to_hbm [thread:$0]  %s4075_s13, 256, %s7429_s7, [#allocation3], %s5914_s19, %s5914_s19, %s5915_s20  }
 0xd52   :  { %5908 = dma.done.wait [#allocation3], 256  }
 0xd53   :  { %5909 = vsyncadd [#allocation3], 4294967040 }
 0xd54   :  { %4084 = vsyncpa [#allocation3], 1 }

</bundles_post_ra>
